<compile_context>
chip_gen: v7x
topology: tpu7x:2x2x1
jax: 0.10.0
libtpu: 0.0.40
codegen_flags: <defaults>
</compile_context>

<pallas_src>
import jax
import jax.numpy as jnp
from jax import lax
from jax.experimental import pallas as pl
from jax.experimental.pallas import tpu as pltpu

# ---------------------------------------------------------------- model sizes
B, F, T = 2, 16, 8          # batch, frequency bins, time frames
C = 16                      # hid_feature (encoder channels)
D_INNER = 32                # mamba expanded dim
D_STATE = 8                 # SSM state size
D_CONV = 4                  # mamba depthwise conv width
DT_RANK = 4
NUM_BLOCKS = 2              # num_tfmamba (small for the synthetic test)
HYPER_DIM = 8
BETA = 2.0                  # learnable-sigmoid beta


def _sigmoid(x):
    return 1.0 / (1.0 + jnp.exp(-x))


# -------------------------------------------------- encoder (two fused 1x1s)
def _encoder_kernel(x_ref, w1_ref, b1_ref, a1_ref, w2_ref, b2_ref, a2_ref,
                    o_ref):
    h = jnp.dot(x_ref[...], w1_ref[...],
                preferred_element_type=jnp.float32) + b1_ref[...]
    h = jnp.where(h >= 0.0, h, a1_ref[...] * h)          # PReLU
    y = jnp.dot(h, w2_ref[...],
                preferred_element_type=jnp.float32) + b2_ref[...]
    o_ref[...] = jnp.where(y >= 0.0, y, a2_ref[...] * y)  # PReLU


def encoder(x2, w1, b1, a1, w2, b2, a2):
    M, Cin = x2.shape
    Ch = w1.shape[1]
    spec = lambda s: pl.BlockSpec(s, lambda i: (0, 0))
    return pl.pallas_call(
        _encoder_kernel,
        grid=(1,),
        in_specs=[spec((M, Cin)), spec((Cin, Ch)), spec((1, Ch)),
                  spec((1, Ch)), spec((Ch, Ch)), spec((1, Ch)), spec((1, Ch))],
        out_specs=spec((M, Ch)),
        out_shape=jax.ShapeDtypeStruct((M, Ch), jnp.float32),
    )(x2, w1, b1.reshape(1, Ch), a1, w2, b2.reshape(1, Ch), a2)


# ---------------------------------------------------------- fused Mamba block
def _mamba_kernel(x_ref, w_in_x_ref, w_in_z_ref, b_in_x_ref, b_in_z_ref,
                  w_conv_ref, b_conv_ref,
                  w_xb_ref, b_xb_ref, w_xc_ref, b_xc_ref,
                  w_dt_ref, b_dt_ref, a_ref, d_ref,
                  w_out_ref, b_out_ref, o_ref):
    L, d_model = x_ref.shape
    K = w_conv_ref.shape[0]
    Nst, Din = a_ref.shape

    x = x_ref[...]                                                # (L, C)

    # ---- in_proj (weights pre-split in the wrapper -> no lane slicing here)
    xin = jnp.dot(x, w_in_x_ref[...],
                  preferred_element_type=jnp.float32) + b_in_x_ref[...]
    z = jnp.dot(x, w_in_z_ref[...],
                preferred_element_type=jnp.float32) + b_in_z_ref[...]
    zs = z * _sigmoid(z)            # SiLU gate, hoisted out of the scan loop

    # ---- depthwise causal conv1d + SiLU.  The causal zero padding is
    #      expressed with banded shift matrices so everything stays in vregs.
    ii = lax.broadcasted_iota(jnp.int32, (L, L), 0)
    jj = lax.broadcasted_iota(jnp.int32, (L, L), 1)
    acc = xin * w_conv_ref[K - 1:K, :]                            # offset-0 tap
    for k in range(K - 1):                                        # static unroll
        off = K - 1 - k
        shift = jnp.where(jj == ii - off, 1.0, 0.0)               # (L, L) band
        acc = acc + jnp.dot(shift, xin,
                            preferred_element_type=jnp.float32) * \
            w_conv_ref[k:k + 1, :]
    xc = acc + b_conv_ref[...]
    xc = xc * _sigmoid(xc)                                        # (L, Din)

    # ---- input-dependent SSM parameters (B/C stay (L, Nst); no HBM broadcast)
    Bm = jnp.dot(xc, w_xb_ref[...],
                 preferred_element_type=jnp.float32) + b_xb_ref[...]   # (L,Nst)
    Cm = jnp.dot(xc, w_xc_ref[...],
                 preferred_element_type=jnp.float32) + b_xc_ref[...]   # (L,Nst)
    dt_pre = jnp.dot(xc, w_dt_ref[...],
                     preferred_element_type=jnp.float32) + b_dt_ref[...]
    # numerically stable softplus
    dt = jnp.maximum(dt_pre, 0.0) + jnp.log(1.0 + jnp.exp(-jnp.abs(dt_pre)))

    A = a_ref[...]                                                # (Nst, Din)<0
    BmT = jnp.transpose(Bm)                                       # (Nst, L)
    dtu = dt * xc                                                 # (L, Din)

    # ---- sequential selective scan, fully unrolled (L is small & static);
    #      y rows are assembled in vregs (no per-step stores / re-reads).
    row_t = lax.broadcasted_iota(jnp.int32, (L, Din), 0)
    h = jnp.zeros((Nst, Din), jnp.float32)
    y = jnp.zeros((L, Din), jnp.float32)
    for t in range(L):
        dA = jnp.exp(dt[t:t + 1, :] * A)                          # (Nst, Din)
        h = dA * h + dtu[t:t + 1, :] * BmT[:, t:t + 1]            # state update
        y_t = jnp.dot(Cm[t:t + 1, :], h,
                      preferred_element_type=jnp.float32)         # (1, Din)
        y = y + jnp.where(row_t == t, y_t, 0.0)
    y = (y + d_ref[...] * xc) * zs                                # skip + gate

    # ---- out_proj + fused residual
    out = jnp.dot(y, w_out_ref[...],
                  preferred_element_type=jnp.float32) + b_out_ref[...]
    o_ref[...] = out + x


def mamba_fused(p, xseq):
    """One fused pallas_call computing x + Mamba(x) over sequences [G, L, C]."""
    # TODO(synk): original SEMamba Mamba is bidirectional; forward-only here.
    G, L, d_model = xseq.shape
    Din = p["w_in"].shape[1] // 2
    Nst = p["A_log"].shape[0]
    dt_rank = p["w_dt"].shape[0]

    # Parameter-only plumbing (plain JAX, negligible): split fused projections
    # so the kernel never lane-slices, and fold x_proj(dt) -> dt_proj (both
    # linear, no nonlinearity in between) into a single (Din, Din) map.
    w_in_x, w_in_z = p["w_in"][:, :Din], p["w_in"][:, Din:]
    b_in_x = p["b_in"][:Din].reshape(1, Din)
    b_in_z = p["b_in"][Din:].reshape(1, Din)
    w_x_dt = p["w_x"][:, :dt_rank]
    w_xb = p["w_x"][:, dt_rank:dt_rank + Nst]
    w_xc = p["w_x"][:, dt_rank + Nst:]
    b_x_dt = p["b_x"][:dt_rank].reshape(1, dt_rank)
    b_xb = p["b_x"][dt_rank:dt_rank + Nst].reshape(1, Nst)
    b_xc = p["b_x"][dt_rank + Nst:].reshape(1, Nst)
    w_dt_eff = w_x_dt @ p["w_dt"]                                  # (Din, Din)
    b_dt_eff = (b_x_dt @ p["w_dt"] + p["b_dt"]).reshape(1, Din)
    A = -jnp.exp(p["A_log"])                                       # (Nst, Din)

    def full(shape):
        return pl.BlockSpec(shape, lambda g: (0, 0))

    seq_spec = pl.BlockSpec((None, L, d_model), lambda g: (g, 0, 0))

    return pl.pallas_call(
        _mamba_kernel,
        grid=(G,),
        in_specs=[seq_spec,
                  full((d_model, Din)), full((d_model, Din)),
                  full((1, Din)), full((1, Din)),
                  full((p["w_conv"].shape[0], Din)), full((1, Din)),
                  full((Din, Nst)), full((1, Nst)),
                  full((Din, Nst)), full((1, Nst)),
                  full((Din, Din)), full((1, Din)),
                  full((Nst, Din)), full((1, Din)),
                  full((Din, d_model)), full((1, d_model))],
        out_specs=seq_spec,
        out_shape=jax.ShapeDtypeStruct((G, L, d_model), jnp.float32),
        compiler_params=pltpu.CompilerParams(
            dimension_semantics=("parallel",)),
    )(xseq, w_in_x, w_in_z, b_in_x, b_in_z,
      p["w_conv"], p["b_conv"].reshape(1, Din),
      w_xb, b_xb, w_xc, b_xc,
      w_dt_eff, b_dt_eff, A, p["D"],
      p["w_out"], p["b_out"].reshape(1, d_model))


# -------------------------------- fused mag/phase decoders + learnable sigmoid
def _decoder_kernel(xT_ref, w1m_ref, b1m_ref, a1m_ref, w2m_ref, b2m_ref,
                    w1p_ref, b1p_ref, a1p_ref, wr_ref, br_ref, wi_ref, bi_ref,
                    slope_ref, beta_ref, mag_ref,
                    dmag_ref, pr_ref, pi_ref):
    xT = xT_ref[...]                                              # (C, rows)
    hm = jnp.dot(w1m_ref[...], xT,
                 preferred_element_type=jnp.float32) + b1m_ref[...]
    hm = jnp.where(hm >= 0.0, hm, a1m_ref[...] * hm)              # PReLU
    ml = jnp.dot(w2m_ref[...], hm,
                 preferred_element_type=jnp.float32) + b2m_ref[...]   # (1,rows)
    hp = jnp.dot(w1p_ref[...], xT,
                 preferred_element_type=jnp.float32) + b1p_ref[...]
    hp = jnp.where(hp >= 0.0, hp, a1p_ref[...] * hp)              # PReLU
    pr = jnp.dot(wr_ref[...], hp,
                 preferred_element_type=jnp.float32) + br_ref[...]
    pi = jnp.dot(wi_ref[...], hp,
                 preferred_element_type=jnp.float32) + bi_ref[...]
    mask = beta_ref[...] * _sigmoid(slope_ref[...] * ml)          # learnable sigmoid
    dmag_ref[...] = mask * mag_ref[...]
    pr_ref[...] = pr
    pi_ref[...] = pi


def decoder(xT, mg, ph, slope_row, mag_row):
    Cc, rows = xT.shape
    spec = lambda s: pl.BlockSpec(s, lambda i: (0, 0))
    return pl.pallas_call(
        _decoder_kernel,
        grid=(1,),
        in_specs=[spec((Cc, rows)),
                  spec((Cc, Cc)), spec((Cc, 1)), spec((Cc, 1)),
                  spec((1, Cc)), spec((1, 1)),
                  spec((Cc, Cc)), spec((Cc, 1)), spec((Cc, 1)),
                  spec((1, Cc)), spec((1, 1)), spec((1, Cc)), spec((1, 1)),
                  spec((1, rows)), spec((1, 1)), spec((1, rows))],
        out_specs=(spec((1, rows)), spec((1, rows)), spec((1, rows))),
        out_shape=(jax.ShapeDtypeStruct((1, rows), jnp.float32),) * 3,
    )(xT,
      mg["w1"].T, mg["b1"].reshape(Cc, 1), mg["alpha"].reshape(Cc, 1),
      mg["w2"].T, mg["b2"].reshape(1, 1),
      ph["w1"].T, ph["b1"].reshape(Cc, 1), ph["alpha"].reshape(Cc, 1),
      ph["wr"].T, ph["br"].reshape(1, 1), ph["wi"].T, ph["bi"].reshape(1, 1),
      slope_row, mg["beta"], mag_row)


# ------------------------------------------------------- complex recomposition
def _recompose_kernel(dmag_ref, pha_ref, cr_ref, ci_ref):
    dmag = dmag_ref[...]
    pha = pha_ref[...]
    cr_ref[...] = dmag * jnp.cos(pha)
    ci_ref[...] = dmag * jnp.sin(pha)


def recompose(dmag_row, pha_row):
    rows = dmag_row.shape[1]
    spec = pl.BlockSpec((1, rows), lambda i: (0, 0))
    return pl.pallas_call(
        _recompose_kernel,
        grid=(1,),
        in_specs=[spec, spec],
        out_specs=(spec, spec),
        out_shape=(jax.ShapeDtypeStruct((1, rows), jnp.float32),) * 2,
    )(dmag_row, pha_row)


# ------------------------------------------------------------------ full model
def hyper_semamba_forward(params, noisy_mag, noisy_pha):
    Bb, Ff, Tt = noisy_mag.shape
    rows = Bb * Tt * Ff
    mag_btf = jnp.transpose(noisy_mag, (0, 2, 1))            # (B, T, F)
    pha_btf = jnp.transpose(noisy_pha, (0, 2, 1))

    # -------- hypernet: tiny 1x8 / 1x32 matmuls, pure launch overhead as a
    # kernel -> plain JAX.
    hp = params["hyper"]
    h1 = jnp.tanh(hp["z"] @ hp["w1"] + hp["b1"])
    wvec = (h1 @ hp["w2"] + hp["b2"])[0]
    enc = params["enc"]
    Ch = enc["w2"].shape[0]
    w1_eff = enc["w1_base"] + 0.1 * wvec[:2 * Ch].reshape(2, Ch)
    b1_eff = enc["b1_base"] + 0.1 * wvec[2 * Ch:]

    # -------- HyperDenseEncoder: both 1x1 convs + PReLU fused in one kernel
    x2 = jnp.stack([mag_btf, pha_btf], axis=-1).reshape(rows, 2)
    x = encoder(x2, w1_eff, b1_eff, enc["alpha1"], enc["w2"], enc["b2"],
                enc["alpha2"])
    x = x.reshape(Bb, Tt, Ff, Ch)

    # -------- TFMamba blocks: time-axis then freq-axis Mamba, residual fused
    # TODO(synk): the time<->freq transposes stay in XLA; a BlockSpec view of
    # [B,T,F,C] with block size 1 on the F axis violates the (8,128) tiling
    # constraint, so a transposed copy is unavoidable without manual DMA.
    for blk in params["blocks"]:
        xt = jnp.transpose(x, (0, 2, 1, 3)).reshape(Bb * Ff, Tt, Ch)
        xt = mamba_fused(blk["time"], xt)
        x = jnp.transpose(xt.reshape(Bb, Ff, Tt, Ch), (0, 2, 1, 3))
        xfr = mamba_fused(blk["freq"], x.reshape(Bb * Tt, Ff, Ch))
        x = xfr.reshape(Bb, Tt, Ff, Ch)

    # -------- decoders + learnable-sigmoid mask in a transposed (C, rows)
    # layout so every kernel output is lane-dense (last dim = rows = B*T*F)
    xT = jnp.transpose(x.reshape(rows, Ch))                  # (C, rows)
    mg, ph = params["mag"], params["pha"]
    # rows are ordered (b, t, f) with f fastest -> tiling slope over B*T keeps
    # slope[f] aligned with each row's frequency bin.
    slope_row = jnp.tile(mg["slope"].reshape(-1), Bb * Tt).reshape(1, rows)
    mag_row = mag_btf.reshape(1, rows)
    dmag_row, pr_row, pi_row = decoder(xT, mg, ph, slope_row, mag_row)

    # TODO(synk): atan2 kept in plain JAX (Mosaic transcendental coverage);
    # it is a tiny (1, rows) elementwise op.
    pha_row = jnp.arctan2(pi_row, pr_row)
    cr_row, ci_row = recompose(dmag_row, pha_row)

    to_bft = lambda r: jnp.transpose(r.reshape(Bb, Tt, Ff), (0, 2, 1))
    denoised_mag = to_bft(dmag_row)
    denoised_pha = to_bft(pha_row)
    denoised_com = jnp.stack([to_bft(cr_row), to_bft(ci_row)], axis=-1)
    return denoised_mag, denoised_pha, denoised_com


# ------------------------------------------------------------------ parameters
def _normal(key, shape, scale):
    return scale * jax.random.normal(key, shape, dtype=jnp.float32)


def init_mamba_params(key, d_model):
    ks = jax.random.split(key, 6)
    return {
        "w_in": _normal(ks[0], (d_model, 2 * D_INNER), 1.0 / (d_model ** 0.5)),
        "b_in": jnp.zeros((2 * D_INNER,), jnp.float32),
        "w_conv": _normal(ks[1], (D_CONV, D_INNER), 0.5),
        "b_conv": jnp.zeros((D_INNER,), jnp.float32),
        "w_x": _normal(ks[2], (D_INNER, DT_RANK + 2 * D_STATE),
                       1.0 / (D_INNER ** 0.5)),
        "b_x": jnp.zeros((DT_RANK + 2 * D_STATE,), jnp.float32),
        "w_dt": _normal(ks[3], (DT_RANK, D_INNER), 1.0 / (DT_RANK ** 0.5)),
        "b_dt": jnp.full((D_INNER,), -2.0, jnp.float32),
        "A_log": jnp.log(jnp.broadcast_to(
            jnp.arange(1, D_STATE + 1, dtype=jnp.float32)[:, None],
            (D_STATE, D_INNER))),
        "D": jnp.ones((1, D_INNER), jnp.float32),
        "w_out": _normal(ks[4], (D_INNER, d_model), 1.0 / (D_INNER ** 0.5)),
        "b_out": jnp.zeros((d_model,), jnp.float32),
    }


def init_params(key):
    keys = jax.random.split(key, 16)
    params = {
        "hyper": {
            "z": _normal(keys[0], (1, HYPER_DIM), 1.0),
            "w1": _normal(keys[1], (HYPER_DIM, 32), 0.3),
            "b1": jnp.zeros((32,), jnp.float32),
            "w2": _normal(keys[2], (32, 2 * C + C), 0.3),
            "b2": jnp.zeros((2 * C + C,), jnp.float32),
        },
        "enc": {
            "w1_base": _normal(keys[3], (2, C), 0.5),
            "b1_base": jnp.zeros((C,), jnp.float32),
            "alpha1": jnp.full((1, C), 0.25, jnp.float32),
            "w2": _normal(keys[4], (C, C), 1.0 / (C ** 0.5)),
            "b2": jnp.zeros((C,), jnp.float32),
            "alpha2": jnp.full((1, C), 0.25, jnp.float32),
        },
        "mag": {
            "w1": _normal(keys[9], (C, C), 1.0 / (C ** 0.5)),
            "b1": jnp.zeros((C,), jnp.float32),
            "alpha": jnp.full((1, C), 0.25, jnp.float32),
            "w2": _normal(keys[10], (C, 1), 1.0 / (C ** 0.5)),
            "b2": jnp.zeros((1,), jnp.float32),
            "slope": jnp.ones((1, F), jnp.float32),
            "beta": jnp.full((1, 1), BETA, jnp.float32),
        },
        "pha": {
            "w1": _normal(keys[11], (C, C), 1.0 / (C ** 0.5)),
            "b1": jnp.zeros((C,), jnp.float32),
            "alpha": jnp.full((1, C), 0.25, jnp.float32),
            "wr": _normal(keys[12], (C, 1), 1.0 / (C ** 0.5)),
            "br": jnp.zeros((1,), jnp.float32),
            "wi": _normal(keys[13], (C, 1), 1.0 / (C ** 0.5)),
            "bi": jnp.zeros((1,), jnp.float32),
        },
    }
    params["blocks"] = []
    for i in range(NUM_BLOCKS):
        bk = jax.random.split(keys[5 + i], 2)
        params["blocks"].append({
            "time": init_mamba_params(bk[0], C),
            "freq": init_mamba_params(bk[1], C),
        })
    return params


# ------------------------------------------------------------------------ main
if __name__ == "__main__":
    key = jax.random.PRNGKey(0)
    k_par, k_mag, k_pha = jax.random.split(key, 3)
    params = init_params(k_par)

    noisy_mag = jnp.abs(jax.random.normal(k_mag, (B, F, T), dtype=jnp.float32))
    noisy_pha = jax.random.uniform(k_pha, (B, F, T), dtype=jnp.float32,
                                   minval=-3.14159, maxval=3.14159)

    fwd = jax.jit(hyper_semamba_forward)
    dmag, dpha, dcom = fwd(params, noisy_mag, noisy_pha)
    jax.block_until_ready((dmag, dpha, dcom))

    assert dmag.shape == (B, F, T)
    assert dpha.shape == (B, F, T)
    assert dcom.shape == (B, F, T, 2)
    assert bool(jnp.all(jnp.isfinite(dmag)))
    assert bool(jnp.all(jnp.isfinite(dpha)))
    assert bool(jnp.all(jnp.isfinite(dcom)))
    print("KERNEL_OK")
</pallas_src>

<mosaic_0001>
module attributes {stable_mosaic.version = 11 : i64} {
  func.func @_encoder_kernel(%arg0: i32, %arg1: memref<256x2xf32, #tpu.memory_space<vmem>>, %arg2: memref<2x16xf32, #tpu.memory_space<vmem>>, %arg3: memref<1x16xf32, #tpu.memory_space<vmem>>, %arg4: memref<1x16xf32, #tpu.memory_space<vmem>>, %arg5: memref<16x16xf32, #tpu.memory_space<vmem>>, %arg6: memref<1x16xf32, #tpu.memory_space<vmem>>, %arg7: memref<1x16xf32, #tpu.memory_space<vmem>>, %arg8: memref<256x16xf32, #tpu.memory_space<vmem>>) attributes {dimension_semantics = [#tpu.dimension_semantics<arbitrary>], iteration_bounds = array<i64: 1>, scalar_prefetch = 0 : i64, scratch_operands = 0 : i64, tpu.core_type = #tpu.core_type<tc>, window_params = [{pipeline_mode = #tpu.pipeline_mode<synchronous>, transform_indices = @transform_0, window_bounds = array<i64: 256, 2>}, {pipeline_mode = #tpu.pipeline_mode<synchronous>, transform_indices = @transform_1, window_bounds = array<i64: 2, 16>}, {pipeline_mode = #tpu.pipeline_mode<synchronous>, transform_indices = @transform_2, window_bounds = array<i64: 1, 16>}, {pipeline_mode = #tpu.pipeline_mode<synchronous>, transform_indices = @transform_3, window_bounds = array<i64: 1, 16>}, {pipeline_mode = #tpu.pipeline_mode<synchronous>, transform_indices = @transform_4, window_bounds = array<i64: 16, 16>}, {pipeline_mode = #tpu.pipeline_mode<synchronous>, transform_indices = @transform_5, window_bounds = array<i64: 1, 16>}, {pipeline_mode = #tpu.pipeline_mode<synchronous>, transform_indices = @transform_6, window_bounds = array<i64: 1, 16>}, {pipeline_mode = #tpu.pipeline_mode<synchronous>, transform_indices = @transform_7, window_bounds = array<i64: 256, 16>}]} {
    %c0 = arith.constant 0 : index
    %c0_0 = arith.constant 0 : index
    %0 = vector.load %arg1[%c0, %c0_0] : memref<256x2xf32, #tpu.memory_space<vmem>>, vector<256x2xf32>
    %c0_1 = arith.constant 0 : index
    %c0_2 = arith.constant 0 : index
    %1 = vector.load %arg2[%c0_1, %c0_2] : memref<2x16xf32, #tpu.memory_space<vmem>>, vector<2x16xf32>
    %cst = arith.constant dense<0.000000e+00> : vector<256x16xf32>
    %2 = tpu.matmul %0, %1, %cst {dimension_numbers = #tpu.dot_dimension_numbers<[1], [0], [0], [1], [0, 0, 1, 1], [], []>} : vector<256x2xf32>, vector<2x16xf32>, vector<256x16xf32> -> vector<256x16xf32>
    %c0_3 = arith.constant 0 : index
    %c0_4 = arith.constant 0 : index
    %3 = vector.load %arg3[%c0_3, %c0_4] : memref<1x16xf32, #tpu.memory_space<vmem>>, vector<1x16xf32>
    %4 = vector.broadcast %3 : vector<1x16xf32> to vector<256x16xf32>
    %5 = arith.addf %2, %4 : vector<256x16xf32>
    %cst_5 = arith.constant 0.000000e+00 : f32
    %6 = vector.broadcast %cst_5 : f32 to vector<256x16xf32>
    %7 = arith.cmpf oge, %5, %6 : vector<256x16xf32>
    %c0_6 = arith.constant 0 : index
    %c0_7 = arith.constant 0 : index
    %8 = vector.load %arg4[%c0_6, %c0_7] : memref<1x16xf32, #tpu.memory_space<vmem>>, vector<1x16xf32>
    %9 = vector.broadcast %8 : vector<1x16xf32> to vector<256x16xf32>
    %10 = arith.mulf %9, %5 : vector<256x16xf32>
    %11 = arith.select %7, %5, %10 : vector<256x16xi1>, vector<256x16xf32>
    %c0_8 = arith.constant 0 : index
    %c0_9 = arith.constant 0 : index
    %12 = vector.load %arg5[%c0_8, %c0_9] : memref<16x16xf32, #tpu.memory_space<vmem>>, vector<16x16xf32>
    %cst_10 = arith.constant dense<0.000000e+00> : vector<256x16xf32>
    %13 = tpu.matmul %11, %12, %cst_10 {dimension_numbers = #tpu.dot_dimension_numbers<[1], [0], [0], [1], [0, 0, 1, 1], [], []>} : vector<256x16xf32>, vector<16x16xf32>, vector<256x16xf32> -> vector<256x16xf32>
    %c0_11 = arith.constant 0 : index
    %c0_12 = arith.constant 0 : index
    %14 = vector.load %arg6[%c0_11, %c0_12] : memref<1x16xf32, #tpu.memory_space<vmem>>, vector<1x16xf32>
    %15 = vector.broadcast %14 : vector<1x16xf32> to vector<256x16xf32>
    %16 = arith.addf %13, %15 : vector<256x16xf32>
    %cst_13 = arith.constant 0.000000e+00 : f32
    %17 = vector.broadcast %cst_13 : f32 to vector<256x16xf32>
    %18 = arith.cmpf oge, %16, %17 : vector<256x16xf32>
    %c0_14 = arith.constant 0 : index
    %c0_15 = arith.constant 0 : index
    %19 = vector.load %arg7[%c0_14, %c0_15] : memref<1x16xf32, #tpu.memory_space<vmem>>, vector<1x16xf32>
    %20 = vector.broadcast %19 : vector<1x16xf32> to vector<256x16xf32>
    %21 = arith.mulf %20, %16 : vector<256x16xf32>
    %22 = arith.select %18, %16, %21 : vector<256x16xi1>, vector<256x16xf32>
    %c0_16 = arith.constant 0 : index
    %c0_17 = arith.constant 0 : index
    %23 = vector.load %arg8[%c0_16, %c0_17] : memref<256x16xf32, #tpu.memory_space<vmem>>, vector<256x16xf32>
    tpu.vector_store %arg8[%c0_16, %c0_17], %22 {strides = array<i32>} : memref<256x16xf32, #tpu.memory_space<vmem>>, vector<256x16xf32>,
    return
  }
  func.func @transform_0(%arg0: i32) -> (i32, i32) {
    %c0_i32 = arith.constant 0 : i32
    %c0_i32_0 = arith.constant 0 : i32
    %c0_i32_1 = arith.constant 0 : i32
    return %c0_i32, %c0_i32_0 : i32, i32
  }
  func.func @transform_1(%arg0: i32) -> (i32, i32) {
    %c0_i32 = arith.constant 0 : i32
    %c0_i32_0 = arith.constant 0 : i32
    %c0_i32_1 = arith.constant 0 : i32
    return %c0_i32, %c0_i32_0 : i32, i32
  }
  func.func @transform_2(%arg0: i32) -> (i32, i32) {
    %c0_i32 = arith.constant 0 : i32
    %c0_i32_0 = arith.constant 0 : i32
    %c0_i32_1 = arith.constant 0 : i32
    return %c0_i32, %c0_i32_0 : i32, i32
  }
  func.func @transform_3(%arg0: i32) -> (i32, i32) {
    %c0_i32 = arith.constant 0 : i32
    %c0_i32_0 = arith.constant 0 : i32
    %c0_i32_1 = arith.constant 0 : i32
    return %c0_i32, %c0_i32_0 : i32, i32
  }
  func.func @transform_4(%arg0: i32) -> (i32, i32) {
    %c0_i32 = arith.constant 0 : i32
    %c0_i32_0 = arith.constant 0 : i32
    %c0_i32_1 = arith.constant 0 : i32
    return %c0_i32, %c0_i32_0 : i32, i32
  }
  func.func @transform_5(%arg0: i32) -> (i32, i32) {
    %c0_i32 = arith.constant 0 : i32
    %c0_i32_0 = arith.constant 0 : i32
    %c0_i32_1 = arith.constant 0 : i32
    return %c0_i32, %c0_i32_0 : i32, i32
  }
  func.func @transform_6(%arg0: i32) -> (i32, i32) {
    %c0_i32 = arith.constant 0 : i32
    %c0_i32_0 = arith.constant 0 : i32
    %c0_i32_1 = arith.constant 0 : i32
    return %c0_i32, %c0_i32_0 : i32, i32
  }
  func.func @transform_7(%arg0: i32) -> (i32, i32) {
    %c0_i32 = arith.constant 0 : i32
    %c0_i32_0 = arith.constant 0 : i32
    %c0_i32_1 = arith.constant 0 : i32
    return %c0_i32, %c0_i32_0 : i32, i32
  }
}

module attributes {stable_mosaic.version = 11 : i64} {
  func.func @_mamba_kernel(%arg0: i32, %arg1: memref<1x8x16xf32, #tpu.memory_space<vmem>>, %arg2: memref<16x32xf32, #tpu.memory_space<vmem>>, %arg3: memref<16x32xf32, #tpu.memory_space<vmem>>, %arg4: memref<1x32xf32, #tpu.memory_space<vmem>>, %arg5: memref<1x32xf32, #tpu.memory_space<vmem>>, %arg6: memref<4x32xf32, #tpu.memory_space<vmem>>, %arg7: memref<1x32xf32, #tpu.memory_space<vmem>>, %arg8: memref<32x8xf32, #tpu.memory_space<vmem>>, %arg9: memref<1x8xf32, #tpu.memory_space<vmem>>, %arg10: memref<32x8xf32, #tpu.memory_space<vmem>>, %arg11: memref<1x8xf32, #tpu.memory_space<vmem>>, %arg12: memref<32x32xf32, #tpu.memory_space<vmem>>, %arg13: memref<1x32xf32, #tpu.memory_space<vmem>>, %arg14: memref<8x32xf32, #tpu.memory_space<vmem>>, %arg15: memref<1x32xf32, #tpu.memory_space<vmem>>, %arg16: memref<32x16xf32, #tpu.memory_space<vmem>>, %arg17: memref<1x16xf32, #tpu.memory_space<vmem>>, %arg18: memref<1x8x16xf32, #tpu.memory_space<vmem>>) attributes {dimension_semantics = [#tpu.dimension_semantics<parallel>], iteration_bounds = array<i64: 32>, scalar_prefetch = 0 : i64, scratch_operands = 0 : i64, tpu.core_type = #tpu.core_type<tc>, window_params = [{transform_indices = @transform_0, window_bounds = array<i64: 1, 8, 16>}, {pipeline_mode = #tpu.pipeline_mode<synchronous>, transform_indices = @transform_1, window_bounds = array<i64: 16, 32>}, {pipeline_mode = #tpu.pipeline_mode<synchronous>, transform_indices = @transform_2, window_bounds = array<i64: 16, 32>}, {pipeline_mode = #tpu.pipeline_mode<synchronous>, transform_indices = @transform_3, window_bounds = array<i64: 1, 32>}, {pipeline_mode = #tpu.pipeline_mode<synchronous>, transform_indices = @transform_4, window_bounds = array<i64: 1, 32>}, {pipeline_mode = #tpu.pipeline_mode<synchronous>, transform_indices = @transform_5, window_bounds = array<i64: 4, 32>}, {pipeline_mode = #tpu.pipeline_mode<synchronous>, transform_indices = @transform_6, window_bounds = array<i64: 1, 32>}, {pipeline_mode = #tpu.pipeline_mode<synchronous>, transform_indices = @transform_7, window_bounds = array<i64: 32, 8>}, {pipeline_mode = #tpu.pipeline_mode<synchronous>, transform_indices = @transform_8, window_bounds = array<i64: 1, 8>}, {pipeline_mode = #tpu.pipeline_mode<synchronous>, transform_indices = @transform_9, window_bounds = array<i64: 32, 8>}, {pipeline_mode = #tpu.pipeline_mode<synchronous>, transform_indices = @transform_10, window_bounds = array<i64: 1, 8>}, {pipeline_mode = #tpu.pipeline_mode<synchronous>, transform_indices = @transform_11, window_bounds = array<i64: 32, 32>}, {pipeline_mode = #tpu.pipeline_mode<synchronous>, transform_indices = @transform_12, window_bounds = array<i64: 1, 32>}, {pipeline_mode = #tpu.pipeline_mode<synchronous>, transform_indices = @transform_13, window_bounds = array<i64: 8, 32>}, {pipeline_mode = #tpu.pipeline_mode<synchronous>, transform_indices = @transform_14, window_bounds = array<i64: 1, 32>}, {pipeline_mode = #tpu.pipeline_mode<synchronous>, transform_indices = @transform_15, window_bounds = array<i64: 32, 16>}, {pipeline_mode = #tpu.pipeline_mode<synchronous>, transform_indices = @transform_16, window_bounds = array<i64: 1, 16>}, {transform_indices = @transform_17, window_bounds = array<i64: 1, 8, 16>}]} {
    %c0 = arith.constant 0 : index
    %c0_0 = arith.constant 0 : index
    %c0_1 = arith.constant 0 : index
    %0 = vector.load %arg1[%c0, %c0_0, %c0_1] : memref<1x8x16xf32, #tpu.memory_space<vmem>>, vector<1x8x16xf32>
    %1 = vector.shape_cast %0 : vector<1x8x16xf32> to vector<8x16xf32>
    %c0_2 = arith.constant 0 : index
    %c0_3 = arith.constant 0 : index
    %2 = vector.load %arg2[%c0_2, %c0_3] : memref<16x32xf32, #tpu.memory_space<vmem>>, vector<16x32xf32>
    %cst = arith.constant dense<0.000000e+00> : vector<8x32xf32>
    %3 = tpu.matmul %1, %2, %cst {dimension_numbers = #tpu.dot_dimension_numbers<[1], [0], [0], [1], [0, 0, 1, 1], [], []>} : vector<8x16xf32>, vector<16x32xf32>, vector<8x32xf32> -> vector<8x32xf32>
    %c0_4 = arith.constant 0 : index
    %c0_5 = arith.constant 0 : index
    %4 = vector.load %arg4[%c0_4, %c0_5] : memref<1x32xf32, #tpu.memory_space<vmem>>, vector<1x32xf32>
    %5 = vector.broadcast %4 : vector<1x32xf32> to vector<8x32xf32>
    %6 = arith.addf %3, %5 : vector<8x32xf32>
    %c0_6 = arith.constant 0 : index
    %c0_7 = arith.constant 0 : index
    %7 = vector.load %arg3[%c0_6, %c0_7] : memref<16x32xf32, #tpu.memory_space<vmem>>, vector<16x32xf32>
    %cst_8 = arith.constant dense<0.000000e+00> : vector<8x32xf32>
    %8 = tpu.matmul %1, %7, %cst_8 {dimension_numbers = #tpu.dot_dimension_numbers<[1], [0], [0], [1], [0, 0, 1, 1], [], []>} : vector<8x16xf32>, vector<16x32xf32>, vector<8x32xf32> -> vector<8x32xf32>
    %c0_9 = arith.constant 0 : index
    %c0_10 = arith.constant 0 : index
    %9 = vector.load %arg5[%c0_9, %c0_10] : memref<1x32xf32, #tpu.memory_space<vmem>>, vector<1x32xf32>
    %10 = vector.broadcast %9 : vector<1x32xf32> to vector<8x32xf32>
    %11 = arith.addf %8, %10 : vector<8x32xf32>
    %cst_11 = arith.constant 0.000000e+00 : f32
    %12 = vector.broadcast %cst_11 : f32 to vector<8x32xf32>
    %13 = arith.subf %12, %11 : vector<8x32xf32>
    %14 = math.exp %13 : vector<8x32xf32>
    %cst_12 = arith.constant 1.000000e+00 : f32
    %15 = vector.broadcast %cst_12 : f32 to vector<8x32xf32>
    %16 = arith.addf %15, %14 : vector<8x32xf32>
    %cst_13 = arith.constant 1.000000e+00 : f32
    %17 = vector.broadcast %cst_13 : f32 to vector<8x32xf32>
    %18 = arith.divf %17, %16 : vector<8x32xf32>
    %19 = arith.mulf %11, %18 : vector<8x32xf32>
    %20 = tpu.iota {dimensions = array<i32: 0>} : vector<8x8xi32>
    %21 = tpu.iota {dimensions = array<i32: 1>} : vector<8x8xi32>
    %c3 = arith.constant 3 : index
    %c0_14 = arith.constant 0 : index
    %22 = vector.load %arg6[%c3, %c0_14] : memref<4x32xf32, #tpu.memory_space<vmem>>, vector<1x32xf32>
    %23 = vector.broadcast %22 : vector<1x32xf32> to vector<8x32xf32>
    %24 = arith.mulf %6, %23 : vector<8x32xf32>
    %c3_i32 = arith.constant 3 : i32
    %25 = vector.broadcast %c3_i32 : i32 to vector<8x8xi32>
    %26 = arith.subi %20, %25 : vector<8x8xi32>
    %27 = arith.cmpi eq, %21, %26 : vector<8x8xi32>
    %cst_15 = arith.constant 1.000000e+00 : f32
    %cst_16 = arith.constant 0.000000e+00 : f32
    %28 = vector.broadcast %cst_15 : f32 to vector<8x8xf32>
    %29 = vector.broadcast %cst_16 : f32 to vector<8x8xf32>
    %30 = arith.select %27, %28, %29 : vector<8x8xi1>, vector<8x8xf32>
    %cst_17 = arith.constant dense<0.000000e+00> : vector<8x32xf32>
    %31 = tpu.matmul %30, %6, %cst_17 {dimension_numbers = #tpu.dot_dimension_numbers<[1], [0], [0], [1], [0, 0, 1, 1], [], []>} : vector<8x8xf32>, vector<8x32xf32>, vector<8x32xf32> -> vector<8x32xf32>
    %c0_18 = arith.constant 0 : index
    %c0_19 = arith.constant 0 : index
    %32 = vector.load %arg6[%c0_18, %c0_19] : memref<4x32xf32, #tpu.memory_space<vmem>>, vector<1x32xf32>
    %33 = vector.broadcast %32 : vector<1x32xf32> to vector<8x32xf32>
    %34 = arith.mulf %31, %33 : vector<8x32xf32>
    %35 = arith.addf %24, %34 : vector<8x32xf32>
    %c2_i32 = arith.constant 2 : i32
    %36 = vector.broadcast %c2_i32 : i32 to vector<8x8xi32>
    %37 = arith.subi %20, %36 : vector<8x8xi32>
    %38 = arith.cmpi eq, %21, %37 : vector<8x8xi32>
    %cst_20 = arith.constant 1.000000e+00 : f32
    %cst_21 = arith.constant 0.000000e+00 : f32
    %39 = vector.broadcast %cst_20 : f32 to vector<8x8xf32>
    %40 = vector.broadcast %cst_21 : f32 to vector<8x8xf32>
    %41 = arith.select %38, %39, %40 : vector<8x8xi1>, vector<8x8xf32>
    %cst_22 = arith.constant dense<0.000000e+00> : vector<8x32xf32>
    %42 = tpu.matmul %41, %6, %cst_22 {dimension_numbers = #tpu.dot_dimension_numbers<[1], [0], [0], [1], [0, 0, 1, 1], [], []>} : vector<8x8xf32>, vector<8x32xf32>, vector<8x32xf32> -> vector<8x32xf32>
    %c1 = arith.constant 1 : index
    %c0_23 = arith.constant 0 : index
    %43 = vector.load %arg6[%c1, %c0_23] : memref<4x32xf32, #tpu.memory_space<vmem>>, vector<1x32xf32>
    %44 = vector.broadcast %43 : vector<1x32xf32> to vector<8x32xf32>
    %45 = arith.mulf %42, %44 : vector<8x32xf32>
    %46 = arith.addf %35, %45 : vector<8x32xf32>
    %c1_i32 = arith.constant 1 : i32
    %47 = vector.broadcast %c1_i32 : i32 to vector<8x8xi32>
    %48 = arith.subi %20, %47 : vector<8x8xi32>
    %49 = arith.cmpi eq, %21, %48 : vector<8x8xi32>
    %cst_24 = arith.constant 1.000000e+00 : f32
    %cst_25 = arith.constant 0.000000e+00 : f32
    %50 = vector.broadcast %cst_24 : f32 to vector<8x8xf32>
    %51 = vector.broadcast %cst_25 : f32 to vector<8x8xf32>
    %52 = arith.select %49, %50, %51 : vector<8x8xi1>, vector<8x8xf32>
    %cst_26 = arith.constant dense<0.000000e+00> : vector<8x32xf32>
    %53 = tpu.matmul %52, %6, %cst_26 {dimension_numbers = #tpu.dot_dimension_numbers<[1], [0], [0], [1], [0, 0, 1, 1], [], []>} : vector<8x8xf32>, vector<8x32xf32>, vector<8x32xf32> -> vector<8x32xf32>
    %c2 = arith.constant 2 : index
    %c0_27 = arith.constant 0 : index
    %54 = vector.load %arg6[%c2, %c0_27] : memref<4x32xf32, #tpu.memory_space<vmem>>, vector<1x32xf32>
    %55 = vector.broadcast %54 : vector<1x32xf32> to vector<8x32xf32>
    %56 = arith.mulf %53, %55 : vector<8x32xf32>
    %57 = arith.addf %46, %56 : vector<8x32xf32>
    %c0_28 = arith.constant 0 : index
    %c0_29 = arith.constant 0 : index
    %58 = vector.load %arg7[%c0_28, %c0_29] : memref<1x32xf32, #tpu.memory_space<vmem>>, vector<1x32xf32>
    %59 = vector.broadcast %58 : vector<1x32xf32> to vector<8x32xf32>
    %60 = arith.addf %57, %59 : vector<8x32xf32>
    %cst_30 = arith.constant 0.000000e+00 : f32
    %61 = vector.broadcast %cst_30 : f32 to vector<8x32xf32>
    %62 = arith.subf %61, %60 : vector<8x32xf32>
    %63 = math.exp %62 : vector<8x32xf32>
    %cst_31 = arith.constant 1.000000e+00 : f32
    %64 = vector.broadcast %cst_31 : f32 to vector<8x32xf32>
    %65 = arith.addf %64, %63 : vector<8x32xf32>
    %cst_32 = arith.constant 1.000000e+00 : f32
    %66 = vector.broadcast %cst_32 : f32 to vector<8x32xf32>
    %67 = arith.divf %66, %65 : vector<8x32xf32>
    %68 = arith.mulf %60, %67 : vector<8x32xf32>
    %c0_33 = arith.constant 0 : index
    %c0_34 = arith.constant 0 : index
    %69 = vector.load %arg8[%c0_33, %c0_34] : memref<32x8xf32, #tpu.memory_space<vmem>>, vector<32x8xf32>
    %cst_35 = arith.constant dense<0.000000e+00> : vector<8x8xf32>
    %70 = tpu.matmul %68, %69, %cst_35 {dimension_numbers = #tpu.dot_dimension_numbers<[1], [0], [0], [1], [0, 0, 1, 1], [], []>} : vector<8x32xf32>, vector<32x8xf32>, vector<8x8xf32> -> vector<8x8xf32>
    %c0_36 = arith.constant 0 : index
    %c0_37 = arith.constant 0 : index
    %71 = vector.load %arg9[%c0_36, %c0_37] : memref<1x8xf32, #tpu.memory_space<vmem>>, vector<1x8xf32>
    %72 = vector.broadcast %71 : vector<1x8xf32> to vector<8x8xf32>
    %73 = arith.addf %70, %72 : vector<8x8xf32>
    %c0_38 = arith.constant 0 : index
    %c0_39 = arith.constant 0 : index
    %74 = vector.load %arg10[%c0_38, %c0_39] : memref<32x8xf32, #tpu.memory_space<vmem>>, vector<32x8xf32>
    %cst_40 = arith.constant dense<0.000000e+00> : vector<8x8xf32>
    %75 = tpu.matmul %68, %74, %cst_40 {dimension_numbers = #tpu.dot_dimension_numbers<[1], [0], [0], [1], [0, 0, 1, 1], [], []>} : vector<8x32xf32>, vector<32x8xf32>, vector<8x8xf32> -> vector<8x8xf32>
    %c0_41 = arith.constant 0 : index
    %c0_42 = arith.constant 0 : index
    %76 = vector.load %arg11[%c0_41, %c0_42] : memref<1x8xf32, #tpu.memory_space<vmem>>, vector<1x8xf32>
    %77 = vector.broadcast %76 : vector<1x8xf32> to vector<8x8xf32>
    %78 = arith.addf %75, %77 : vector<8x8xf32>
    %c0_43 = arith.constant 0 : index
    %c0_44 = arith.constant 0 : index
    %79 = vector.load %arg12[%c0_43, %c0_44] : memref<32x32xf32, #tpu.memory_space<vmem>>, vector<32x32xf32>
    %cst_45 = arith.constant dense<0.000000e+00> : vector<8x32xf32>
    %80 = tpu.matmul %68, %79, %cst_45 {dimension_numbers = #tpu.dot_dimension_numbers<[1], [0], [0], [1], [0, 0, 1, 1], [], []>} : vector<8x32xf32>, vector<32x32xf32>, vector<8x32xf32> -> vector<8x32xf32>
    %c0_46 = arith.constant 0 : index
    %c0_47 = arith.constant 0 : index
    %81 = vector.load %arg13[%c0_46, %c0_47] : memref<1x32xf32, #tpu.memory_space<vmem>>, vector<1x32xf32>
    %82 = vector.broadcast %81 : vector<1x32xf32> to vector<8x32xf32>
    %83 = arith.addf %80, %82 : vector<8x32xf32>
    %cst_48 = arith.constant 0.000000e+00 : f32
    %84 = vector.broadcast %cst_48 : f32 to vector<8x32xf32>
    %85 = arith.maximumf %83, %84 : vector<8x32xf32>
    %86 = math.absf %83 : vector<8x32xf32>
    %cst_49 = arith.constant 0.000000e+00 : f32
    %87 = vector.broadcast %cst_49 : f32 to vector<8x32xf32>
    %88 = arith.subf %87, %86 : vector<8x32xf32>
    %89 = math.exp %88 : vector<8x32xf32>
    %cst_50 = arith.constant 1.000000e+00 : f32
    %90 = vector.broadcast %cst_50 : f32 to vector<8x32xf32>
    %91 = arith.addf %90, %89 : vector<8x32xf32>
    %92 = math.log %91 : vector<8x32xf32>
    %93 = arith.addf %85, %92 : vector<8x32xf32>
    %c0_51 = arith.constant 0 : index
    %c0_52 = arith.constant 0 : index
    %94 = vector.load %arg14[%c0_51, %c0_52] : memref<8x32xf32, #tpu.memory_space<vmem>>, vector<8x32xf32>
    %95 = tpu.transpose %73, [1, 0] : vector<8x8xf32> -> vector<8x8xf32>
    %96 = arith.mulf %93, %68 : vector<8x32xf32>
    %97 = tpu.iota {dimensions = array<i32: 0>} : vector<8x32xi32>
    %cst_53 = arith.constant 0.000000e+00 : f32
    %98 = vector.broadcast %cst_53 : f32 to vector<8x32xf32>
    %cst_54 = arith.constant 0.000000e+00 : f32
    %99 = vector.broadcast %cst_54 : f32 to vector<8x32xf32>
    %100 = vector.extract_strided_slice %93 {offsets = [0, 0], sizes = [1, 32], strides = [1, 1]} : vector<8x32xf32> to vector<1x32xf32>
    %101 = vector.broadcast %100 : vector<1x32xf32> to vector<8x32xf32>
    %102 = arith.mulf %101, %94 : vector<8x32xf32>
    %103 = math.exp %102 : vector<8x32xf32>
    %104 = arith.mulf %103, %98 : vector<8x32xf32>
    %105 = vector.extract_strided_slice %96 {offsets = [0, 0], sizes = [1, 32], strides = [1, 1]} : vector<8x32xf32> to vector<1x32xf32>
    %106 = vector.extract_strided_slice %95 {offsets = [0, 0], sizes = [8, 1], strides = [1, 1]} : vector<8x8xf32> to vector<8x1xf32>
    %107 = vector.broadcast %105 : vector<1x32xf32> to vector<8x32xf32>
    %108 = vector.broadcast %106 : vector<8x1xf32> to vector<8x32xf32>
    %109 = arith.mulf %107, %108 : vector<8x32xf32>
    %110 = arith.addf %104, %109 : vector<8x32xf32>
    %111 = vector.extract_strided_slice %78 {offsets = [0, 0], sizes = [1, 8], strides = [1, 1]} : vector<8x8xf32> to vector<1x8xf32>
    %cst_55 = arith.constant dense<0.000000e+00> : vector<1x32xf32>
    %112 = tpu.matmul %111, %110, %cst_55 {dimension_numbers = #tpu.dot_dimension_numbers<[1], [0], [0], [1], [0, 0, 1, 1], [], []>} : vector<1x8xf32>, vector<8x32xf32>, vector<1x32xf32> -> vector<1x32xf32>
    %c0_i32 = arith.constant 0 : i32
    %113 = vector.broadcast %c0_i32 : i32 to vector<8x32xi32>
    %114 = arith.cmpi eq, %97, %113 : vector<8x32xi32>
    %cst_56 = arith.constant 0.000000e+00 : f32
    %115 = vector.shape_cast %112 : vector<1x32xf32> to vector<1x32xf32>
    %116 = vector.broadcast %115 : vector<1x32xf32> to vector<8x32xf32>
    %117 = vector.broadcast %cst_56 : f32 to vector<8x32xf32>
    %118 = arith.select %114, %116, %117 : vector<8x32xi1>, vector<8x32xf32>
    %119 = arith.addf %99, %118 : vector<8x32xf32>
    %120 = vector.extract_strided_slice %93 {offsets = [1, 0], sizes = [1, 32], strides = [1, 1]} : vector<8x32xf32> to vector<1x32xf32>
    %121 = vector.broadcast %120 : vector<1x32xf32> to vector<8x32xf32>
    %122 = arith.mulf %121, %94 : vector<8x32xf32>
    %123 = math.exp %122 : vector<8x32xf32>
    %124 = arith.mulf %123, %110 : vector<8x32xf32>
    %125 = vector.extract_strided_slice %96 {offsets = [1, 0], sizes = [1, 32], strides = [1, 1]} : vector<8x32xf32> to vector<1x32xf32>
    %126 = vector.extract_strided_slice %95 {offsets = [0, 1], sizes = [8, 1], strides = [1, 1]} : vector<8x8xf32> to vector<8x1xf32>
    %127 = vector.broadcast %125 : vector<1x32xf32> to vector<8x32xf32>
    %128 = vector.broadcast %126 : vector<8x1xf32> to vector<8x32xf32>
    %129 = arith.mulf %127, %128 : vector<8x32xf32>
    %130 = arith.addf %124, %129 : vector<8x32xf32>
    %131 = vector.extract_strided_slice %78 {offsets = [1, 0], sizes = [1, 8], strides = [1, 1]} : vector<8x8xf32> to vector<1x8xf32>
    %cst_57 = arith.constant dense<0.000000e+00> : vector<1x32xf32>
    %132 = tpu.matmul %131, %130, %cst_57 {dimension_numbers = #tpu.dot_dimension_numbers<[1], [0], [0], [1], [0, 0, 1, 1], [], []>} : vector<1x8xf32>, vector<8x32xf32>, vector<1x32xf32> -> vector<1x32xf32>
    %c1_i32_58 = arith.constant 1 : i32
    %133 = vector.broadcast %c1_i32_58 : i32 to vector<8x32xi32>
    %134 = arith.cmpi eq, %97, %133 : vector<8x32xi32>
    %cst_59 = arith.constant 0.000000e+00 : f32
    %135 = vector.shape_cast %132 : vector<1x32xf32> to vector<1x32xf32>
    %136 = vector.broadcast %135 : vector<1x32xf32> to vector<8x32xf32>
    %137 = vector.broadcast %cst_59 : f32 to vector<8x32xf32>
    %138 = arith.select %134, %136, %137 : vector<8x32xi1>, vector<8x32xf32>
    %139 = arith.addf %119, %138 : vector<8x32xf32>
    %140 = vector.extract_strided_slice %93 {offsets = [2, 0], sizes = [1, 32], strides = [1, 1]} : vector<8x32xf32> to vector<1x32xf32>
    %141 = vector.broadcast %140 : vector<1x32xf32> to vector<8x32xf32>
    %142 = arith.mulf %141, %94 : vector<8x32xf32>
    %143 = math.exp %142 : vector<8x32xf32>
    %144 = arith.mulf %143, %130 : vector<8x32xf32>
    %145 = vector.extract_strided_slice %96 {offsets = [2, 0], sizes = [1, 32], strides = [1, 1]} : vector<8x32xf32> to vector<1x32xf32>
    %146 = vector.extract_strided_slice %95 {offsets = [0, 2], sizes = [8, 1], strides = [1, 1]} : vector<8x8xf32> to vector<8x1xf32>
    %147 = vector.broadcast %145 : vector<1x32xf32> to vector<8x32xf32>
    %148 = vector.broadcast %146 : vector<8x1xf32> to vector<8x32xf32>
    %149 = arith.mulf %147, %148 : vector<8x32xf32>
    %150 = arith.addf %144, %149 : vector<8x32xf32>
    %151 = vector.extract_strided_slice %78 {offsets = [2, 0], sizes = [1, 8], strides = [1, 1]} : vector<8x8xf32> to vector<1x8xf32>
    %cst_60 = arith.constant dense<0.000000e+00> : vector<1x32xf32>
    %152 = tpu.matmul %151, %150, %cst_60 {dimension_numbers = #tpu.dot_dimension_numbers<[1], [0], [0], [1], [0, 0, 1, 1], [], []>} : vector<1x8xf32>, vector<8x32xf32>, vector<1x32xf32> -> vector<1x32xf32>
    %c2_i32_61 = arith.constant 2 : i32
    %153 = vector.broadcast %c2_i32_61 : i32 to vector<8x32xi32>
    %154 = arith.cmpi eq, %97, %153 : vector<8x32xi32>
    %cst_62 = arith.constant 0.000000e+00 : f32
    %155 = vector.shape_cast %152 : vector<1x32xf32> to vector<1x32xf32>
    %156 = vector.broadcast %155 : vector<1x32xf32> to vector<8x32xf32>
    %157 = vector.broadcast %cst_62 : f32 to vector<8x32xf32>
    %158 = arith.select %154, %156, %157 : vector<8x32xi1>, vector<8x32xf32>
    %159 = arith.addf %139, %158 : vector<8x32xf32>
    %160 = vector.extract_strided_slice %93 {offsets = [3, 0], sizes = [1, 32], strides = [1, 1]} : vector<8x32xf32> to vector<1x32xf32>
    %161 = vector.broadcast %160 : vector<1x32xf32> to vector<8x32xf32>
    %162 = arith.mulf %161, %94 : vector<8x32xf32>
    %163 = math.exp %162 : vector<8x32xf32>
    %164 = arith.mulf %163, %150 : vector<8x32xf32>
    %165 = vector.extract_strided_slice %96 {offsets = [3, 0], sizes = [1, 32], strides = [1, 1]} : vector<8x32xf32> to vector<1x32xf32>
    %166 = vector.extract_strided_slice %95 {offsets = [0, 3], sizes = [8, 1], strides = [1, 1]} : vector<8x8xf32> to vector<8x1xf32>
    %167 = vector.broadcast %165 : vector<1x32xf32> to vector<8x32xf32>
    %168 = vector.broadcast %166 : vector<8x1xf32> to vector<8x32xf32>
    %169 = arith.mulf %167, %168 : vector<8x32xf32>
    %170 = arith.addf %164, %169 : vector<8x32xf32>
    %171 = vector.extract_strided_slice %78 {offsets = [3, 0], sizes = [1, 8], strides = [1, 1]} : vector<8x8xf32> to vector<1x8xf32>
    %cst_63 = arith.constant dense<0.000000e+00> : vector<1x32xf32>
    %172 = tpu.matmul %171, %170, %cst_63 {dimension_numbers = #tpu.dot_dimension_numbers<[1], [0], [0], [1], [0, 0, 1, 1], [], []>} : vector<1x8xf32>, vector<8x32xf32>, vector<1x32xf32> -> vector<1x32xf32>
    %c3_i32_64 = arith.constant 3 : i32
    %173 = vector.broadcast %c3_i32_64 : i32 to vector<8x32xi32>
    %174 = arith.cmpi eq, %97, %173 : vector<8x32xi32>
    %cst_65 = arith.constant 0.000000e+00 : f32
    %175 = vector.shape_cast %172 : vector<1x32xf32> to vector<1x32xf32>
    %176 = vector.broadcast %175 : vector<1x32xf32> to vector<8x32xf32>
    %177 = vector.broadcast %cst_65 : f32 to vector<8x32xf32>
    %178 = arith.select %174, %176, %177 : vector<8x32xi1>, vector<8x32xf32>
    %179 = arith.addf %159, %178 : vector<8x32xf32>
    %180 = vector.extract_strided_slice %93 {offsets = [4, 0], sizes = [1, 32], strides = [1, 1]} : vector<8x32xf32> to vector<1x32xf32>
    %181 = vector.broadcast %180 : vector<1x32xf32> to vector<8x32xf32>
    %182 = arith.mulf %181, %94 : vector<8x32xf32>
    %183 = math.exp %182 : vector<8x32xf32>
    %184 = arith.mulf %183, %170 : vector<8x32xf32>
    %185 = vector.extract_strided_slice %96 {offsets = [4, 0], sizes = [1, 32], strides = [1, 1]} : vector<8x32xf32> to vector<1x32xf32>
    %186 = vector.extract_strided_slice %95 {offsets = [0, 4], sizes = [8, 1], strides = [1, 1]} : vector<8x8xf32> to vector<8x1xf32>
    %187 = vector.broadcast %185 : vector<1x32xf32> to vector<8x32xf32>
    %188 = vector.broadcast %186 : vector<8x1xf32> to vector<8x32xf32>
    %189 = arith.mulf %187, %188 : vector<8x32xf32>
    %190 = arith.addf %184, %189 : vector<8x32xf32>
    %191 = vector.extract_strided_slice %78 {offsets = [4, 0], sizes = [1, 8], strides = [1, 1]} : vector<8x8xf32> to vector<1x8xf32>
    %cst_66 = arith.constant dense<0.000000e+00> : vector<1x32xf32>
    %192 = tpu.matmul %191, %190, %cst_66 {dimension_numbers = #tpu.dot_dimension_numbers<[1], [0], [0], [1], [0, 0, 1, 1], [], []>} : vector<1x8xf32>, vector<8x32xf32>, vector<1x32xf32> -> vector<1x32xf32>
    %c4_i32 = arith.constant 4 : i32
    %193 = vector.broadcast %c4_i32 : i32 to vector<8x32xi32>
    %194 = arith.cmpi eq, %97, %193 : vector<8x32xi32>
    %cst_67 = arith.constant 0.000000e+00 : f32
    %195 = vector.shape_cast %192 : vector<1x32xf32> to vector<1x32xf32>
    %196 = vector.broadcast %195 : vector<1x32xf32> to vector<8x32xf32>
    %197 = vector.broadcast %cst_67 : f32 to vector<8x32xf32>
    %198 = arith.select %194, %196, %197 : vector<8x32xi1>, vector<8x32xf32>
    %199 = arith.addf %179, %198 : vector<8x32xf32>
    %200 = vector.extract_strided_slice %93 {offsets = [5, 0], sizes = [1, 32], strides = [1, 1]} : vector<8x32xf32> to vector<1x32xf32>
    %201 = vector.broadcast %200 : vector<1x32xf32> to vector<8x32xf32>
    %202 = arith.mulf %201, %94 : vector<8x32xf32>
    %203 = math.exp %202 : vector<8x32xf32>
    %204 = arith.mulf %203, %190 : vector<8x32xf32>
    %205 = vector.extract_strided_slice %96 {offsets = [5, 0], sizes = [1, 32], strides = [1, 1]} : vector<8x32xf32> to vector<1x32xf32>
    %206 = vector.extract_strided_slice %95 {offsets = [0, 5], sizes = [8, 1], strides = [1, 1]} : vector<8x8xf32> to vector<8x1xf32>
    %207 = vector.broadcast %205 : vector<1x32xf32> to vector<8x32xf32>
    %208 = vector.broadcast %206 : vector<8x1xf32> to vector<8x32xf32>
    %209 = arith.mulf %207, %208 : vector<8x32xf32>
    %210 = arith.addf %204, %209 : vector<8x32xf32>
    %211 = vector.extract_strided_slice %78 {offsets = [5, 0], sizes = [1, 8], strides = [1, 1]} : vector<8x8xf32> to vector<1x8xf32>
    %cst_68 = arith.constant dense<0.000000e+00> : vector<1x32xf32>
    %212 = tpu.matmul %211, %210, %cst_68 {dimension_numbers = #tpu.dot_dimension_numbers<[1], [0], [0], [1], [0, 0, 1, 1], [], []>} : vector<1x8xf32>, vector<8x32xf32>, vector<1x32xf32> -> vector<1x32xf32>
    %c5_i32 = arith.constant 5 : i32
    %213 = vector.broadcast %c5_i32 : i32 to vector<8x32xi32>
    %214 = arith.cmpi eq, %97, %213 : vector<8x32xi32>
    %cst_69 = arith.constant 0.000000e+00 : f32
    %215 = vector.shape_cast %212 : vector<1x32xf32> to vector<1x32xf32>
    %216 = vector.broadcast %215 : vector<1x32xf32> to vector<8x32xf32>
    %217 = vector.broadcast %cst_69 : f32 to vector<8x32xf32>
    %218 = arith.select %214, %216, %217 : vector<8x32xi1>, vector<8x32xf32>
    %219 = arith.addf %199, %218 : vector<8x32xf32>
    %220 = vector.extract_strided_slice %93 {offsets = [6, 0], sizes = [1, 32], strides = [1, 1]} : vector<8x32xf32> to vector<1x32xf32>
    %221 = vector.broadcast %220 : vector<1x32xf32> to vector<8x32xf32>
    %222 = arith.mulf %221, %94 : vector<8x32xf32>
    %223 = math.exp %222 : vector<8x32xf32>
    %224 = arith.mulf %223, %210 : vector<8x32xf32>
    %225 = vector.extract_strided_slice %96 {offsets = [6, 0], sizes = [1, 32], strides = [1, 1]} : vector<8x32xf32> to vector<1x32xf32>
    %226 = vector.extract_strided_slice %95 {offsets = [0, 6], sizes = [8, 1], strides = [1, 1]} : vector<8x8xf32> to vector<8x1xf32>
    %227 = vector.broadcast %225 : vector<1x32xf32> to vector<8x32xf32>
    %228 = vector.broadcast %226 : vector<8x1xf32> to vector<8x32xf32>
    %229 = arith.mulf %227, %228 : vector<8x32xf32>
    %230 = arith.addf %224, %229 : vector<8x32xf32>
    %231 = vector.extract_strided_slice %78 {offsets = [6, 0], sizes = [1, 8], strides = [1, 1]} : vector<8x8xf32> to vector<1x8xf32>
    %cst_70 = arith.constant dense<0.000000e+00> : vector<1x32xf32>
    %232 = tpu.matmul %231, %230, %cst_70 {dimension_numbers = #tpu.dot_dimension_numbers<[1], [0], [0], [1], [0, 0, 1, 1], [], []>} : vector<1x8xf32>, vector<8x32xf32>, vector<1x32xf32> -> vector<1x32xf32>
    %c6_i32 = arith.constant 6 : i32
    %233 = vector.broadcast %c6_i32 : i32 to vector<8x32xi32>
    %234 = arith.cmpi eq, %97, %233 : vector<8x32xi32>
    %cst_71 = arith.constant 0.000000e+00 : f32
    %235 = vector.shape_cast %232 : vector<1x32xf32> to vector<1x32xf32>
    %236 = vector.broadcast %235 : vector<1x32xf32> to vector<8x32xf32>
    %237 = vector.broadcast %cst_71 : f32 to vector<8x32xf32>
    %238 = arith.select %234, %236, %237 : vector<8x32xi1>, vector<8x32xf32>
    %239 = arith.addf %219, %238 : vector<8x32xf32>
    %240 = vector.extract_strided_slice %93 {offsets = [7, 0], sizes = [1, 32], strides = [1, 1]} : vector<8x32xf32> to vector<1x32xf32>
    %241 = vector.broadcast %240 : vector<1x32xf32> to vector<8x32xf32>
    %242 = arith.mulf %241, %94 : vector<8x32xf32>
    %243 = math.exp %242 : vector<8x32xf32>
    %244 = arith.mulf %243, %230 : vector<8x32xf32>
    %245 = vector.extract_strided_slice %96 {offsets = [7, 0], sizes = [1, 32], strides = [1, 1]} : vector<8x32xf32> to vector<1x32xf32>
    %246 = vector.extract_strided_slice %95 {offsets = [0, 7], sizes = [8, 1], strides = [1, 1]} : vector<8x8xf32> to vector<8x1xf32>
    %247 = vector.broadcast %245 : vector<1x32xf32> to vector<8x32xf32>
    %248 = vector.broadcast %246 : vector<8x1xf32> to vector<8x32xf32>
    %249 = arith.mulf %247, %248 : vector<8x32xf32>
    %250 = arith.addf %244, %249 : vector<8x32xf32>
    %251 = vector.extract_strided_slice %78 {offsets = [7, 0], sizes = [1, 8], strides = [1, 1]} : vector<8x8xf32> to vector<1x8xf32>
    %cst_72 = arith.constant dense<0.000000e+00> : vector<1x32xf32>
    %252 = tpu.matmul %251, %250, %cst_72 {dimension_numbers = #tpu.dot_dimension_numbers<[1], [0], [0], [1], [0, 0, 1, 1], [], []>} : vector<1x8xf32>, vector<8x32xf32>, vector<1x32xf32> -> vector<1x32xf32>
    %c7_i32 = arith.constant 7 : i32
    %253 = vector.broadcast %c7_i32 : i32 to vector<8x32xi32>
    %254 = arith.cmpi eq, %97, %253 : vector<8x32xi32>
    %cst_73 = arith.constant 0.000000e+00 : f32
    %255 = vector.shape_cast %252 : vector<1x32xf32> to vector<1x32xf32>
    %256 = vector.broadcast %255 : vector<1x32xf32> to vector<8x32xf32>
    %257 = vector.broadcast %cst_73 : f32 to vector<8x32xf32>
    %258 = arith.select %254, %256, %257 : vector<8x32xi1>, vector<8x32xf32>
    %259 = arith.addf %239, %258 : vector<8x32xf32>
    %c0_74 = arith.constant 0 : index
    %c0_75 = arith.constant 0 : index
    %260 = vector.load %arg15[%c0_74, %c0_75] : memref<1x32xf32, #tpu.memory_space<vmem>>, vector<1x32xf32>
    %261 = vector.broadcast %260 : vector<1x32xf32> to vector<8x32xf32>
    %262 = arith.mulf %261, %68 : vector<8x32xf32>
    %263 = arith.addf %259, %262 : vector<8x32xf32>
    %264 = arith.mulf %263, %19 : vector<8x32xf32>
    %c0_76 = arith.constant 0 : index
    %c0_77 = arith.constant 0 : index
    %265 = vector.load %arg16[%c0_76, %c0_77] : memref<32x16xf32, #tpu.memory_space<vmem>>, vector<32x16xf32>
    %cst_78 = arith.constant dense<0.000000e+00> : vector<8x16xf32>
    %266 = tpu.matmul %264, %265, %cst_78 {dimension_numbers = #tpu.dot_dimension_numbers<[1], [0], [0], [1], [0, 0, 1, 1], [], []>} : vector<8x32xf32>, vector<32x16xf32>, vector<8x16xf32> -> vector<8x16xf32>
    %c0_79 = arith.constant 0 : index
    %c0_80 = arith.constant 0 : index
    %267 = vector.load %arg17[%c0_79, %c0_80] : memref<1x16xf32, #tpu.memory_space<vmem>>, vector<1x16xf32>
    %268 = vector.broadcast %267 : vector<1x16xf32> to vector<8x16xf32>
    %269 = arith.addf %266, %268 : vector<8x16xf32>
    %270 = arith.addf %269, %1 : vector<8x16xf32>
    %c0_81 = arith.constant 0 : index
    %c0_82 = arith.constant 0 : index
    %c0_83 = arith.constant 0 : index
    %271 = vector.load %arg18[%c0_81, %c0_82, %c0_83] : memref<1x8x16xf32, #tpu.memory_space<vmem>>, vector<1x8x16xf32>
    %272 = vector.shape_cast %271 : vector<1x8x16xf32> to vector<8x16xf32>
    %273 = vector.shape_cast %270 : vector<8x16xf32> to vector<1x8x16xf32>
    tpu.vector_store %arg18[%c0_81, %c0_82, %c0_83], %273 {strides = array<i32>} : memref<1x8x16xf32, #tpu.memory_space<vmem>>, vector<1x8x16xf32>,
    return
  }
  func.func @transform_0(%arg0: i32) -> (i32, i32, i32) {
    %c0_i32 = arith.constant 0 : i32
    %c0_i32_0 = arith.constant 0 : i32
    %c0_i32_1 = arith.constant 0 : i32
    return %arg0, %c0_i32, %c0_i32_0 : i32, i32, i32
  }
  func.func @transform_1(%arg0: i32) -> (i32, i32) {
    %c0_i32 = arith.constant 0 : i32
    %c0_i32_0 = arith.constant 0 : i32
    %c0_i32_1 = arith.constant 0 : i32
    return %c0_i32, %c0_i32_0 : i32, i32
  }
  func.func @transform_2(%arg0: i32) -> (i32, i32) {
    %c0_i32 = arith.constant 0 : i32
    %c0_i32_0 = arith.constant 0 : i32
    %c0_i32_1 = arith.constant 0 : i32
    return %c0_i32, %c0_i32_0 : i32, i32
  }
  func.func @transform_3(%arg0: i32) -> (i32, i32) {
    %c0_i32 = arith.constant 0 : i32
    %c0_i32_0 = arith.constant 0 : i32
    %c0_i32_1 = arith.constant 0 : i32
    return %c0_i32, %c0_i32_0 : i32, i32
  }
  func.func @transform_4(%arg0: i32) -> (i32, i32) {
    %c0_i32 = arith.constant 0 : i32
    %c0_i32_0 = arith.constant 0 : i32
    %c0_i32_1 = arith.constant 0 : i32
    return %c0_i32, %c0_i32_0 : i32, i32
  }
  func.func @transform_5(%arg0: i32) -> (i32, i32) {
    %c0_i32 = arith.constant 0 : i32
    %c0_i32_0 = arith.constant 0 : i32
    %c0_i32_1 = arith.constant 0 : i32
    return %c0_i32, %c0_i32_0 : i32, i32
  }
  func.func @transform_6(%arg0: i32) -> (i32, i32) {
    %c0_i32 = arith.constant 0 : i32
    %c0_i32_0 = arith.constant 0 : i32
    %c0_i32_1 = arith.constant 0 : i32
    return %c0_i32, %c0_i32_0 : i32, i32
  }
  func.func @transform_7(%arg0: i32) -> (i32, i32) {
    %c0_i32 = arith.constant 0 : i32
    %c0_i32_0 = arith.constant 0 : i32
    %c0_i32_1 = arith.constant 0 : i32
    return %c0_i32, %c0_i32_0 : i32, i32
  }
  func.func @transform_8(%arg0: i32) -> (i32, i32) {
    %c0_i32 = arith.constant 0 : i32
    %c0_i32_0 = arith.constant 0 : i32
    %c0_i32_1 = arith.constant 0 : i32
    return %c0_i32, %c0_i32_0 : i32, i32
  }
  func.func @transform_9(%arg0: i32) -> (i32, i32) {
    %c0_i32 = arith.constant 0 : i32
    %c0_i32_0 = arith.constant 0 : i32
    %c0_i32_1 = arith.constant 0 : i32
    return %c0_i32, %c0_i32_0 : i32, i32
  }
  func.func @transform_10(%arg0: i32) -> (i32, i32) {
    %c0_i32 = arith.constant 0 : i32
    %c0_i32_0 = arith.constant 0 : i32
    %c0_i32_1 = arith.constant 0 : i32
    return %c0_i32, %c0_i32_0 : i32, i32
  }
  func.func @transform_11(%arg0: i32) -> (i32, i32) {
    %c0_i32 = arith.constant 0 : i32
    %c0_i32_0 = arith.constant 0 : i32
    %c0_i32_1 = arith.constant 0 : i32
    return %c0_i32, %c0_i32_0 : i32, i32
  }
  func.func @transform_12(%arg0: i32) -> (i32, i32) {
    %c0_i32 = arith.constant 0 : i32
    %c0_i32_0 = arith.constant 0 : i32
    %c0_i32_1 = arith.constant 0 : i32
    return %c0_i32, %c0_i32_0 : i32, i32
  }
  func.func @transform_13(%arg0: i32) -> (i32, i32) {
    %c0_i32 = arith.constant 0 : i32
    %c0_i32_0 = arith.constant 0 : i32
    %c0_i32_1 = arith.constant 0 : i32
    return %c0_i32, %c0_i32_0 : i32, i32
  }
  func.func @transform_14(%arg0: i32) -> (i32, i32) {
    %c0_i32 = arith.constant 0 : i32
    %c0_i32_0 = arith.constant 0 : i32
    %c0_i32_1 = arith.constant 0 : i32
    return %c0_i32, %c0_i32_0 : i32, i32
  }
  func.func @transform_15(%arg0: i32) -> (i32, i32) {
    %c0_i32 = arith.constant 0 : i32
    %c0_i32_0 = arith.constant 0 : i32
    %c0_i32_1 = arith.constant 0 : i32
    return %c0_i32, %c0_i32_0 : i32, i32
  }
  func.func @transform_16(%arg0: i32) -> (i32, i32) {
    %c0_i32 = arith.constant 0 : i32
    %c0_i32_0 = arith.constant 0 : i32
    %c0_i32_1 = arith.constant 0 : i32
    return %c0_i32, %c0_i32_0 : i32, i32
  }
  func.func @transform_17(%arg0: i32) -> (i32, i32, i32) {
    %c0_i32 = arith.constant 0 : i32
    %c0_i32_0 = arith.constant 0 : i32
    %c0_i32_1 = arith.constant 0 : i32
    return %arg0, %c0_i32, %c0_i32_0 : i32, i32, i32
  }
}

module attributes {stable_mosaic.version = 11 : i64} {
  func.func @_mamba_kernel(%arg0: i32, %arg1: memref<1x16x16xf32, #tpu.memory_space<vmem>>, %arg2: memref<16x32xf32, #tpu.memory_space<vmem>>, %arg3: memref<16x32xf32, #tpu.memory_space<vmem>>, %arg4: memref<1x32xf32, #tpu.memory_space<vmem>>, %arg5: memref<1x32xf32, #tpu.memory_space<vmem>>, %arg6: memref<4x32xf32, #tpu.memory_space<vmem>>, %arg7: memref<1x32xf32, #tpu.memory_space<vmem>>, %arg8: memref<32x8xf32, #tpu.memory_space<vmem>>, %arg9: memref<1x8xf32, #tpu.memory_space<vmem>>, %arg10: memref<32x8xf32, #tpu.memory_space<vmem>>, %arg11: memref<1x8xf32, #tpu.memory_space<vmem>>, %arg12: memref<32x32xf32, #tpu.memory_space<vmem>>, %arg13: memref<1x32xf32, #tpu.memory_space<vmem>>, %arg14: memref<8x32xf32, #tpu.memory_space<vmem>>, %arg15: memref<1x32xf32, #tpu.memory_space<vmem>>, %arg16: memref<32x16xf32, #tpu.memory_space<vmem>>, %arg17: memref<1x16xf32, #tpu.memory_space<vmem>>, %arg18: memref<1x16x16xf32, #tpu.memory_space<vmem>>) attributes {dimension_semantics = [#tpu.dimension_semantics<parallel>], iteration_bounds = array<i64: 16>, scalar_prefetch = 0 : i64, scratch_operands = 0 : i64, tpu.core_type = #tpu.core_type<tc>, window_params = [{transform_indices = @transform_0, window_bounds = array<i64: 1, 16, 16>}, {pipeline_mode = #tpu.pipeline_mode<synchronous>, transform_indices = @transform_1, window_bounds = array<i64: 16, 32>}, {pipeline_mode = #tpu.pipeline_mode<synchronous>, transform_indices = @transform_2, window_bounds = array<i64: 16, 32>}, {pipeline_mode = #tpu.pipeline_mode<synchronous>, transform_indices = @transform_3, window_bounds = array<i64: 1, 32>}, {pipeline_mode = #tpu.pipeline_mode<synchronous>, transform_indices = @transform_4, window_bounds = array<i64: 1, 32>}, {pipeline_mode = #tpu.pipeline_mode<synchronous>, transform_indices = @transform_5, window_bounds = array<i64: 4, 32>}, {pipeline_mode = #tpu.pipeline_mode<synchronous>, transform_indices = @transform_6, window_bounds = array<i64: 1, 32>}, {pipeline_mode = #tpu.pipeline_mode<synchronous>, transform_indices = @transform_7, window_bounds = array<i64: 32, 8>}, {pipeline_mode = #tpu.pipeline_mode<synchronous>, transform_indices = @transform_8, window_bounds = array<i64: 1, 8>}, {pipeline_mode = #tpu.pipeline_mode<synchronous>, transform_indices = @transform_9, window_bounds = array<i64: 32, 8>}, {pipeline_mode = #tpu.pipeline_mode<synchronous>, transform_indices = @transform_10, window_bounds = array<i64: 1, 8>}, {pipeline_mode = #tpu.pipeline_mode<synchronous>, transform_indices = @transform_11, window_bounds = array<i64: 32, 32>}, {pipeline_mode = #tpu.pipeline_mode<synchronous>, transform_indices = @transform_12, window_bounds = array<i64: 1, 32>}, {pipeline_mode = #tpu.pipeline_mode<synchronous>, transform_indices = @transform_13, window_bounds = array<i64: 8, 32>}, {pipeline_mode = #tpu.pipeline_mode<synchronous>, transform_indices = @transform_14, window_bounds = array<i64: 1, 32>}, {pipeline_mode = #tpu.pipeline_mode<synchronous>, transform_indices = @transform_15, window_bounds = array<i64: 32, 16>}, {pipeline_mode = #tpu.pipeline_mode<synchronous>, transform_indices = @transform_16, window_bounds = array<i64: 1, 16>}, {transform_indices = @transform_17, window_bounds = array<i64: 1, 16, 16>}]} {
    %c0 = arith.constant 0 : index
    %c0_0 = arith.constant 0 : index
    %c0_1 = arith.constant 0 : index
    %0 = vector.load %arg1[%c0, %c0_0, %c0_1] : memref<1x16x16xf32, #tpu.memory_space<vmem>>, vector<1x16x16xf32>
    %1 = vector.shape_cast %0 : vector<1x16x16xf32> to vector<16x16xf32>
    %c0_2 = arith.constant 0 : index
    %c0_3 = arith.constant 0 : index
    %2 = vector.load %arg2[%c0_2, %c0_3] : memref<16x32xf32, #tpu.memory_space<vmem>>, vector<16x32xf32>
    %cst = arith.constant dense<0.000000e+00> : vector<16x32xf32>
    %3 = tpu.matmul %1, %2, %cst {dimension_numbers = #tpu.dot_dimension_numbers<[1], [0], [0], [1], [0, 0, 1, 1], [], []>} : vector<16x16xf32>, vector<16x32xf32>, vector<16x32xf32> -> vector<16x32xf32>
    %c0_4 = arith.constant 0 : index
    %c0_5 = arith.constant 0 : index
    %4 = vector.load %arg4[%c0_4, %c0_5] : memref<1x32xf32, #tpu.memory_space<vmem>>, vector<1x32xf32>
    %5 = vector.broadcast %4 : vector<1x32xf32> to vector<16x32xf32>
    %6 = arith.addf %3, %5 : vector<16x32xf32>
    %c0_6 = arith.constant 0 : index
    %c0_7 = arith.constant 0 : index
    %7 = vector.load %arg3[%c0_6, %c0_7] : memref<16x32xf32, #tpu.memory_space<vmem>>, vector<16x32xf32>
    %cst_8 = arith.constant dense<0.000000e+00> : vector<16x32xf32>
    %8 = tpu.matmul %1, %7, %cst_8 {dimension_numbers = #tpu.dot_dimension_numbers<[1], [0], [0], [1], [0, 0, 1, 1], [], []>} : vector<16x16xf32>, vector<16x32xf32>, vector<16x32xf32> -> vector<16x32xf32>
    %c0_9 = arith.constant 0 : index
    %c0_10 = arith.constant 0 : index
    %9 = vector.load %arg5[%c0_9, %c0_10] : memref<1x32xf32, #tpu.memory_space<vmem>>, vector<1x32xf32>
    %10 = vector.broadcast %9 : vector<1x32xf32> to vector<16x32xf32>
    %11 = arith.addf %8, %10 : vector<16x32xf32>
    %cst_11 = arith.constant 0.000000e+00 : f32
    %12 = vector.broadcast %cst_11 : f32 to vector<16x32xf32>
    %13 = arith.subf %12, %11 : vector<16x32xf32>
    %14 = math.exp %13 : vector<16x32xf32>
    %cst_12 = arith.constant 1.000000e+00 : f32
    %15 = vector.broadcast %cst_12 : f32 to vector<16x32xf32>
    %16 = arith.addf %15, %14 : vector<16x32xf32>
    %cst_13 = arith.constant 1.000000e+00 : f32
    %17 = vector.broadcast %cst_13 : f32 to vector<16x32xf32>
    %18 = arith.divf %17, %16 : vector<16x32xf32>
    %19 = arith.mulf %11, %18 : vector<16x32xf32>
    %20 = tpu.iota {dimensions = array<i32: 0>} : vector<16x16xi32>
    %21 = tpu.iota {dimensions = array<i32: 1>} : vector<16x16xi32>
    %c3 = arith.constant 3 : index
    %c0_14 = arith.constant 0 : index
    %22 = vector.load %arg6[%c3, %c0_14] : memref<4x32xf32, #tpu.memory_space<vmem>>, vector<1x32xf32>
    %23 = vector.broadcast %22 : vector<1x32xf32> to vector<16x32xf32>
    %24 = arith.mulf %6, %23 : vector<16x32xf32>
    %c3_i32 = arith.constant 3 : i32
    %25 = vector.broadcast %c3_i32 : i32 to vector<16x16xi32>
    %26 = arith.subi %20, %25 : vector<16x16xi32>
    %27 = arith.cmpi eq, %21, %26 : vector<16x16xi32>
    %cst_15 = arith.constant 1.000000e+00 : f32
    %cst_16 = arith.constant 0.000000e+00 : f32
    %28 = vector.broadcast %cst_15 : f32 to vector<16x16xf32>
    %29 = vector.broadcast %cst_16 : f32 to vector<16x16xf32>
    %30 = arith.select %27, %28, %29 : vector<16x16xi1>, vector<16x16xf32>
    %cst_17 = arith.constant dense<0.000000e+00> : vector<16x32xf32>
    %31 = tpu.matmul %30, %6, %cst_17 {dimension_numbers = #tpu.dot_dimension_numbers<[1], [0], [0], [1], [0, 0, 1, 1], [], []>} : vector<16x16xf32>, vector<16x32xf32>, vector<16x32xf32> -> vector<16x32xf32>
    %c0_18 = arith.constant 0 : index
    %c0_19 = arith.constant 0 : index
    %32 = vector.load %arg6[%c0_18, %c0_19] : memref<4x32xf32, #tpu.memory_space<vmem>>, vector<1x32xf32>
    %33 = vector.broadcast %32 : vector<1x32xf32> to vector<16x32xf32>
    %34 = arith.mulf %31, %33 : vector<16x32xf32>
    %35 = arith.addf %24, %34 : vector<16x32xf32>
    %c2_i32 = arith.constant 2 : i32
    %36 = vector.broadcast %c2_i32 : i32 to vector<16x16xi32>
    %37 = arith.subi %20, %36 : vector<16x16xi32>
    %38 = arith.cmpi eq, %21, %37 : vector<16x16xi32>
    %cst_20 = arith.constant 1.000000e+00 : f32
    %cst_21 = arith.constant 0.000000e+00 : f32
    %39 = vector.broadcast %cst_20 : f32 to vector<16x16xf32>
    %40 = vector.broadcast %cst_21 : f32 to vector<16x16xf32>
    %41 = arith.select %38, %39, %40 : vector<16x16xi1>, vector<16x16xf32>
    %cst_22 = arith.constant dense<0.000000e+00> : vector<16x32xf32>
    %42 = tpu.matmul %41, %6, %cst_22 {dimension_numbers = #tpu.dot_dimension_numbers<[1], [0], [0], [1], [0, 0, 1, 1], [], []>} : vector<16x16xf32>, vector<16x32xf32>, vector<16x32xf32> -> vector<16x32xf32>
    %c1 = arith.constant 1 : index
    %c0_23 = arith.constant 0 : index
    %43 = vector.load %arg6[%c1, %c0_23] : memref<4x32xf32, #tpu.memory_space<vmem>>, vector<1x32xf32>
    %44 = vector.broadcast %43 : vector<1x32xf32> to vector<16x32xf32>
    %45 = arith.mulf %42, %44 : vector<16x32xf32>
    %46 = arith.addf %35, %45 : vector<16x32xf32>
    %c1_i32 = arith.constant 1 : i32
    %47 = vector.broadcast %c1_i32 : i32 to vector<16x16xi32>
    %48 = arith.subi %20, %47 : vector<16x16xi32>
    %49 = arith.cmpi eq, %21, %48 : vector<16x16xi32>
    %cst_24 = arith.constant 1.000000e+00 : f32
    %cst_25 = arith.constant 0.000000e+00 : f32
    %50 = vector.broadcast %cst_24 : f32 to vector<16x16xf32>
    %51 = vector.broadcast %cst_25 : f32 to vector<16x16xf32>
    %52 = arith.select %49, %50, %51 : vector<16x16xi1>, vector<16x16xf32>
    %cst_26 = arith.constant dense<0.000000e+00> : vector<16x32xf32>
    %53 = tpu.matmul %52, %6, %cst_26 {dimension_numbers = #tpu.dot_dimension_numbers<[1], [0], [0], [1], [0, 0, 1, 1], [], []>} : vector<16x16xf32>, vector<16x32xf32>, vector<16x32xf32> -> vector<16x32xf32>
    %c2 = arith.constant 2 : index
    %c0_27 = arith.constant 0 : index
    %54 = vector.load %arg6[%c2, %c0_27] : memref<4x32xf32, #tpu.memory_space<vmem>>, vector<1x32xf32>
    %55 = vector.broadcast %54 : vector<1x32xf32> to vector<16x32xf32>
    %56 = arith.mulf %53, %55 : vector<16x32xf32>
    %57 = arith.addf %46, %56 : vector<16x32xf32>
    %c0_28 = arith.constant 0 : index
    %c0_29 = arith.constant 0 : index
    %58 = vector.load %arg7[%c0_28, %c0_29] : memref<1x32xf32, #tpu.memory_space<vmem>>, vector<1x32xf32>
    %59 = vector.broadcast %58 : vector<1x32xf32> to vector<16x32xf32>
    %60 = arith.addf %57, %59 : vector<16x32xf32>
    %cst_30 = arith.constant 0.000000e+00 : f32
    %61 = vector.broadcast %cst_30 : f32 to vector<16x32xf32>
    %62 = arith.subf %61, %60 : vector<16x32xf32>
    %63 = math.exp %62 : vector<16x32xf32>
    %cst_31 = arith.constant 1.000000e+00 : f32
    %64 = vector.broadcast %cst_31 : f32 to vector<16x32xf32>
    %65 = arith.addf %64, %63 : vector<16x32xf32>
    %cst_32 = arith.constant 1.000000e+00 : f32
    %66 = vector.broadcast %cst_32 : f32 to vector<16x32xf32>
    %67 = arith.divf %66, %65 : vector<16x32xf32>
    %68 = arith.mulf %60, %67 : vector<16x32xf32>
    %c0_33 = arith.constant 0 : index
    %c0_34 = arith.constant 0 : index
    %69 = vector.load %arg8[%c0_33, %c0_34] : memref<32x8xf32, #tpu.memory_space<vmem>>, vector<32x8xf32>
    %cst_35 = arith.constant dense<0.000000e+00> : vector<16x8xf32>
    %70 = tpu.matmul %68, %69, %cst_35 {dimension_numbers = #tpu.dot_dimension_numbers<[1], [0], [0], [1], [0, 0, 1, 1], [], []>} : vector<16x32xf32>, vector<32x8xf32>, vector<16x8xf32> -> vector<16x8xf32>
    %c0_36 = arith.constant 0 : index
    %c0_37 = arith.constant 0 : index
    %71 = vector.load %arg9[%c0_36, %c0_37] : memref<1x8xf32, #tpu.memory_space<vmem>>, vector<1x8xf32>
    %72 = vector.broadcast %71 : vector<1x8xf32> to vector<16x8xf32>
    %73 = arith.addf %70, %72 : vector<16x8xf32>
    %c0_38 = arith.constant 0 : index
    %c0_39 = arith.constant 0 : index
    %74 = vector.load %arg10[%c0_38, %c0_39] : memref<32x8xf32, #tpu.memory_space<vmem>>, vector<32x8xf32>
    %cst_40 = arith.constant dense<0.000000e+00> : vector<16x8xf32>
    %75 = tpu.matmul %68, %74, %cst_40 {dimension_numbers = #tpu.dot_dimension_numbers<[1], [0], [0], [1], [0, 0, 1, 1], [], []>} : vector<16x32xf32>, vector<32x8xf32>, vector<16x8xf32> -> vector<16x8xf32>
    %c0_41 = arith.constant 0 : index
    %c0_42 = arith.constant 0 : index
    %76 = vector.load %arg11[%c0_41, %c0_42] : memref<1x8xf32, #tpu.memory_space<vmem>>, vector<1x8xf32>
    %77 = vector.broadcast %76 : vector<1x8xf32> to vector<16x8xf32>
    %78 = arith.addf %75, %77 : vector<16x8xf32>
    %c0_43 = arith.constant 0 : index
    %c0_44 = arith.constant 0 : index
    %79 = vector.load %arg12[%c0_43, %c0_44] : memref<32x32xf32, #tpu.memory_space<vmem>>, vector<32x32xf32>
    %cst_45 = arith.constant dense<0.000000e+00> : vector<16x32xf32>
    %80 = tpu.matmul %68, %79, %cst_45 {dimension_numbers = #tpu.dot_dimension_numbers<[1], [0], [0], [1], [0, 0, 1, 1], [], []>} : vector<16x32xf32>, vector<32x32xf32>, vector<16x32xf32> -> vector<16x32xf32>
    %c0_46 = arith.constant 0 : index
    %c0_47 = arith.constant 0 : index
    %81 = vector.load %arg13[%c0_46, %c0_47] : memref<1x32xf32, #tpu.memory_space<vmem>>, vector<1x32xf32>
    %82 = vector.broadcast %81 : vector<1x32xf32> to vector<16x32xf32>
    %83 = arith.addf %80, %82 : vector<16x32xf32>
    %cst_48 = arith.constant 0.000000e+00 : f32
    %84 = vector.broadcast %cst_48 : f32 to vector<16x32xf32>
    %85 = arith.maximumf %83, %84 : vector<16x32xf32>
    %86 = math.absf %83 : vector<16x32xf32>
    %cst_49 = arith.constant 0.000000e+00 : f32
    %87 = vector.broadcast %cst_49 : f32 to vector<16x32xf32>
    %88 = arith.subf %87, %86 : vector<16x32xf32>
    %89 = math.exp %88 : vector<16x32xf32>
    %cst_50 = arith.constant 1.000000e+00 : f32
    %90 = vector.broadcast %cst_50 : f32 to vector<16x32xf32>
    %91 = arith.addf %90, %89 : vector<16x32xf32>
    %92 = math.log %91 : vector<16x32xf32>
    %93 = arith.addf %85, %92 : vector<16x32xf32>
    %c0_51 = arith.constant 0 : index
    %c0_52 = arith.constant 0 : index
    %94 = vector.load %arg14[%c0_51, %c0_52] : memref<8x32xf32, #tpu.memory_space<vmem>>, vector<8x32xf32>
    %95 = tpu.transpose %73, [1, 0] : vector<16x8xf32> -> vector<8x16xf32>
    %96 = arith.mulf %93, %68 : vector<16x32xf32>
    %97 = tpu.iota {dimensions = array<i32: 0>} : vector<16x32xi32>
    %cst_53 = arith.constant 0.000000e+00 : f32
    %98 = vector.broadcast %cst_53 : f32 to vector<8x32xf32>
    %cst_54 = arith.constant 0.000000e+00 : f32
    %99 = vector.broadcast %cst_54 : f32 to vector<16x32xf32>
    %100 = vector.extract_strided_slice %93 {offsets = [0, 0], sizes = [1, 32], strides = [1, 1]} : vector<16x32xf32> to vector<1x32xf32>
    %101 = vector.broadcast %100 : vector<1x32xf32> to vector<8x32xf32>
    %102 = arith.mulf %101, %94 : vector<8x32xf32>
    %103 = math.exp %102 : vector<8x32xf32>
    %104 = arith.mulf %103, %98 : vector<8x32xf32>
    %105 = vector.extract_strided_slice %96 {offsets = [0, 0], sizes = [1, 32], strides = [1, 1]} : vector<16x32xf32> to vector<1x32xf32>
    %106 = vector.extract_strided_slice %95 {offsets = [0, 0], sizes = [8, 1], strides = [1, 1]} : vector<8x16xf32> to vector<8x1xf32>
    %107 = vector.broadcast %105 : vector<1x32xf32> to vector<8x32xf32>
    %108 = vector.broadcast %106 : vector<8x1xf32> to vector<8x32xf32>
    %109 = arith.mulf %107, %108 : vector<8x32xf32>
    %110 = arith.addf %104, %109 : vector<8x32xf32>
    %111 = vector.extract_strided_slice %78 {offsets = [0, 0], sizes = [1, 8], strides = [1, 1]} : vector<16x8xf32> to vector<1x8xf32>
    %cst_55 = arith.constant dense<0.000000e+00> : vector<1x32xf32>
    %112 = tpu.matmul %111, %110, %cst_55 {dimension_numbers = #tpu.dot_dimension_numbers<[1], [0], [0], [1], [0, 0, 1, 1], [], []>} : vector<1x8xf32>, vector<8x32xf32>, vector<1x32xf32> -> vector<1x32xf32>
    %c0_i32 = arith.constant 0 : i32
    %113 = vector.broadcast %c0_i32 : i32 to vector<16x32xi32>
    %114 = arith.cmpi eq, %97, %113 : vector<16x32xi32>
    %cst_56 = arith.constant 0.000000e+00 : f32
    %115 = vector.shape_cast %112 : vector<1x32xf32> to vector<1x32xf32>
    %116 = vector.broadcast %115 : vector<1x32xf32> to vector<16x32xf32>
    %117 = vector.broadcast %cst_56 : f32 to vector<16x32xf32>
    %118 = arith.select %114, %116, %117 : vector<16x32xi1>, vector<16x32xf32>
    %119 = arith.addf %99, %118 : vector<16x32xf32>
    %120 = vector.extract_strided_slice %93 {offsets = [1, 0], sizes = [1, 32], strides = [1, 1]} : vector<16x32xf32> to vector<1x32xf32>
    %121 = vector.broadcast %120 : vector<1x32xf32> to vector<8x32xf32>
    %122 = arith.mulf %121, %94 : vector<8x32xf32>
    %123 = math.exp %122 : vector<8x32xf32>
    %124 = arith.mulf %123, %110 : vector<8x32xf32>
    %125 = vector.extract_strided_slice %96 {offsets = [1, 0], sizes = [1, 32], strides = [1, 1]} : vector<16x32xf32> to vector<1x32xf32>
    %126 = vector.extract_strided_slice %95 {offsets = [0, 1], sizes = [8, 1], strides = [1, 1]} : vector<8x16xf32> to vector<8x1xf32>
    %127 = vector.broadcast %125 : vector<1x32xf32> to vector<8x32xf32>
    %128 = vector.broadcast %126 : vector<8x1xf32> to vector<8x32xf32>
    %129 = arith.mulf %127, %128 : vector<8x32xf32>
    %130 = arith.addf %124, %129 : vector<8x32xf32>
    %131 = vector.extract_strided_slice %78 {offsets = [1, 0], sizes = [1, 8], strides = [1, 1]} : vector<16x8xf32> to vector<1x8xf32>
    %cst_57 = arith.constant dense<0.000000e+00> : vector<1x32xf32>
    %132 = tpu.matmul %131, %130, %cst_57 {dimension_numbers = #tpu.dot_dimension_numbers<[1], [0], [0], [1], [0, 0, 1, 1], [], []>} : vector<1x8xf32>, vector<8x32xf32>, vector<1x32xf32> -> vector<1x32xf32>
    %c1_i32_58 = arith.constant 1 : i32
    %133 = vector.broadcast %c1_i32_58 : i32 to vector<16x32xi32>
    %134 = arith.cmpi eq, %97, %133 : vector<16x32xi32>
    %cst_59 = arith.constant 0.000000e+00 : f32
    %135 = vector.shape_cast %132 : vector<1x32xf32> to vector<1x32xf32>
    %136 = vector.broadcast %135 : vector<1x32xf32> to vector<16x32xf32>
    %137 = vector.broadcast %cst_59 : f32 to vector<16x32xf32>
    %138 = arith.select %134, %136, %137 : vector<16x32xi1>, vector<16x32xf32>
    %139 = arith.addf %119, %138 : vector<16x32xf32>
    %140 = vector.extract_strided_slice %93 {offsets = [2, 0], sizes = [1, 32], strides = [1, 1]} : vector<16x32xf32> to vector<1x32xf32>
    %141 = vector.broadcast %140 : vector<1x32xf32> to vector<8x32xf32>
    %142 = arith.mulf %141, %94 : vector<8x32xf32>
    %143 = math.exp %142 : vector<8x32xf32>
    %144 = arith.mulf %143, %130 : vector<8x32xf32>
    %145 = vector.extract_strided_slice %96 {offsets = [2, 0], sizes = [1, 32], strides = [1, 1]} : vector<16x32xf32> to vector<1x32xf32>
    %146 = vector.extract_strided_slice %95 {offsets = [0, 2], sizes = [8, 1], strides = [1, 1]} : vector<8x16xf32> to vector<8x1xf32>
    %147 = vector.broadcast %145 : vector<1x32xf32> to vector<8x32xf32>
    %148 = vector.broadcast %146 : vector<8x1xf32> to vector<8x32xf32>
    %149 = arith.mulf %147, %148 : vector<8x32xf32>
    %150 = arith.addf %144, %149 : vector<8x32xf32>
    %151 = vector.extract_strided_slice %78 {offsets = [2, 0], sizes = [1, 8], strides = [1, 1]} : vector<16x8xf32> to vector<1x8xf32>
    %cst_60 = arith.constant dense<0.000000e+00> : vector<1x32xf32>
    %152 = tpu.matmul %151, %150, %cst_60 {dimension_numbers = #tpu.dot_dimension_numbers<[1], [0], [0], [1], [0, 0, 1, 1], [], []>} : vector<1x8xf32>, vector<8x32xf32>, vector<1x32xf32> -> vector<1x32xf32>
    %c2_i32_61 = arith.constant 2 : i32
    %153 = vector.broadcast %c2_i32_61 : i32 to vector<16x32xi32>
    %154 = arith.cmpi eq, %97, %153 : vector<16x32xi32>
    %cst_62 = arith.constant 0.000000e+00 : f32
    %155 = vector.shape_cast %152 : vector<1x32xf32> to vector<1x32xf32>
    %156 = vector.broadcast %155 : vector<1x32xf32> to vector<16x32xf32>
    %157 = vector.broadcast %cst_62 : f32 to vector<16x32xf32>
    %158 = arith.select %154, %156, %157 : vector<16x32xi1>, vector<16x32xf32>
    %159 = arith.addf %139, %158 : vector<16x32xf32>
    %160 = vector.extract_strided_slice %93 {offsets = [3, 0], sizes = [1, 32], strides = [1, 1]} : vector<16x32xf32> to vector<1x32xf32>
    %161 = vector.broadcast %160 : vector<1x32xf32> to vector<8x32xf32>
    %162 = arith.mulf %161, %94 : vector<8x32xf32>
    %163 = math.exp %162 : vector<8x32xf32>
    %164 = arith.mulf %163, %150 : vector<8x32xf32>
    %165 = vector.extract_strided_slice %96 {offsets = [3, 0], sizes = [1, 32], strides = [1, 1]} : vector<16x32xf32> to vector<1x32xf32>
    %166 = vector.extract_strided_slice %95 {offsets = [0, 3], sizes = [8, 1], strides = [1, 1]} : vector<8x16xf32> to vector<8x1xf32>
    %167 = vector.broadcast %165 : vector<1x32xf32> to vector<8x32xf32>
    %168 = vector.broadcast %166 : vector<8x1xf32> to vector<8x32xf32>
    %169 = arith.mulf %167, %168 : vector<8x32xf32>
    %170 = arith.addf %164, %169 : vector<8x32xf32>
    %171 = vector.extract_strided_slice %78 {offsets = [3, 0], sizes = [1, 8], strides = [1, 1]} : vector<16x8xf32> to vector<1x8xf32>
    %cst_63 = arith.constant dense<0.000000e+00> : vector<1x32xf32>
    %172 = tpu.matmul %171, %170, %cst_63 {dimension_numbers = #tpu.dot_dimension_numbers<[1], [0], [0], [1], [0, 0, 1, 1], [], []>} : vector<1x8xf32>, vector<8x32xf32>, vector<1x32xf32> -> vector<1x32xf32>
    %c3_i32_64 = arith.constant 3 : i32
    %173 = vector.broadcast %c3_i32_64 : i32 to vector<16x32xi32>
    %174 = arith.cmpi eq, %97, %173 : vector<16x32xi32>
    %cst_65 = arith.constant 0.000000e+00 : f32
    %175 = vector.shape_cast %172 : vector<1x32xf32> to vector<1x32xf32>
    %176 = vector.broadcast %175 : vector<1x32xf32> to vector<16x32xf32>
    %177 = vector.broadcast %cst_65 : f32 to vector<16x32xf32>
    %178 = arith.select %174, %176, %177 : vector<16x32xi1>, vector<16x32xf32>
    %179 = arith.addf %159, %178 : vector<16x32xf32>
    %180 = vector.extract_strided_slice %93 {offsets = [4, 0], sizes = [1, 32], strides = [1, 1]} : vector<16x32xf32> to vector<1x32xf32>
    %181 = vector.broadcast %180 : vector<1x32xf32> to vector<8x32xf32>
    %182 = arith.mulf %181, %94 : vector<8x32xf32>
    %183 = math.exp %182 : vector<8x32xf32>
    %184 = arith.mulf %183, %170 : vector<8x32xf32>
    %185 = vector.extract_strided_slice %96 {offsets = [4, 0], sizes = [1, 32], strides = [1, 1]} : vector<16x32xf32> to vector<1x32xf32>
    %186 = vector.extract_strided_slice %95 {offsets = [0, 4], sizes = [8, 1], strides = [1, 1]} : vector<8x16xf32> to vector<8x1xf32>
    %187 = vector.broadcast %185 : vector<1x32xf32> to vector<8x32xf32>
    %188 = vector.broadcast %186 : vector<8x1xf32> to vector<8x32xf32>
    %189 = arith.mulf %187, %188 : vector<8x32xf32>
    %190 = arith.addf %184, %189 : vector<8x32xf32>
    %191 = vector.extract_strided_slice %78 {offsets = [4, 0], sizes = [1, 8], strides = [1, 1]} : vector<16x8xf32> to vector<1x8xf32>
    %cst_66 = arith.constant dense<0.000000e+00> : vector<1x32xf32>
    %192 = tpu.matmul %191, %190, %cst_66 {dimension_numbers = #tpu.dot_dimension_numbers<[1], [0], [0], [1], [0, 0, 1, 1], [], []>} : vector<1x8xf32>, vector<8x32xf32>, vector<1x32xf32> -> vector<1x32xf32>
    %c4_i32 = arith.constant 4 : i32
    %193 = vector.broadcast %c4_i32 : i32 to vector<16x32xi32>
    %194 = arith.cmpi eq, %97, %193 : vector<16x32xi32>
    %cst_67 = arith.constant 0.000000e+00 : f32
    %195 = vector.shape_cast %192 : vector<1x32xf32> to vector<1x32xf32>
    %196 = vector.broadcast %195 : vector<1x32xf32> to vector<16x32xf32>
    %197 = vector.broadcast %cst_67 : f32 to vector<16x32xf32>
    %198 = arith.select %194, %196, %197 : vector<16x32xi1>, vector<16x32xf32>
    %199 = arith.addf %179, %198 : vector<16x32xf32>
    %200 = vector.extract_strided_slice %93 {offsets = [5, 0], sizes = [1, 32], strides = [1, 1]} : vector<16x32xf32> to vector<1x32xf32>
    %201 = vector.broadcast %200 : vector<1x32xf32> to vector<8x32xf32>
    %202 = arith.mulf %201, %94 : vector<8x32xf32>
    %203 = math.exp %202 : vector<8x32xf32>
    %204 = arith.mulf %203, %190 : vector<8x32xf32>
    %205 = vector.extract_strided_slice %96 {offsets = [5, 0], sizes = [1, 32], strides = [1, 1]} : vector<16x32xf32> to vector<1x32xf32>
    %206 = vector.extract_strided_slice %95 {offsets = [0, 5], sizes = [8, 1], strides = [1, 1]} : vector<8x16xf32> to vector<8x1xf32>
    %207 = vector.broadcast %205 : vector<1x32xf32> to vector<8x32xf32>
    %208 = vector.broadcast %206 : vector<8x1xf32> to vector<8x32xf32>
    %209 = arith.mulf %207, %208 : vector<8x32xf32>
    %210 = arith.addf %204, %209 : vector<8x32xf32>
    %211 = vector.extract_strided_slice %78 {offsets = [5, 0], sizes = [1, 8], strides = [1, 1]} : vector<16x8xf32> to vector<1x8xf32>
    %cst_68 = arith.constant dense<0.000000e+00> : vector<1x32xf32>
    %212 = tpu.matmul %211, %210, %cst_68 {dimension_numbers = #tpu.dot_dimension_numbers<[1], [0], [0], [1], [0, 0, 1, 1], [], []>} : vector<1x8xf32>, vector<8x32xf32>, vector<1x32xf32> -> vector<1x32xf32>
    %c5_i32 = arith.constant 5 : i32
    %213 = vector.broadcast %c5_i32 : i32 to vector<16x32xi32>
    %214 = arith.cmpi eq, %97, %213 : vector<16x32xi32>
    %cst_69 = arith.constant 0.000000e+00 : f32
    %215 = vector.shape_cast %212 : vector<1x32xf32> to vector<1x32xf32>
    %216 = vector.broadcast %215 : vector<1x32xf32> to vector<16x32xf32>
    %217 = vector.broadcast %cst_69 : f32 to vector<16x32xf32>
    %218 = arith.select %214, %216, %217 : vector<16x32xi1>, vector<16x32xf32>
    %219 = arith.addf %199, %218 : vector<16x32xf32>
    %220 = vector.extract_strided_slice %93 {offsets = [6, 0], sizes = [1, 32], strides = [1, 1]} : vector<16x32xf32> to vector<1x32xf32>
    %221 = vector.broadcast %220 : vector<1x32xf32> to vector<8x32xf32>
    %222 = arith.mulf %221, %94 : vector<8x32xf32>
    %223 = math.exp %222 : vector<8x32xf32>
    %224 = arith.mulf %223, %210 : vector<8x32xf32>
    %225 = vector.extract_strided_slice %96 {offsets = [6, 0], sizes = [1, 32], strides = [1, 1]} : vector<16x32xf32> to vector<1x32xf32>
    %226 = vector.extract_strided_slice %95 {offsets = [0, 6], sizes = [8, 1], strides = [1, 1]} : vector<8x16xf32> to vector<8x1xf32>
    %227 = vector.broadcast %225 : vector<1x32xf32> to vector<8x32xf32>
    %228 = vector.broadcast %226 : vector<8x1xf32> to vector<8x32xf32>
    %229 = arith.mulf %227, %228 : vector<8x32xf32>
    %230 = arith.addf %224, %229 : vector<8x32xf32>
    %231 = vector.extract_strided_slice %78 {offsets = [6, 0], sizes = [1, 8], strides = [1, 1]} : vector<16x8xf32> to vector<1x8xf32>
    %cst_70 = arith.constant dense<0.000000e+00> : vector<1x32xf32>
    %232 = tpu.matmul %231, %230, %cst_70 {dimension_numbers = #tpu.dot_dimension_numbers<[1], [0], [0], [1], [0, 0, 1, 1], [], []>} : vector<1x8xf32>, vector<8x32xf32>, vector<1x32xf32> -> vector<1x32xf32>
    %c6_i32 = arith.constant 6 : i32
    %233 = vector.broadcast %c6_i32 : i32 to vector<16x32xi32>
    %234 = arith.cmpi eq, %97, %233 : vector<16x32xi32>
    %cst_71 = arith.constant 0.000000e+00 : f32
    %235 = vector.shape_cast %232 : vector<1x32xf32> to vector<1x32xf32>
    %236 = vector.broadcast %235 : vector<1x32xf32> to vector<16x32xf32>
    %237 = vector.broadcast %cst_71 : f32 to vector<16x32xf32>
    %238 = arith.select %234, %236, %237 : vector<16x32xi1>, vector<16x32xf32>
    %239 = arith.addf %219, %238 : vector<16x32xf32>
    %240 = vector.extract_strided_slice %93 {offsets = [7, 0], sizes = [1, 32], strides = [1, 1]} : vector<16x32xf32> to vector<1x32xf32>
    %241 = vector.broadcast %240 : vector<1x32xf32> to vector<8x32xf32>
    %242 = arith.mulf %241, %94 : vector<8x32xf32>
    %243 = math.exp %242 : vector<8x32xf32>
    %244 = arith.mulf %243, %230 : vector<8x32xf32>
    %245 = vector.extract_strided_slice %96 {offsets = [7, 0], sizes = [1, 32], strides = [1, 1]} : vector<16x32xf32> to vector<1x32xf32>
    %246 = vector.extract_strided_slice %95 {offsets = [0, 7], sizes = [8, 1], strides = [1, 1]} : vector<8x16xf32> to vector<8x1xf32>
    %247 = vector.broadcast %245 : vector<1x32xf32> to vector<8x32xf32>
    %248 = vector.broadcast %246 : vector<8x1xf32> to vector<8x32xf32>
    %249 = arith.mulf %247, %248 : vector<8x32xf32>
    %250 = arith.addf %244, %249 : vector<8x32xf32>
    %251 = vector.extract_strided_slice %78 {offsets = [7, 0], sizes = [1, 8], strides = [1, 1]} : vector<16x8xf32> to vector<1x8xf32>
    %cst_72 = arith.constant dense<0.000000e+00> : vector<1x32xf32>
    %252 = tpu.matmul %251, %250, %cst_72 {dimension_numbers = #tpu.dot_dimension_numbers<[1], [0], [0], [1], [0, 0, 1, 1], [], []>} : vector<1x8xf32>, vector<8x32xf32>, vector<1x32xf32> -> vector<1x32xf32>
    %c7_i32 = arith.constant 7 : i32
    %253 = vector.broadcast %c7_i32 : i32 to vector<16x32xi32>
    %254 = arith.cmpi eq, %97, %253 : vector<16x32xi32>
    %cst_73 = arith.constant 0.000000e+00 : f32
    %255 = vector.shape_cast %252 : vector<1x32xf32> to vector<1x32xf32>
    %256 = vector.broadcast %255 : vector<1x32xf32> to vector<16x32xf32>
    %257 = vector.broadcast %cst_73 : f32 to vector<16x32xf32>
    %258 = arith.select %254, %256, %257 : vector<16x32xi1>, vector<16x32xf32>
    %259 = arith.addf %239, %258 : vector<16x32xf32>
    %260 = vector.extract_strided_slice %93 {offsets = [8, 0], sizes = [1, 32], strides = [1, 1]} : vector<16x32xf32> to vector<1x32xf32>
    %261 = vector.broadcast %260 : vector<1x32xf32> to vector<8x32xf32>
    %262 = arith.mulf %261, %94 : vector<8x32xf32>
    %263 = math.exp %262 : vector<8x32xf32>
    %264 = arith.mulf %263, %250 : vector<8x32xf32>
    %265 = vector.extract_strided_slice %96 {offsets = [8, 0], sizes = [1, 32], strides = [1, 1]} : vector<16x32xf32> to vector<1x32xf32>
    %266 = vector.extract_strided_slice %95 {offsets = [0, 8], sizes = [8, 1], strides = [1, 1]} : vector<8x16xf32> to vector<8x1xf32>
    %267 = vector.broadcast %265 : vector<1x32xf32> to vector<8x32xf32>
    %268 = vector.broadcast %266 : vector<8x1xf32> to vector<8x32xf32>
    %269 = arith.mulf %267, %268 : vector<8x32xf32>
    %270 = arith.addf %264, %269 : vector<8x32xf32>
    %271 = vector.extract_strided_slice %78 {offsets = [8, 0], sizes = [1, 8], strides = [1, 1]} : vector<16x8xf32> to vector<1x8xf32>
    %cst_74 = arith.constant dense<0.000000e+00> : vector<1x32xf32>
    %272 = tpu.matmul %271, %270, %cst_74 {dimension_numbers = #tpu.dot_dimension_numbers<[1], [0], [0], [1], [0, 0, 1, 1], [], []>} : vector<1x8xf32>, vector<8x32xf32>, vector<1x32xf32> -> vector<1x32xf32>
    %c8_i32 = arith.constant 8 : i32
    %273 = vector.broadcast %c8_i32 : i32 to vector<16x32xi32>
    %274 = arith.cmpi eq, %97, %273 : vector<16x32xi32>
    %cst_75 = arith.constant 0.000000e+00 : f32
    %275 = vector.shape_cast %272 : vector<1x32xf32> to vector<1x32xf32>
    %276 = vector.broadcast %275 : vector<1x32xf32> to vector<16x32xf32>
    %277 = vector.broadcast %cst_75 : f32 to vector<16x32xf32>
    %278 = arith.select %274, %276, %277 : vector<16x32xi1>, vector<16x32xf32>
    %279 = arith.addf %259, %278 : vector<16x32xf32>
    %280 = vector.extract_strided_slice %93 {offsets = [9, 0], sizes = [1, 32], strides = [1, 1]} : vector<16x32xf32> to vector<1x32xf32>
    %281 = vector.broadcast %280 : vector<1x32xf32> to vector<8x32xf32>
    %282 = arith.mulf %281, %94 : vector<8x32xf32>
    %283 = math.exp %282 : vector<8x32xf32>
    %284 = arith.mulf %283, %270 : vector<8x32xf32>
    %285 = vector.extract_strided_slice %96 {offsets = [9, 0], sizes = [1, 32], strides = [1, 1]} : vector<16x32xf32> to vector<1x32xf32>
    %286 = vector.extract_strided_slice %95 {offsets = [0, 9], sizes = [8, 1], strides = [1, 1]} : vector<8x16xf32> to vector<8x1xf32>
    %287 = vector.broadcast %285 : vector<1x32xf32> to vector<8x32xf32>
    %288 = vector.broadcast %286 : vector<8x1xf32> to vector<8x32xf32>
    %289 = arith.mulf %287, %288 : vector<8x32xf32>
    %290 = arith.addf %284, %289 : vector<8x32xf32>
    %291 = vector.extract_strided_slice %78 {offsets = [9, 0], sizes = [1, 8], strides = [1, 1]} : vector<16x8xf32> to vector<1x8xf32>
    %cst_76 = arith.constant dense<0.000000e+00> : vector<1x32xf32>
    %292 = tpu.matmul %291, %290, %cst_76 {dimension_numbers = #tpu.dot_dimension_numbers<[1], [0], [0], [1], [0, 0, 1, 1], [], []>} : vector<1x8xf32>, vector<8x32xf32>, vector<1x32xf32> -> vector<1x32xf32>
    %c9_i32 = arith.constant 9 : i32
    %293 = vector.broadcast %c9_i32 : i32 to vector<16x32xi32>
    %294 = arith.cmpi eq, %97, %293 : vector<16x32xi32>
    %cst_77 = arith.constant 0.000000e+00 : f32
    %295 = vector.shape_cast %292 : vector<1x32xf32> to vector<1x32xf32>
    %296 = vector.broadcast %295 : vector<1x32xf32> to vector<16x32xf32>
    %297 = vector.broadcast %cst_77 : f32 to vector<16x32xf32>
    %298 = arith.select %294, %296, %297 : vector<16x32xi1>, vector<16x32xf32>
    %299 = arith.addf %279, %298 : vector<16x32xf32>
    %300 = vector.extract_strided_slice %93 {offsets = [10, 0], sizes = [1, 32], strides = [1, 1]} : vector<16x32xf32> to vector<1x32xf32>
    %301 = vector.broadcast %300 : vector<1x32xf32> to vector<8x32xf32>
    %302 = arith.mulf %301, %94 : vector<8x32xf32>
    %303 = math.exp %302 : vector<8x32xf32>
    %304 = arith.mulf %303, %290 : vector<8x32xf32>
    %305 = vector.extract_strided_slice %96 {offsets = [10, 0], sizes = [1, 32], strides = [1, 1]} : vector<16x32xf32> to vector<1x32xf32>
    %306 = vector.extract_strided_slice %95 {offsets = [0, 10], sizes = [8, 1], strides = [1, 1]} : vector<8x16xf32> to vector<8x1xf32>
    %307 = vector.broadcast %305 : vector<1x32xf32> to vector<8x32xf32>
    %308 = vector.broadcast %306 : vector<8x1xf32> to vector<8x32xf32>
    %309 = arith.mulf %307, %308 : vector<8x32xf32>
    %310 = arith.addf %304, %309 : vector<8x32xf32>
    %311 = vector.extract_strided_slice %78 {offsets = [10, 0], sizes = [1, 8], strides = [1, 1]} : vector<16x8xf32> to vector<1x8xf32>
    %cst_78 = arith.constant dense<0.000000e+00> : vector<1x32xf32>
    %312 = tpu.matmul %311, %310, %cst_78 {dimension_numbers = #tpu.dot_dimension_numbers<[1], [0], [0], [1], [0, 0, 1, 1], [], []>} : vector<1x8xf32>, vector<8x32xf32>, vector<1x32xf32> -> vector<1x32xf32>
    %c10_i32 = arith.constant 10 : i32
    %313 = vector.broadcast %c10_i32 : i32 to vector<16x32xi32>
    %314 = arith.cmpi eq, %97, %313 : vector<16x32xi32>
    %cst_79 = arith.constant 0.000000e+00 : f32
    %315 = vector.shape_cast %312 : vector<1x32xf32> to vector<1x32xf32>
    %316 = vector.broadcast %315 : vector<1x32xf32> to vector<16x32xf32>
    %317 = vector.broadcast %cst_79 : f32 to vector<16x32xf32>
    %318 = arith.select %314, %316, %317 : vector<16x32xi1>, vector<16x32xf32>
    %319 = arith.addf %299, %318 : vector<16x32xf32>
    %320 = vector.extract_strided_slice %93 {offsets = [11, 0], sizes = [1, 32], strides = [1, 1]} : vector<16x32xf32> to vector<1x32xf32>
    %321 = vector.broadcast %320 : vector<1x32xf32> to vector<8x32xf32>
    %322 = arith.mulf %321, %94 : vector<8x32xf32>
    %323 = math.exp %322 : vector<8x32xf32>
    %324 = arith.mulf %323, %310 : vector<8x32xf32>
    %325 = vector.extract_strided_slice %96 {offsets = [11, 0], sizes = [1, 32], strides = [1, 1]} : vector<16x32xf32> to vector<1x32xf32>
    %326 = vector.extract_strided_slice %95 {offsets = [0, 11], sizes = [8, 1], strides = [1, 1]} : vector<8x16xf32> to vector<8x1xf32>
    %327 = vector.broadcast %325 : vector<1x32xf32> to vector<8x32xf32>
    %328 = vector.broadcast %326 : vector<8x1xf32> to vector<8x32xf32>
    %329 = arith.mulf %327, %328 : vector<8x32xf32>
    %330 = arith.addf %324, %329 : vector<8x32xf32>
    %331 = vector.extract_strided_slice %78 {offsets = [11, 0], sizes = [1, 8], strides = [1, 1]} : vector<16x8xf32> to vector<1x8xf32>
    %cst_80 = arith.constant dense<0.000000e+00> : vector<1x32xf32>
    %332 = tpu.matmul %331, %330, %cst_80 {dimension_numbers = #tpu.dot_dimension_numbers<[1], [0], [0], [1], [0, 0, 1, 1], [], []>} : vector<1x8xf32>, vector<8x32xf32>, vector<1x32xf32> -> vector<1x32xf32>
    %c11_i32 = arith.constant 11 : i32
    %333 = vector.broadcast %c11_i32 : i32 to vector<16x32xi32>
    %334 = arith.cmpi eq, %97, %333 : vector<16x32xi32>
    %cst_81 = arith.constant 0.000000e+00 : f32
    %335 = vector.shape_cast %332 : vector<1x32xf32> to vector<1x32xf32>
    %336 = vector.broadcast %335 : vector<1x32xf32> to vector<16x32xf32>
    %337 = vector.broadcast %cst_81 : f32 to vector<16x32xf32>
    %338 = arith.select %334, %336, %337 : vector<16x32xi1>, vector<16x32xf32>
    %339 = arith.addf %319, %338 : vector<16x32xf32>
    %340 = vector.extract_strided_slice %93 {offsets = [12, 0], sizes = [1, 32], strides = [1, 1]} : vector<16x32xf32> to vector<1x32xf32>
    %341 = vector.broadcast %340 : vector<1x32xf32> to vector<8x32xf32>
    %342 = arith.mulf %341, %94 : vector<8x32xf32>
    %343 = math.exp %342 : vector<8x32xf32>
    %344 = arith.mulf %343, %330 : vector<8x32xf32>
    %345 = vector.extract_strided_slice %96 {offsets = [12, 0], sizes = [1, 32], strides = [1, 1]} : vector<16x32xf32> to vector<1x32xf32>
    %346 = vector.extract_strided_slice %95 {offsets = [0, 12], sizes = [8, 1], strides = [1, 1]} : vector<8x16xf32> to vector<8x1xf32>
    %347 = vector.broadcast %345 : vector<1x32xf32> to vector<8x32xf32>
    %348 = vector.broadcast %346 : vector<8x1xf32> to vector<8x32xf32>
    %349 = arith.mulf %347, %348 : vector<8x32xf32>
    %350 = arith.addf %344, %349 : vector<8x32xf32>
    %351 = vector.extract_strided_slice %78 {offsets = [12, 0], sizes = [1, 8], strides = [1, 1]} : vector<16x8xf32> to vector<1x8xf32>
    %cst_82 = arith.constant dense<0.000000e+00> : vector<1x32xf32>
    %352 = tpu.matmul %351, %350, %cst_82 {dimension_numbers = #tpu.dot_dimension_numbers<[1], [0], [0], [1], [0, 0, 1, 1], [], []>} : vector<1x8xf32>, vector<8x32xf32>, vector<1x32xf32> -> vector<1x32xf32>
    %c12_i32 = arith.constant 12 : i32
    %353 = vector.broadcast %c12_i32 : i32 to vector<16x32xi32>
    %354 = arith.cmpi eq, %97, %353 : vector<16x32xi32>
    %cst_83 = arith.constant 0.000000e+00 : f32
    %355 = vector.shape_cast %352 : vector<1x32xf32> to vector<1x32xf32>
    %356 = vector.broadcast %355 : vector<1x32xf32> to vector<16x32xf32>
    %357 = vector.broadcast %cst_83 : f32 to vector<16x32xf32>
    %358 = arith.select %354, %356, %357 : vector<16x32xi1>, vector<16x32xf32>
    %359 = arith.addf %339, %358 : vector<16x32xf32>
    %360 = vector.extract_strided_slice %93 {offsets = [13, 0], sizes = [1, 32], strides = [1, 1]} : vector<16x32xf32> to vector<1x32xf32>
    %361 = vector.broadcast %360 : vector<1x32xf32> to vector<8x32xf32>
    %362 = arith.mulf %361, %94 : vector<8x32xf32>
    %363 = math.exp %362 : vector<8x32xf32>
    %364 = arith.mulf %363, %350 : vector<8x32xf32>
    %365 = vector.extract_strided_slice %96 {offsets = [13, 0], sizes = [1, 32], strides = [1, 1]} : vector<16x32xf32> to vector<1x32xf32>
    %366 = vector.extract_strided_slice %95 {offsets = [0, 13], sizes = [8, 1], strides = [1, 1]} : vector<8x16xf32> to vector<8x1xf32>
    %367 = vector.broadcast %365 : vector<1x32xf32> to vector<8x32xf32>
    %368 = vector.broadcast %366 : vector<8x1xf32> to vector<8x32xf32>
    %369 = arith.mulf %367, %368 : vector<8x32xf32>
    %370 = arith.addf %364, %369 : vector<8x32xf32>
    %371 = vector.extract_strided_slice %78 {offsets = [13, 0], sizes = [1, 8], strides = [1, 1]} : vector<16x8xf32> to vector<1x8xf32>
    %cst_84 = arith.constant dense<0.000000e+00> : vector<1x32xf32>
    %372 = tpu.matmul %371, %370, %cst_84 {dimension_numbers = #tpu.dot_dimension_numbers<[1], [0], [0], [1], [0, 0, 1, 1], [], []>} : vector<1x8xf32>, vector<8x32xf32>, vector<1x32xf32> -> vector<1x32xf32>
    %c13_i32 = arith.constant 13 : i32
    %373 = vector.broadcast %c13_i32 : i32 to vector<16x32xi32>
    %374 = arith.cmpi eq, %97, %373 : vector<16x32xi32>
    %cst_85 = arith.constant 0.000000e+00 : f32
    %375 = vector.shape_cast %372 : vector<1x32xf32> to vector<1x32xf32>
    %376 = vector.broadcast %375 : vector<1x32xf32> to vector<16x32xf32>
    %377 = vector.broadcast %cst_85 : f32 to vector<16x32xf32>
    %378 = arith.select %374, %376, %377 : vector<16x32xi1>, vector<16x32xf32>
    %379 = arith.addf %359, %378 : vector<16x32xf32>
    %380 = vector.extract_strided_slice %93 {offsets = [14, 0], sizes = [1, 32], strides = [1, 1]} : vector<16x32xf32> to vector<1x32xf32>
    %381 = vector.broadcast %380 : vector<1x32xf32> to vector<8x32xf32>
    %382 = arith.mulf %381, %94 : vector<8x32xf32>
    %383 = math.exp %382 : vector<8x32xf32>
    %384 = arith.mulf %383, %370 : vector<8x32xf32>
    %385 = vector.extract_strided_slice %96 {offsets = [14, 0], sizes = [1, 32], strides = [1, 1]} : vector<16x32xf32> to vector<1x32xf32>
    %386 = vector.extract_strided_slice %95 {offsets = [0, 14], sizes = [8, 1], strides = [1, 1]} : vector<8x16xf32> to vector<8x1xf32>
    %387 = vector.broadcast %385 : vector<1x32xf32> to vector<8x32xf32>
    %388 = vector.broadcast %386 : vector<8x1xf32> to vector<8x32xf32>
    %389 = arith.mulf %387, %388 : vector<8x32xf32>
    %390 = arith.addf %384, %389 : vector<8x32xf32>
    %391 = vector.extract_strided_slice %78 {offsets = [14, 0], sizes = [1, 8], strides = [1, 1]} : vector<16x8xf32> to vector<1x8xf32>
    %cst_86 = arith.constant dense<0.000000e+00> : vector<1x32xf32>
    %392 = tpu.matmul %391, %390, %cst_86 {dimension_numbers = #tpu.dot_dimension_numbers<[1], [0], [0], [1], [0, 0, 1, 1], [], []>} : vector<1x8xf32>, vector<8x32xf32>, vector<1x32xf32> -> vector<1x32xf32>
    %c14_i32 = arith.constant 14 : i32
    %393 = vector.broadcast %c14_i32 : i32 to vector<16x32xi32>
    %394 = arith.cmpi eq, %97, %393 : vector<16x32xi32>
    %cst_87 = arith.constant 0.000000e+00 : f32
    %395 = vector.shape_cast %392 : vector<1x32xf32> to vector<1x32xf32>
    %396 = vector.broadcast %395 : vector<1x32xf32> to vector<16x32xf32>
    %397 = vector.broadcast %cst_87 : f32 to vector<16x32xf32>
    %398 = arith.select %394, %396, %397 : vector<16x32xi1>, vector<16x32xf32>
    %399 = arith.addf %379, %398 : vector<16x32xf32>
    %400 = vector.extract_strided_slice %93 {offsets = [15, 0], sizes = [1, 32], strides = [1, 1]} : vector<16x32xf32> to vector<1x32xf32>
    %401 = vector.broadcast %400 : vector<1x32xf32> to vector<8x32xf32>
    %402 = arith.mulf %401, %94 : vector<8x32xf32>
    %403 = math.exp %402 : vector<8x32xf32>
    %404 = arith.mulf %403, %390 : vector<8x32xf32>
    %405 = vector.extract_strided_slice %96 {offsets = [15, 0], sizes = [1, 32], strides = [1, 1]} : vector<16x32xf32> to vector<1x32xf32>
    %406 = vector.extract_strided_slice %95 {offsets = [0, 15], sizes = [8, 1], strides = [1, 1]} : vector<8x16xf32> to vector<8x1xf32>
    %407 = vector.broadcast %405 : vector<1x32xf32> to vector<8x32xf32>
    %408 = vector.broadcast %406 : vector<8x1xf32> to vector<8x32xf32>
    %409 = arith.mulf %407, %408 : vector<8x32xf32>
    %410 = arith.addf %404, %409 : vector<8x32xf32>
    %411 = vector.extract_strided_slice %78 {offsets = [15, 0], sizes = [1, 8], strides = [1, 1]} : vector<16x8xf32> to vector<1x8xf32>
    %cst_88 = arith.constant dense<0.000000e+00> : vector<1x32xf32>
    %412 = tpu.matmul %411, %410, %cst_88 {dimension_numbers = #tpu.dot_dimension_numbers<[1], [0], [0], [1], [0, 0, 1, 1], [], []>} : vector<1x8xf32>, vector<8x32xf32>, vector<1x32xf32> -> vector<1x32xf32>
    %c15_i32 = arith.constant 15 : i32
    %413 = vector.broadcast %c15_i32 : i32 to vector<16x32xi32>
    %414 = arith.cmpi eq, %97, %413 : vector<16x32xi32>
    %cst_89 = arith.constant 0.000000e+00 : f32
    %415 = vector.shape_cast %412 : vector<1x32xf32> to vector<1x32xf32>
    %416 = vector.broadcast %415 : vector<1x32xf32> to vector<16x32xf32>
    %417 = vector.broadcast %cst_89 : f32 to vector<16x32xf32>
    %418 = arith.select %414, %416, %417 : vector<16x32xi1>, vector<16x32xf32>
    %419 = arith.addf %399, %418 : vector<16x32xf32>
    %c0_90 = arith.constant 0 : index
    %c0_91 = arith.constant 0 : index
    %420 = vector.load %arg15[%c0_90, %c0_91] : memref<1x32xf32, #tpu.memory_space<vmem>>, vector<1x32xf32>
    %421 = vector.broadcast %420 : vector<1x32xf32> to vector<16x32xf32>
    %422 = arith.mulf %421, %68 : vector<16x32xf32>
    %423 = arith.addf %419, %422 : vector<16x32xf32>
    %424 = arith.mulf %423, %19 : vector<16x32xf32>
    %c0_92 = arith.constant 0 : index
    %c0_93 = arith.constant 0 : index
    %425 = vector.load %arg16[%c0_92, %c0_93] : memref<32x16xf32, #tpu.memory_space<vmem>>, vector<32x16xf32>
    %cst_94 = arith.constant dense<0.000000e+00> : vector<16x16xf32>
    %426 = tpu.matmul %424, %425, %cst_94 {dimension_numbers = #tpu.dot_dimension_numbers<[1], [0], [0], [1], [0, 0, 1, 1], [], []>} : vector<16x32xf32>, vector<32x16xf32>, vector<16x16xf32> -> vector<16x16xf32>
    %c0_95 = arith.constant 0 : index
    %c0_96 = arith.constant 0 : index
    %427 = vector.load %arg17[%c0_95, %c0_96] : memref<1x16xf32, #tpu.memory_space<vmem>>, vector<1x16xf32>
    %428 = vector.broadcast %427 : vector<1x16xf32> to vector<16x16xf32>
    %429 = arith.addf %426, %428 : vector<16x16xf32>
    %430 = arith.addf %429, %1 : vector<16x16xf32>
    %c0_97 = arith.constant 0 : index
    %c0_98 = arith.constant 0 : index
    %c0_99 = arith.constant 0 : index
    %431 = vector.load %arg18[%c0_97, %c0_98, %c0_99] : memref<1x16x16xf32, #tpu.memory_space<vmem>>, vector<1x16x16xf32>
    %432 = vector.shape_cast %431 : vector<1x16x16xf32> to vector<16x16xf32>
    %433 = vector.shape_cast %430 : vector<16x16xf32> to vector<1x16x16xf32>
    tpu.vector_store %arg18[%c0_97, %c0_98, %c0_99], %433 {strides = array<i32>} : memref<1x16x16xf32, #tpu.memory_space<vmem>>, vector<1x16x16xf32>,
    return
  }
  func.func @transform_0(%arg0: i32) -> (i32, i32, i32) {
    %c0_i32 = arith.constant 0 : i32
    %c0_i32_0 = arith.constant 0 : i32
    %c0_i32_1 = arith.constant 0 : i32
    return %arg0, %c0_i32, %c0_i32_0 : i32, i32, i32
  }
  func.func @transform_1(%arg0: i32) -> (i32, i32) {
    %c0_i32 = arith.constant 0 : i32
    %c0_i32_0 = arith.constant 0 : i32
    %c0_i32_1 = arith.constant 0 : i32
    return %c0_i32, %c0_i32_0 : i32, i32
  }
  func.func @transform_2(%arg0: i32) -> (i32, i32) {
    %c0_i32 = arith.constant 0 : i32
    %c0_i32_0 = arith.constant 0 : i32
    %c0_i32_1 = arith.constant 0 : i32
    return %c0_i32, %c0_i32_0 : i32, i32
  }
  func.func @transform_3(%arg0: i32) -> (i32, i32) {
    %c0_i32 = arith.constant 0 : i32
    %c0_i32_0 = arith.constant 0 : i32
    %c0_i32_1 = arith.constant 0 : i32
    return %c0_i32, %c0_i32_0 : i32, i32
  }
  func.func @transform_4(%arg0: i32) -> (i32, i32) {
    %c0_i32 = arith.constant 0 : i32
    %c0_i32_0 = arith.constant 0 : i32
    %c0_i32_1 = arith.constant 0 : i32
    return %c0_i32, %c0_i32_0 : i32, i32
  }
  func.func @transform_5(%arg0: i32) -> (i32, i32) {
    %c0_i32 = arith.constant 0 : i32
    %c0_i32_0 = arith.constant 0 : i32
    %c0_i32_1 = arith.constant 0 : i32
    return %c0_i32, %c0_i32_0 : i32, i32
  }
  func.func @transform_6(%arg0: i32) -> (i32, i32) {
    %c0_i32 = arith.constant 0 : i32
    %c0_i32_0 = arith.constant 0 : i32
    %c0_i32_1 = arith.constant 0 : i32
    return %c0_i32, %c0_i32_0 : i32, i32
  }
  func.func @transform_7(%arg0: i32) -> (i32, i32) {
    %c0_i32 = arith.constant 0 : i32
    %c0_i32_0 = arith.constant 0 : i32
    %c0_i32_1 = arith.constant 0 : i32
    return %c0_i32, %c0_i32_0 : i32, i32
  }
  func.func @transform_8(%arg0: i32) -> (i32, i32) {
    %c0_i32 = arith.constant 0 : i32
    %c0_i32_0 = arith.constant 0 : i32
    %c0_i32_1 = arith.constant 0 : i32
    return %c0_i32, %c0_i32_0 : i32, i32
  }
  func.func @transform_9(%arg0: i32) -> (i32, i32) {
    %c0_i32 = arith.constant 0 : i32
    %c0_i32_0 = arith.constant 0 : i32
    %c0_i32_1 = arith.constant 0 : i32
    return %c0_i32, %c0_i32_0 : i32, i32
  }
  func.func @transform_10(%arg0: i32) -> (i32, i32) {
    %c0_i32 = arith.constant 0 : i32
    %c0_i32_0 = arith.constant 0 : i32
    %c0_i32_1 = arith.constant 0 : i32
    return %c0_i32, %c0_i32_0 : i32, i32
  }
  func.func @transform_11(%arg0: i32) -> (i32, i32) {
    %c0_i32 = arith.constant 0 : i32
    %c0_i32_0 = arith.constant 0 : i32
    %c0_i32_1 = arith.constant 0 : i32
    return %c0_i32, %c0_i32_0 : i32, i32
  }
  func.func @transform_12(%arg0: i32) -> (i32, i32) {
    %c0_i32 = arith.constant 0 : i32
    %c0_i32_0 = arith.constant 0 : i32
    %c0_i32_1 = arith.constant 0 : i32
    return %c0_i32, %c0_i32_0 : i32, i32
  }
  func.func @transform_13(%arg0: i32) -> (i32, i32) {
    %c0_i32 = arith.constant 0 : i32
    %c0_i32_0 = arith.constant 0 : i32
    %c0_i32_1 = arith.constant 0 : i32
    return %c0_i32, %c0_i32_0 : i32, i32
  }
  func.func @transform_14(%arg0: i32) -> (i32, i32) {
    %c0_i32 = arith.constant 0 : i32
    %c0_i32_0 = arith.constant 0 : i32
    %c0_i32_1 = arith.constant 0 : i32
    return %c0_i32, %c0_i32_0 : i32, i32
  }
  func.func @transform_15(%arg0: i32) -> (i32, i32) {
    %c0_i32 = arith.constant 0 : i32
    %c0_i32_0 = arith.constant 0 : i32
    %c0_i32_1 = arith.constant 0 : i32
    return %c0_i32, %c0_i32_0 : i32, i32
  }
  func.func @transform_16(%arg0: i32) -> (i32, i32) {
    %c0_i32 = arith.constant 0 : i32
    %c0_i32_0 = arith.constant 0 : i32
    %c0_i32_1 = arith.constant 0 : i32
    return %c0_i32, %c0_i32_0 : i32, i32
  }
  func.func @transform_17(%arg0: i32) -> (i32, i32, i32) {
    %c0_i32 = arith.constant 0 : i32
    %c0_i32_0 = arith.constant 0 : i32
    %c0_i32_1 = arith.constant 0 : i32
    return %arg0, %c0_i32, %c0_i32_0 : i32, i32, i32
  }
}

module attributes {stable_mosaic.version = 11 : i64} {
  func.func @_decoder_kernel(%arg0: i32, %arg1: memref<16x256xf32, #tpu.memory_space<vmem>>, %arg2: memref<16x16xf32, #tpu.memory_space<vmem>>, %arg3: memref<16x1xf32, #tpu.memory_space<vmem>>, %arg4: memref<16x1xf32, #tpu.memory_space<vmem>>, %arg5: memref<1x16xf32, #tpu.memory_space<vmem>>, %arg6: memref<1x1xf32, #tpu.memory_space<vmem>>, %arg7: memref<16x16xf32, #tpu.memory_space<vmem>>, %arg8: memref<16x1xf32, #tpu.memory_space<vmem>>, %arg9: memref<16x1xf32, #tpu.memory_space<vmem>>, %arg10: memref<1x16xf32, #tpu.memory_space<vmem>>, %arg11: memref<1x1xf32, #tpu.memory_space<vmem>>, %arg12: memref<1x16xf32, #tpu.memory_space<vmem>>, %arg13: memref<1x1xf32, #tpu.memory_space<vmem>>, %arg14: memref<1x256xf32, #tpu.memory_space<vmem>>, %arg15: memref<1x1xf32, #tpu.memory_space<vmem>>, %arg16: memref<1x256xf32, #tpu.memory_space<vmem>>, %arg17: memref<1x256xf32, #tpu.memory_space<vmem>>, %arg18: memref<1x256xf32, #tpu.memory_space<vmem>>, %arg19: memref<1x256xf32, #tpu.memory_space<vmem>>) attributes {dimension_semantics = [#tpu.dimension_semantics<arbitrary>], iteration_bounds = array<i64: 1>, scalar_prefetch = 0 : i64, scratch_operands = 0 : i64, tpu.core_type = #tpu.core_type<tc>, window_params = [{pipeline_mode = #tpu.pipeline_mode<synchronous>, transform_indices = @transform_0, window_bounds = array<i64: 16, 256>}, {pipeline_mode = #tpu.pipeline_mode<synchronous>, transform_indices = @transform_1, window_bounds = array<i64: 16, 16>}, {pipeline_mode = #tpu.pipeline_mode<synchronous>, transform_indices = @transform_2, window_bounds = array<i64: 16, 1>}, {pipeline_mode = #tpu.pipeline_mode<synchronous>, transform_indices = @transform_3, window_bounds = array<i64: 16, 1>}, {pipeline_mode = #tpu.pipeline_mode<synchronous>, transform_indices = @transform_4, window_bounds = array<i64: 1, 16>}, {pipeline_mode = #tpu.pipeline_mode<synchronous>, transform_indices = @transform_5, window_bounds = array<i64: 1, 1>}, {pipeline_mode = #tpu.pipeline_mode<synchronous>, transform_indices = @transform_6, window_bounds = array<i64: 16, 16>}, {pipeline_mode = #tpu.pipeline_mode<synchronous>, transform_indices = @transform_7, window_bounds = array<i64: 16, 1>}, {pipeline_mode = #tpu.pipeline_mode<synchronous>, transform_indices = @transform_8, window_bounds = array<i64: 16, 1>}, {pipeline_mode = #tpu.pipeline_mode<synchronous>, transform_indices = @transform_9, window_bounds = array<i64: 1, 16>}, {pipeline_mode = #tpu.pipeline_mode<synchronous>, transform_indices = @transform_10, window_bounds = array<i64: 1, 1>}, {pipeline_mode = #tpu.pipeline_mode<synchronous>, transform_indices = @transform_11, window_bounds = array<i64: 1, 16>}, {pipeline_mode = #tpu.pipeline_mode<synchronous>, transform_indices = @transform_12, window_bounds = array<i64: 1, 1>}, {pipeline_mode = #tpu.pipeline_mode<synchronous>, transform_indices = @transform_13, window_bounds = array<i64: 1, 256>}, {pipeline_mode = #tpu.pipeline_mode<synchronous>, transform_indices = @transform_14, window_bounds = array<i64: 1, 1>}, {pipeline_mode = #tpu.pipeline_mode<synchronous>, transform_indices = @transform_15, window_bounds = array<i64: 1, 256>}, {pipeline_mode = #tpu.pipeline_mode<synchronous>, transform_indices = @transform_16, window_bounds = array<i64: 1, 256>}, {pipeline_mode = #tpu.pipeline_mode<synchronous>, transform_indices = @transform_17, window_bounds = array<i64: 1, 256>}, {pipeline_mode = #tpu.pipeline_mode<synchronous>, transform_indices = @transform_18, window_bounds = array<i64: 1, 256>}]} {
    %c0 = arith.constant 0 : index
    %c0_0 = arith.constant 0 : index
    %0 = vector.load %arg1[%c0, %c0_0] : memref<16x256xf32, #tpu.memory_space<vmem>>, vector<16x256xf32>
    %c0_1 = arith.constant 0 : index
    %c0_2 = arith.constant 0 : index
    %1 = vector.load %arg2[%c0_1, %c0_2] : memref<16x16xf32, #tpu.memory_space<vmem>>, vector<16x16xf32>
    %cst = arith.constant dense<0.000000e+00> : vector<16x256xf32>
    %2 = tpu.matmul %1, %0, %cst {dimension_numbers = #tpu.dot_dimension_numbers<[1], [0], [0], [1], [0, 0, 1, 1], [], []>} : vector<16x16xf32>, vector<16x256xf32>, vector<16x256xf32> -> vector<16x256xf32>
    %c0_3 = arith.constant 0 : index
    %c0_4 = arith.constant 0 : index
    %3 = vector.load %arg3[%c0_3, %c0_4] : memref<16x1xf32, #tpu.memory_space<vmem>>, vector<16x1xf32>
    %4 = vector.broadcast %3 : vector<16x1xf32> to vector<16x256xf32>
    %5 = arith.addf %2, %4 : vector<16x256xf32>
    %cst_5 = arith.constant 0.000000e+00 : f32
    %6 = vector.broadcast %cst_5 : f32 to vector<16x256xf32>
    %7 = arith.cmpf oge, %5, %6 : vector<16x256xf32>
    %c0_6 = arith.constant 0 : index
    %c0_7 = arith.constant 0 : index
    %8 = vector.load %arg4[%c0_6, %c0_7] : memref<16x1xf32, #tpu.memory_space<vmem>>, vector<16x1xf32>
    %9 = vector.broadcast %8 : vector<16x1xf32> to vector<16x256xf32>
    %10 = arith.mulf %9, %5 : vector<16x256xf32>
    %11 = arith.select %7, %5, %10 : vector<16x256xi1>, vector<16x256xf32>
    %c0_8 = arith.constant 0 : index
    %c0_9 = arith.constant 0 : index
    %12 = vector.load %arg5[%c0_8, %c0_9] : memref<1x16xf32, #tpu.memory_space<vmem>>, vector<1x16xf32>
    %cst_10 = arith.constant dense<0.000000e+00> : vector<1x256xf32>
    %13 = tpu.matmul %12, %11, %cst_10 {dimension_numbers = #tpu.dot_dimension_numbers<[1], [0], [0], [1], [0, 0, 1, 1], [], []>} : vector<1x16xf32>, vector<16x256xf32>, vector<1x256xf32> -> vector<1x256xf32>
    %c0_11 = arith.constant 0 : index
    %c0_12 = arith.constant 0 : index
    %14 = vector.load %arg6[%c0_11, %c0_12] : memref<1x1xf32, #tpu.memory_space<vmem>>, vector<1x1xf32>
    %15 = vector.broadcast %14 : vector<1x1xf32> to vector<1x256xf32>
    %16 = arith.addf %13, %15 : vector<1x256xf32>
    %c0_13 = arith.constant 0 : index
    %c0_14 = arith.constant 0 : index
    %17 = vector.load %arg7[%c0_13, %c0_14] : memref<16x16xf32, #tpu.memory_space<vmem>>, vector<16x16xf32>
    %cst_15 = arith.constant dense<0.000000e+00> : vector<16x256xf32>
    %18 = tpu.matmul %17, %0, %cst_15 {dimension_numbers = #tpu.dot_dimension_numbers<[1], [0], [0], [1], [0, 0, 1, 1], [], []>} : vector<16x16xf32>, vector<16x256xf32>, vector<16x256xf32> -> vector<16x256xf32>
    %c0_16 = arith.constant 0 : index
    %c0_17 = arith.constant 0 : index
    %19 = vector.load %arg8[%c0_16, %c0_17] : memref<16x1xf32, #tpu.memory_space<vmem>>, vector<16x1xf32>
    %20 = vector.broadcast %19 : vector<16x1xf32> to vector<16x256xf32>
    %21 = arith.addf %18, %20 : vector<16x256xf32>
    %cst_18 = arith.constant 0.000000e+00 : f32
    %22 = vector.broadcast %cst_18 : f32 to vector<16x256xf32>
    %23 = arith.cmpf oge, %21, %22 : vector<16x256xf32>
    %c0_19 = arith.constant 0 : index
    %c0_20 = arith.constant 0 : index
    %24 = vector.load %arg9[%c0_19, %c0_20] : memref<16x1xf32, #tpu.memory_space<vmem>>, vector<16x1xf32>
    %25 = vector.broadcast %24 : vector<16x1xf32> to vector<16x256xf32>
    %26 = arith.mulf %25, %21 : vector<16x256xf32>
    %27 = arith.select %23, %21, %26 : vector<16x256xi1>, vector<16x256xf32>
    %c0_21 = arith.constant 0 : index
    %c0_22 = arith.constant 0 : index
    %28 = vector.load %arg10[%c0_21, %c0_22] : memref<1x16xf32, #tpu.memory_space<vmem>>, vector<1x16xf32>
    %cst_23 = arith.constant dense<0.000000e+00> : vector<1x256xf32>
    %29 = tpu.matmul %28, %27, %cst_23 {dimension_numbers = #tpu.dot_dimension_numbers<[1], [0], [0], [1], [0, 0, 1, 1], [], []>} : vector<1x16xf32>, vector<16x256xf32>, vector<1x256xf32> -> vector<1x256xf32>
    %c0_24 = arith.constant 0 : index
    %c0_25 = arith.constant 0 : index
    %30 = vector.load %arg11[%c0_24, %c0_25] : memref<1x1xf32, #tpu.memory_space<vmem>>, vector<1x1xf32>
    %31 = vector.broadcast %30 : vector<1x1xf32> to vector<1x256xf32>
    %32 = arith.addf %29, %31 : vector<1x256xf32>
    %c0_26 = arith.constant 0 : index
    %c0_27 = arith.constant 0 : index
    %33 = vector.load %arg12[%c0_26, %c0_27] : memref<1x16xf32, #tpu.memory_space<vmem>>, vector<1x16xf32>
    %cst_28 = arith.constant dense<0.000000e+00> : vector<1x256xf32>
    %34 = tpu.matmul %33, %27, %cst_28 {dimension_numbers = #tpu.dot_dimension_numbers<[1], [0], [0], [1], [0, 0, 1, 1], [], []>} : vector<1x16xf32>, vector<16x256xf32>, vector<1x256xf32> -> vector<1x256xf32>
    %c0_29 = arith.constant 0 : index
    %c0_30 = arith.constant 0 : index
    %35 = vector.load %arg13[%c0_29, %c0_30] : memref<1x1xf32, #tpu.memory_space<vmem>>, vector<1x1xf32>
    %36 = vector.broadcast %35 : vector<1x1xf32> to vector<1x256xf32>
    %37 = arith.addf %34, %36 : vector<1x256xf32>
    %c0_31 = arith.constant 0 : index
    %c0_32 = arith.constant 0 : index
    %38 = vector.load %arg15[%c0_31, %c0_32] : memref<1x1xf32, #tpu.memory_space<vmem>>, vector<1x1xf32>
    %c0_33 = arith.constant 0 : index
    %c0_34 = arith.constant 0 : index
    %39 = vector.load %arg14[%c0_33, %c0_34] : memref<1x256xf32, #tpu.memory_space<vmem>>, vector<1x256xf32>
    %40 = arith.mulf %39, %16 : vector<1x256xf32>
    %cst_35 = arith.constant 0.000000e+00 : f32
    %41 = vector.broadcast %cst_35 : f32 to vector<1x256xf32>
    %42 = arith.subf %41, %40 : vector<1x256xf32>
    %43 = math.exp %42 : vector<1x256xf32>
    %cst_36 = arith.constant 1.000000e+00 : f32
    %44 = vector.broadcast %cst_36 : f32 to vector<1x256xf32>
    %45 = arith.addf %44, %43 : vector<1x256xf32>
    %cst_37 = arith.constant 1.000000e+00 : f32
    %46 = vector.broadcast %cst_37 : f32 to vector<1x256xf32>
    %47 = arith.divf %46, %45 : vector<1x256xf32>
    %48 = vector.broadcast %38 : vector<1x1xf32> to vector<1x256xf32>
    %49 = arith.mulf %48, %47 : vector<1x256xf32>
    %c0_38 = arith.constant 0 : index
    %c0_39 = arith.constant 0 : index
    %50 = vector.load %arg16[%c0_38, %c0_39] : memref<1x256xf32, #tpu.memory_space<vmem>>, vector<1x256xf32>
    %51 = arith.mulf %49, %50 : vector<1x256xf32>
    %c0_40 = arith.constant 0 : index
    %c0_41 = arith.constant 0 : index
    %52 = vector.load %arg17[%c0_40, %c0_41] : memref<1x256xf32, #tpu.memory_space<vmem>>, vector<1x256xf32>
    tpu.vector_store %arg17[%c0_40, %c0_41], %51 {strides = array<i32>} : memref<1x256xf32, #tpu.memory_space<vmem>>, vector<1x256xf32>,
    %c0_42 = arith.constant 0 : index
    %c0_43 = arith.constant 0 : index
    %53 = vector.load %arg18[%c0_42, %c0_43] : memref<1x256xf32, #tpu.memory_space<vmem>>, vector<1x256xf32>
    tpu.vector_store %arg18[%c0_42, %c0_43], %32 {strides = array<i32>} : memref<1x256xf32, #tpu.memory_space<vmem>>, vector<1x256xf32>,
    %c0_44 = arith.constant 0 : index
    %c0_45 = arith.constant 0 : index
    %54 = vector.load %arg19[%c0_44, %c0_45] : memref<1x256xf32, #tpu.memory_space<vmem>>, vector<1x256xf32>
    tpu.vector_store %arg19[%c0_44, %c0_45], %37 {strides = array<i32>} : memref<1x256xf32, #tpu.memory_space<vmem>>, vector<1x256xf32>,
    return
  }
  func.func @transform_0(%arg0: i32) -> (i32, i32) {
    %c0_i32 = arith.constant 0 : i32
    %c0_i32_0 = arith.constant 0 : i32
    %c0_i32_1 = arith.constant 0 : i32
    return %c0_i32, %c0_i32_0 : i32, i32
  }
  func.func @transform_1(%arg0: i32) -> (i32, i32) {
    %c0_i32 = arith.constant 0 : i32
    %c0_i32_0 = arith.constant 0 : i32
    %c0_i32_1 = arith.constant 0 : i32
    return %c0_i32, %c0_i32_0 : i32, i32
  }
  func.func @transform_2(%arg0: i32) -> (i32, i32) {
    %c0_i32 = arith.constant 0 : i32
    %c0_i32_0 = arith.constant 0 : i32
    %c0_i32_1 = arith.constant 0 : i32
    return %c0_i32, %c0_i32_0 : i32, i32
  }
  func.func @transform_3(%arg0: i32) -> (i32, i32) {
    %c0_i32 = arith.constant 0 : i32
    %c0_i32_0 = arith.constant 0 : i32
    %c0_i32_1 = arith.constant 0 : i32
    return %c0_i32, %c0_i32_0 : i32, i32
  }
  func.func @transform_4(%arg0: i32) -> (i32, i32) {
    %c0_i32 = arith.constant 0 : i32
    %c0_i32_0 = arith.constant 0 : i32
    %c0_i32_1 = arith.constant 0 : i32
    return %c0_i32, %c0_i32_0 : i32, i32
  }
  func.func @transform_5(%arg0: i32) -> (i32, i32) {
    %c0_i32 = arith.constant 0 : i32
    %c0_i32_0 = arith.constant 0 : i32
    %c0_i32_1 = arith.constant 0 : i32
    return %c0_i32, %c0_i32_0 : i32, i32
  }
  func.func @transform_6(%arg0: i32) -> (i32, i32) {
    %c0_i32 = arith.constant 0 : i32
    %c0_i32_0 = arith.constant 0 : i32
    %c0_i32_1 = arith.constant 0 : i32
    return %c0_i32, %c0_i32_0 : i32, i32
  }
  func.func @transform_7(%arg0: i32) -> (i32, i32) {
    %c0_i32 = arith.constant 0 : i32
    %c0_i32_0 = arith.constant 0 : i32
    %c0_i32_1 = arith.constant 0 : i32
    return %c0_i32, %c0_i32_0 : i32, i32
  }
  func.func @transform_8(%arg0: i32) -> (i32, i32) {
    %c0_i32 = arith.constant 0 : i32
    %c0_i32_0 = arith.constant 0 : i32
    %c0_i32_1 = arith.constant 0 : i32
    return %c0_i32, %c0_i32_0 : i32, i32
  }
  func.func @transform_9(%arg0: i32) -> (i32, i32) {
    %c0_i32 = arith.constant 0 : i32
    %c0_i32_0 = arith.constant 0 : i32
    %c0_i32_1 = arith.constant 0 : i32
    return %c0_i32, %c0_i32_0 : i32, i32
  }
  func.func @transform_10(%arg0: i32) -> (i32, i32) {
    %c0_i32 = arith.constant 0 : i32
    %c0_i32_0 = arith.constant 0 : i32
    %c0_i32_1 = arith.constant 0 : i32
    return %c0_i32, %c0_i32_0 : i32, i32
  }
  func.func @transform_11(%arg0: i32) -> (i32, i32) {
    %c0_i32 = arith.constant 0 : i32
    %c0_i32_0 = arith.constant 0 : i32
    %c0_i32_1 = arith.constant 0 : i32
    return %c0_i32, %c0_i32_0 : i32, i32
  }
  func.func @transform_12(%arg0: i32) -> (i32, i32) {
    %c0_i32 = arith.constant 0 : i32
    %c0_i32_0 = arith.constant 0 : i32
    %c0_i32_1 = arith.constant 0 : i32
    return %c0_i32, %c0_i32_0 : i32, i32
  }
  func.func @transform_13(%arg0: i32) -> (i32, i32) {
    %c0_i32 = arith.constant 0 : i32
    %c0_i32_0 = arith.constant 0 : i32
    %c0_i32_1 = arith.constant 0 : i32
    return %c0_i32, %c0_i32_0 : i32, i32
  }
  func.func @transform_14(%arg0: i32) -> (i32, i32) {
    %c0_i32 = arith.constant 0 : i32
    %c0_i32_0 = arith.constant 0 : i32
    %c0_i32_1 = arith.constant 0 : i32
    return %c0_i32, %c0_i32_0 : i32, i32
  }
  func.func @transform_15(%arg0: i32) -> (i32, i32) {
    %c0_i32 = arith.constant 0 : i32
    %c0_i32_0 = arith.constant 0 : i32
    %c0_i32_1 = arith.constant 0 : i32
    return %c0_i32, %c0_i32_0 : i32, i32
  }
  func.func @transform_16(%arg0: i32) -> (i32, i32) {
    %c0_i32 = arith.constant 0 : i32
    %c0_i32_0 = arith.constant 0 : i32
    %c0_i32_1 = arith.constant 0 : i32
    return %c0_i32, %c0_i32_0 : i32, i32
  }
  func.func @transform_17(%arg0: i32) -> (i32, i32) {
    %c0_i32 = arith.constant 0 : i32
    %c0_i32_0 = arith.constant 0 : i32
    %c0_i32_1 = arith.constant 0 : i32
    return %c0_i32, %c0_i32_0 : i32, i32
  }
  func.func @transform_18(%arg0: i32) -> (i32, i32) {
    %c0_i32 = arith.constant 0 : i32
    %c0_i32_0 = arith.constant 0 : i32
    %c0_i32_1 = arith.constant 0 : i32
    return %c0_i32, %c0_i32_0 : i32, i32
  }
}

module attributes {stable_mosaic.version = 11 : i64} {
  func.func @_recompose_kernel(%arg0: i32, %arg1: memref<1x256xf32, #tpu.memory_space<vmem>>, %arg2: memref<1x256xf32, #tpu.memory_space<vmem>>, %arg3: memref<1x256xf32, #tpu.memory_space<vmem>>, %arg4: memref<1x256xf32, #tpu.memory_space<vmem>>) attributes {dimension_semantics = [#tpu.dimension_semantics<arbitrary>], iteration_bounds = array<i64: 1>, scalar_prefetch = 0 : i64, scratch_operands = 0 : i64, tpu.core_type = #tpu.core_type<tc>, window_params = [{pipeline_mode = #tpu.pipeline_mode<synchronous>, transform_indices = @transform_0, window_bounds = array<i64: 1, 256>}, {pipeline_mode = #tpu.pipeline_mode<synchronous>, transform_indices = @transform_1, window_bounds = array<i64: 1, 256>}, {pipeline_mode = #tpu.pipeline_mode<synchronous>, transform_indices = @transform_2, window_bounds = array<i64: 1, 256>}, {pipeline_mode = #tpu.pipeline_mode<synchronous>, transform_indices = @transform_3, window_bounds = array<i64: 1, 256>}]} {
    %c0 = arith.constant 0 : index
    %c0_0 = arith.constant 0 : index
    %0 = vector.load %arg1[%c0, %c0_0] : memref<1x256xf32, #tpu.memory_space<vmem>>, vector<1x256xf32>
    %c0_1 = arith.constant 0 : index
    %c0_2 = arith.constant 0 : index
    %1 = vector.load %arg2[%c0_1, %c0_2] : memref<1x256xf32, #tpu.memory_space<vmem>>, vector<1x256xf32>
    %2 = math.cos %1 : vector<1x256xf32>
    %3 = arith.mulf %0, %2 : vector<1x256xf32>
    %c0_3 = arith.constant 0 : index
    %c0_4 = arith.constant 0 : index
    %4 = vector.load %arg3[%c0_3, %c0_4] : memref<1x256xf32, #tpu.memory_space<vmem>>, vector<1x256xf32>
    tpu.vector_store %arg3[%c0_3, %c0_4], %3 {strides = array<i32>} : memref<1x256xf32, #tpu.memory_space<vmem>>, vector<1x256xf32>,
    %5 = math.sin %1 : vector<1x256xf32>
    %6 = arith.mulf %0, %5 : vector<1x256xf32>
    %c0_5 = arith.constant 0 : index
    %c0_6 = arith.constant 0 : index
    %7 = vector.load %arg4[%c0_5, %c0_6] : memref<1x256xf32, #tpu.memory_space<vmem>>, vector<1x256xf32>
    tpu.vector_store %arg4[%c0_5, %c0_6], %6 {strides = array<i32>} : memref<1x256xf32, #tpu.memory_space<vmem>>, vector<1x256xf32>,
    return
  }
  func.func @transform_0(%arg0: i32) -> (i32, i32) {
    %c0_i32 = arith.constant 0 : i32
    %c0_i32_0 = arith.constant 0 : i32
    %c0_i32_1 = arith.constant 0 : i32
    return %c0_i32, %c0_i32_0 : i32, i32
  }
  func.func @transform_1(%arg0: i32) -> (i32, i32) {
    %c0_i32 = arith.constant 0 : i32
    %c0_i32_0 = arith.constant 0 : i32
    %c0_i32_1 = arith.constant 0 : i32
    return %c0_i32, %c0_i32_0 : i32, i32
  }
  func.func @transform_2(%arg0: i32) -> (i32, i32) {
    %c0_i32 = arith.constant 0 : i32
    %c0_i32_0 = arith.constant 0 : i32
    %c0_i32_1 = arith.constant 0 : i32
    return %c0_i32, %c0_i32_0 : i32, i32
  }
  func.func @transform_3(%arg0: i32) -> (i32, i32) {
    %c0_i32 = arith.constant 0 : i32
    %c0_i32_0 = arith.constant 0 : i32
    %c0_i32_1 = arith.constant 0 : i32
    return %c0_i32, %c0_i32_0 : i32, i32
  }
}

</mosaic_0001>

<bundles_post_ra>
// kernel: tile.6
= control target key start
LH: loop header
LB: loop body
LE: loop exit
PB: predicated region body
PF: predicated region fallthrough
CT: control target
= control target key end

     0   :  { %s28_s0 = inlined_call_operand.vmem [shape: f32[16], index: 0, kind: input, shape index: {}]   ;;  %s29_s1 = inlined_call_operand.vmem [shape: f32[16,16], index: 1, kind: output, shape index: {}]  }
   0x1   :  { %v4_v0 = vld [vmem:[%s28_s0] ss:$0 sm:$0xff] }
   0x2   :  { %5 = vst [vmem:[%s29_s1] sm:$0xff] %v4_v0  ;;  %8 = vst [vmem:[%s29_s1 + $0x8] sm:$0xff] %v4_v0 }

// kernel: tile.7
= control target key start
LH: loop header
LB: loop body
LE: loop exit
PB: predicated region body
PF: predicated region fallthrough
CT: control target
= control target key end

     0   :  { %s7_s6 = smov 3  ;;  %s21_s9 = smov 3  ;;  %vm4_vm0 = vcmask 130048   ;;  %vm11_vm1 = vcmask 1048448   ;;  %vm18_vm2 = vcmask 917248   ;;  %vm25_vm3 = vcmask 786048   ;;  %s128_s0 = inlined_call_operand.vmem [shape: f32[16,16], index: 0, kind: input, shape index: {}]   ;;  %s129_s1 = inlined_call_operand.vmem [shape: f32[1,256], index: 1, kind: output, shape index: {}]  }
   0x1   :  { %v66_v0 = vld [vmem:[%s128_s0 + $0x7] ss:$8 sm:%s7_s6]   ;;  %s81_s10 = smov 112   ;;  %v68_v1 = vld [vmem:[%s128_s0 + $0x5] ss:$8 sm:%s21_s9]   ;;  %s14_s13 = smov 3 }
   0x2   :  { %9 = vrot.lane.b32.xlu0 %v66_v0, %s81_s10  ;;  %s82_s14 = smov 80   ;;  %v67_v2 = vld [vmem:[%s128_s0 + $0x6] ss:$8 sm:%s14_s13]   ;;  %s28_s17 = smov 3  ;;  %vm32_vm4 = vcmask 654848   ;;  %vm39_vm5 = vcmask 523648  }
   0x3   :  { %23 = vrot.lane.b32.xlu1 %v68_v1, %s82_s14  ;;  %v69_v3 = vld [vmem:[%s128_s0 + $0x4] ss:$8 sm:%s28_s17]   ;;  %s35_s20 = smov 3  ;;  %s42_s21 = smov 3  ;;  %vm46_vm6 = vcmask 392448   ;;  %vm53_vm7 = vcmask 261248  }
   0x4   :  { %s83_s22 = smov 96   ;;  %s84_s23 = smov 64   ;;  %v70_v4 = vld [vmem:[%s128_s0 + $0x3] ss:$8 sm:%s35_s20]   ;;  %v71_v5 = vld [vmem:[%s128_s0 + $0x2] ss:$8 sm:%s42_s21]  }
   0x5   :  { %s2_s26 = smov 3  ;;  %s49_s29 = smov 3 }
   0x6   :  { %16 = vrot.lane.b32.xlu0 %v67_v2, %s83_s22  ;;  %v3_v6 = vld [vmem:[%s128_s0] ss:$8 sm:%s2_s26]   ;;  %s85_s3 = smov 48   ;;  %s86_s4 = smov 32  }
   0x7   :  { %30 = vrot.lane.b32.xlu1 %v69_v3, %s84_s23  ;;  %5 = vst.msk [vmem:[#allocation0] ss:$8 sm:$0x3] %vm4_vm0, %v3_v6   ;;  %v72_v7 = vld [vmem:[%s128_s0 + $0x1] ss:$8 sm:%s49_s29]   ;;  %s87_s0 = smov 16  }
   0xa   :  { %37 = vrot.lane.b32.xlu0 %v70_v4, %s85_s3 }
   0xb   :  { %44 = vrot.lane.b32.xlu1 %v71_v5, %s86_s4 }
   0xe   :  { %51 = vrot.lane.b32.xlu0 %v72_v7, %s87_s0 }
  0x74   :  { %v10_v8 = vpop.permute.xlu0 %9  }
  0x75   :  { %12 = vst.msk [vmem:[#allocation0] ss:$8 sm:$0x3] %vm11_vm1, %v10_v8   ;;  %v24_v9 = vpop.permute.xlu1 %23  }
  0x78   :  { %v17_v10 = vpop.permute.xlu0 %16  }
  0x79   :  { %19 = vst.msk [vmem:[#allocation0] ss:$8 sm:$0x3] %vm18_vm2, %v17_v10   ;;  %v31_v11 = vpop.permute.xlu1 %30  }
  0x7a   :  { %26 = vst.msk [vmem:[#allocation0] ss:$8 sm:$0x3] %vm25_vm3, %v24_v9  }
  0x7b   :  { %33 = vst.msk [vmem:[#allocation0] ss:$8 sm:$0x3] %vm32_vm4, %v31_v11  }
  0x7c   :  { %v38_v12 = vpop.permute.xlu0 %37  }
  0x7d   :  { %40 = vst.msk [vmem:[#allocation0] ss:$8 sm:$0x3] %vm39_vm5, %v38_v12   ;;  %v45_v13 = vpop.permute.xlu1 %44  }
  0x7e   :  { %47 = vst.msk [vmem:[#allocation0] ss:$8 sm:$0x3] %vm46_vm6, %v45_v13  }
  0x80   :  { %v52_v14 = vpop.permute.xlu0 %51  }
  0x81   :  { %54 = vst.msk [vmem:[#allocation0] ss:$8 sm:$0x3] %vm53_vm7, %v52_v14  }
  0x88   :  { %v58_v15 = vld [vmem:[#allocation0] sm:$0x1]  ;;  %v62_v16 = vld [vmem:[#allocation0 + $0x8] sm:$0x1] }
  0x89   :  { %60 = vst [vmem:[%s129_s1] sm:$0x1] %v58_v15  ;;  %73 = vst [vmem:[%s129_s1 + $0x1] sm:$0x1] %v62_v16 }

// kernel: hyper_semamba_forward.7
= control target key start
LH: loop header
LB: loop body
LE: loop exit
PB: predicated region body
PF: predicated region fallthrough
CT: control target
= control target key end

     0   :  { %vm163_vm0 = vcmask 1041408   ;;  %vm66_vm1 = vcmask 15360   ;;  %vm504_vm4 = vcmask 130048   ;;  %s1692_s1 = inlined_call_operand.vmem [shape: f32[2,16], index: 1, kind: input, shape index: {}]   ;;  %s1693_s0 = inlined_call_operand.vmem [shape: f32[256,2], index: 0, kind: input, shape index: {}]   ;;  %s1694_s4 = inlined_call_operand.vmem [shape: f32[16,16], index: 4, kind: input, shape index: {}]   ;;  %s1695_s2 = inlined_call_operand.vmem [shape: f32[1,16], index: 2, kind: input, shape index: {}]   ;;  %s1696_s3 = inlined_call_operand.vmem [shape: f32[1,16], index: 3, kind: input, shape index: {}]   ;;  %s1697_s5 = inlined_call_operand.vmem [shape: f32[1,16], index: 5, kind: input, shape index: {}]   ;;  %s1698_s6 = inlined_call_operand.vmem [shape: f32[1,16], index: 6, kind: input, shape index: {}]   ;;  %s1699_s7 = inlined_call_operand.vmem [shape: f32[256,16], index: 7, kind: output, shape index: {}]  }
   0x1   :  { %v58_v0 = vld [vmem:[%s1692_s1] sm:$0x3]  ;;  %v27_v2 = vld [vmem:[%s1693_s0 + $0x8] sm:$0xff]  ;;  %v28_v3 = vld [vmem:[%s1693_s0 + $0x10] sm:$0xff] }
   0x2   :  { %v26_v1 = vld [vmem:[%s1693_s0] sm:$0xff]  ;;  %1101 = vmatprep.subr.msk.mxu0 %vm163_vm0, %v58_v0  ;;  %v29_v4 = vld [vmem:[%s1693_s0 + $0x18] sm:$0xff]  ;;  %v31_v6 = vld [vmem:[%s1693_s0 + $0x28] sm:$0xff] }
   0x3   :  { %1103 = vmatprep.mubr.msk.f32.mxu0 %vm66_vm1, %v26_v1  ;;  %1102 = vmatpush3.msk.msra.mxu0 %vm163_vm0, %v58_v0  ;;  %v30_v5 = vld [vmem:[%s1693_s0 + $0x20] sm:$0xff]  ;;  %v32_v7 = vld [vmem:[%s1693_s0 + $0x30] sm:$0xff]  ;;  %v33_v8 = vld [vmem:[%s1693_s0 + $0x38] sm:$0xff] }
   0x4   :  { %1104 = vmatmul.mubr.msk.f32.vlgmr.msra.gmra.mrb[0].mxu0 %vm66_vm1, %v27_v2  ;;  %v34_v9 = vld [vmem:[%s1693_s0 + $0x40] sm:$0xff]  ;;  %v35_v10 = vld [vmem:[%s1693_s0 + $0x48] sm:$0xff]  ;;  %v36_v11 = vld [vmem:[%s1693_s0 + $0x50] sm:$0xff] }
   0x5   :  { %1106 = vmatprep.mubr.msk.f32.mxu0 %vm66_vm1, %v28_v3  ;;  %v37_v12 = vld [vmem:[%s1693_s0 + $0x58] sm:$0xff]  ;;  %v38_v13 = vld [vmem:[%s1693_s0 + $0x60] sm:$0xff]  ;;  %v39_v14 = vld [vmem:[%s1693_s0 + $0x68] sm:$0xff] }
   0x6   :  { %v40_v15 = vld [vmem:[%s1693_s0 + $0x70] sm:$0xff]  ;;  %v41_v16 = vld [vmem:[%s1693_s0 + $0x78] sm:$0xff]  ;;  %v42_v17 = vld [vmem:[%s1693_s0 + $0x80] sm:$0xff] }
   0x7   :  { %v43_v18 = vld [vmem:[%s1693_s0 + $0x88] sm:$0xff]  ;;  %v44_v19 = vld [vmem:[%s1693_s0 + $0x90] sm:$0xff]  ;;  %v45_v20 = vld [vmem:[%s1693_s0 + $0x98] sm:$0xff] }
   0x8   :  { %1107 = vmatmul.mubr.msk.f32.gmra.mrb[2].mxu0 %vm66_vm1, %v29_v4  ;;  %v46_v21 = vld [vmem:[%s1693_s0 + $0xa0] sm:$0xff]  ;;  %v47_v22 = vld [vmem:[%s1693_s0 + $0xa8] sm:$0xff]  ;;  %v48_v23 = vld [vmem:[%s1693_s0 + $0xb0] sm:$0xff] }
   0x9   :  { %1109 = vmatprep.mubr.msk.f32.mxu0 %vm66_vm1, %v30_v5  ;;  %v49_v24 = vld [vmem:[%s1693_s0 + $0xb8] sm:$0xff]  ;;  %v50_v25 = vld [vmem:[%s1693_s0 + $0xc0] sm:$0xff]  ;;  %v51_v26 = vld [vmem:[%s1693_s0 + $0xc8] sm:$0xff] }
   0xa   :  { %v52_v27 = vld [vmem:[%s1693_s0 + $0xd0] sm:$0xff]  ;;  %v53_v28 = vld [vmem:[%s1693_s0 + $0xd8] sm:$0xff]  ;;  %v54_v29 = vld [vmem:[%s1693_s0 + $0xe0] sm:$0xff] }
   0xb   :  { %v55_v30 = vld [vmem:[%s1693_s0 + $0xe8] sm:$0xff]  ;;  %v56_v31 = vld [vmem:[%s1693_s0 + $0xf0] sm:$0xff]  ;;  %v57_v32 = vld [vmem:[%s1693_s0 + $0xf8] sm:$0xff] }
   0xc   :  { %1110 = vmatmul.mubr.msk.f32.gmra.mrb[4].mxu0 %vm66_vm1, %v31_v6  ;;  %v495_v33 = vld [vmem:[%s1694_s4] sm:$0xff]  ;;  %v496_v34 = vld [vmem:[%s1694_s4 + $0x8] sm:$0xff] }
   0xd   :  { %1112 = vmatprep.mubr.msk.f32.mxu0 %vm66_vm1, %v32_v7  ;;  %v1203_v35 = vpack.c.bf16 %v496_v34, %v495_v33  ;;  %v1387_v36 = vld [vmem:[%s1695_s2] ss:$0 sm:$0xff] }
   0xe   :  { %v1392_v38 = vld [vmem:[%s1696_s3] ss:$0 sm:$0xff] }
   0xf   :  { %1204 = vmatprep.subr.bf16.mxu1 %v1203_v35 }
  0x10   :  { %1113 = vmatmul.mubr.msk.f32.gmra.mrb[6].mxu0 %vm66_vm1, %v33_v8  ;;  %1206 = vmatpush3.bf16.msra.mxu1 %v1203_v35 }
  0x11   :  { %1115 = vmatprep.mubr.msk.f32.mxu0 %vm66_vm1, %v34_v9 }
  0x14   :  { %1116 = vmatmul.mubr.msk.f32.gmra.mrb[8].mxu0 %vm66_vm1, %v35_v10 }
  0x15   :  { %1118 = vmatprep.mubr.msk.f32.mxu0 %vm66_vm1, %v36_v11 }
  0x18   :  { %1119 = vmatmul.mubr.msk.f32.gmra.mrb[10].mxu0 %vm66_vm1, %v37_v12 }
  0x19   :  { %1121 = vmatprep.mubr.msk.f32.mxu0 %vm66_vm1, %v38_v13 }
  0x1c   :  { %1122 = vmatmul.mubr.msk.f32.gmra.mrb[12].mxu0 %vm66_vm1, %v39_v14 }
  0x1d   :  { %1124 = vmatprep.mubr.msk.f32.mxu0 %vm66_vm1, %v40_v15 }
  0x20   :  { %1125 = vmatmul.mubr.msk.f32.gmra.mrb[14].mxu0 %vm66_vm1, %v41_v16 }
  0x21   :  { %1127 = vmatprep.mubr.msk.f32.mxu0 %vm66_vm1, %v42_v17 }
  0x24   :  { %1128 = vmatmul.mubr.msk.f32.gmra.mrb[16].mxu0 %vm66_vm1, %v43_v18 }
  0x25   :  { %1130 = vmatprep.mubr.msk.f32.mxu0 %vm66_vm1, %v44_v19 }
  0x28   :  { %1131 = vmatmul.mubr.msk.f32.gmra.mrb[18].mxu0 %vm66_vm1, %v45_v20 }
  0x29   :  { %1133 = vmatprep.mubr.msk.f32.mxu0 %vm66_vm1, %v46_v21 }
  0x2c   :  { %1134 = vmatmul.mubr.msk.f32.gmra.mrb[20].mxu0 %vm66_vm1, %v47_v22 }
  0x2d   :  { %1136 = vmatprep.mubr.msk.f32.mxu0 %vm66_vm1, %v48_v23 }
  0x30   :  { %1137 = vmatmul.mubr.msk.f32.gmra.mrb[22].mxu0 %vm66_vm1, %v49_v24 }
  0x31   :  { %1139 = vmatprep.mubr.msk.f32.mxu0 %vm66_vm1, %v50_v25 }
  0x34   :  { %1140 = vmatmul.mubr.msk.f32.gmra.mrb[24].mxu0 %vm66_vm1, %v51_v26 }
  0x35   :  { %1142 = vmatprep.mubr.msk.f32.mxu0 %vm66_vm1, %v52_v27 }
  0x38   :  { %1143 = vmatmul.mubr.msk.f32.gmra.mrb[26].mxu0 %vm66_vm1, %v53_v28 }
  0x39   :  { %1145 = vmatprep.mubr.msk.f32.mxu0 %vm66_vm1, %v54_v29 }
  0x3c   :  { %1146 = vmatmul.mubr.msk.f32.gmra.mrb[28].mxu0 %vm66_vm1, %v55_v30 }
  0x3d   :  { %1148 = vmatprep.mubr.msk.f32.mxu0 %vm66_vm1, %v56_v31 }
  0x40   :  { %1149 = vmatmul.mubr.msk.f32.gmra.mrb[30].mxu0 %vm66_vm1, %v57_v32 }
  0xd7   :  { %v1105_v37 = vpop.f32.mrb[0].mxu0 }
  0xd8   :  { %v239_v39 = vadd.f32 %v1105_v37, %v1387_v36  ;;  %v233_v40 = vpop.f32.mrb[1].mxu0 }
  0xd9   :  { %v234_v41 = vadd.f32 %v1387_v36, %v233_v40 }
  0xda   :  { %v432_v42 = vmul.f32 %v1392_v38, %v239_v39  ;;  %vm393_vm2 = vcmp.ge.f32.partialorder %v239_v39, 0.0 }
  0xdb   :  { %v1108_v43 = vpop.f32.mrb[2].mxu0  ;;  %vm392_vm3 = vcmp.ge.f32.partialorder %v234_v41, 0.0  ;;  %v431_v44 = vmul.f32 %v1392_v38, %v234_v41 }
  0xdc   :  { %v249_v45 = vadd.f32 %v1108_v43, %v1387_v36  ;;  %v243_v46 = vpop.f32.mrb[3].mxu0  ;;  %v464_v50 = vsel %vm393_vm2, %v239_v39, %v432_v42 }
  0xdd   :  { %v244_v47 = vadd.f32 %v1387_v36, %v243_v46  ;;  %v463_v48 = vsel %vm392_vm3, %v234_v41, %v431_v44 }
  0xde   :  { %v434_v49 = vmul.f32 %v1392_v38, %v249_v45  ;;  %1155 = vmatprep.mubr.msk.f32.mxu1 %vm504_vm4, %v463_v48  ;;  %vm395_vm5 = vcmp.ge.f32.partialorder %v249_v45, 0.0 }
  0xdf   :  { %vm394_vm6 = vcmp.ge.f32.partialorder %v244_v47, 0.0  ;;  %v433_v51 = vmul.f32 %v1392_v38, %v244_v47  ;;  %v1111_v52 = vpop.f32.mrb[4].mxu0  ;;  %1156 = vmatmul.mubr.msk.f32.vlgmr.msra.gmra.mrb[0].mxu1 %vm504_vm4, %v464_v50 }
  0xe0   :  { %v259_v53 = vadd.f32 %v1111_v52, %v1387_v36  ;;  %v253_v54 = vpop.f32.mrb[5].mxu0  ;;  %v466_v58 = vsel %vm395_vm5, %v249_v45, %v434_v49 }
  0xe1   :  { %v254_v55 = vadd.f32 %v1387_v36, %v253_v54  ;;  %v465_v56 = vsel %vm394_vm6, %v244_v47, %v433_v51 }
  0xe2   :  { %v436_v57 = vmul.f32 %v1392_v38, %v259_v53  ;;  %1158 = vmatprep.mubr.msk.f32.mxu1 %vm504_vm4, %v465_v56  ;;  %vm397_vm7 = vcmp.ge.f32.partialorder %v259_v53, 0.0 }
  0xe3   :  { %vm396_vm8 = vcmp.ge.f32.partialorder %v254_v55, 0.0  ;;  %v435_v59 = vmul.f32 %v1392_v38, %v254_v55  ;;  %v1114_v60 = vpop.f32.mrb[6].mxu0  ;;  %1159 = vmatmul.mubr.msk.f32.gmra.mrb[2].mxu1 %vm504_vm4, %v466_v58 }
  0xe4   :  { %v269_v61 = vadd.f32 %v1114_v60, %v1387_v36  ;;  %v263_v62 = vpop.f32.mrb[7].mxu0  ;;  %v468_v2 = vsel %vm397_vm7, %v259_v53, %v436_v57 }
  0xe5   :  { %v264_v63 = vadd.f32 %v1387_v36, %v263_v62  ;;  %v467_v0 = vsel %vm396_vm8, %v254_v55, %v435_v59 }
  0xe6   :  { %v438_v1 = vmul.f32 %v1392_v38, %v269_v61  ;;  %1161 = vmatprep.mubr.msk.f32.mxu1 %vm504_vm4, %v467_v0  ;;  %vm399_vm9 = vcmp.ge.f32.partialorder %v269_v61, 0.0 }
  0xe7   :  { %vm398_vm10 = vcmp.ge.f32.partialorder %v264_v63, 0.0  ;;  %v437_v3 = vmul.f32 %v1392_v38, %v264_v63  ;;  %v1117_v4 = vpop.f32.mrb[8].mxu0  ;;  %1162 = vmatmul.mubr.msk.f32.gmra.mrb[4].mxu1 %vm504_vm4, %v468_v2 }
  0xe8   :  { %v279_v5 = vadd.f32 %v1117_v4, %v1387_v36  ;;  %v273_v6 = vpop.f32.mrb[9].mxu0  ;;  %v470_v10 = vsel %vm399_vm9, %v269_v61, %v438_v1 }
  0xe9   :  { %v274_v7 = vadd.f32 %v1387_v36, %v273_v6  ;;  %v469_v8 = vsel %vm398_vm10, %v264_v63, %v437_v3 }
  0xea   :  { %v440_v9 = vmul.f32 %v1392_v38, %v279_v5  ;;  %1164 = vmatprep.mubr.msk.f32.mxu1 %vm504_vm4, %v469_v8  ;;  %vm401_vm11 = vcmp.ge.f32.partialorder %v279_v5, 0.0 }
  0xeb   :  { %vm400_vm12 = vcmp.ge.f32.partialorder %v274_v7, 0.0  ;;  %v439_v11 = vmul.f32 %v1392_v38, %v274_v7  ;;  %v1120_v12 = vpop.f32.mrb[10].mxu0  ;;  %1165 = vmatmul.mubr.msk.f32.gmra.mrb[6].mxu1 %vm504_vm4, %v470_v10 }
  0xec   :  { %v289_v13 = vadd.f32 %v1120_v12, %v1387_v36  ;;  %v283_v14 = vpop.f32.mrb[11].mxu0  ;;  %v472_v18 = vsel %vm401_vm11, %v279_v5, %v440_v9 }
  0xed   :  { %v284_v15 = vadd.f32 %v1387_v36, %v283_v14  ;;  %v471_v16 = vsel %vm400_vm12, %v274_v7, %v439_v11 }
  0xee   :  { %v442_v17 = vmul.f32 %v1392_v38, %v289_v13  ;;  %1167 = vmatprep.mubr.msk.f32.mxu1 %vm504_vm4, %v471_v16  ;;  %vm403_vm13 = vcmp.ge.f32.partialorder %v289_v13, 0.0 }
  0xef   :  { %vm402_vm14 = vcmp.ge.f32.partialorder %v284_v15, 0.0  ;;  %v441_v19 = vmul.f32 %v1392_v38, %v284_v15  ;;  %v1123_v20 = vpop.f32.mrb[12].mxu0  ;;  %1168 = vmatmul.mubr.msk.f32.gmra.mrb[8].mxu1 %vm504_vm4, %v472_v18 }
  0xf0   :  { %v299_v21 = vadd.f32 %v1123_v20, %v1387_v36  ;;  %v293_v22 = vpop.f32.mrb[13].mxu0  ;;  %v474_v26 = vsel %vm403_vm13, %v289_v13, %v442_v17 }
  0xf1   :  { %v294_v23 = vadd.f32 %v1387_v36, %v293_v22  ;;  %v473_v24 = vsel %vm402_vm14, %v284_v15, %v441_v19 }
  0xf2   :  { %v444_v25 = vmul.f32 %v1392_v38, %v299_v21  ;;  %1170 = vmatprep.mubr.msk.f32.mxu1 %vm504_vm4, %v473_v24  ;;  %vm405_vm15 = vcmp.ge.f32.partialorder %v299_v21, 0.0 }
  0xf3   :  { %vm404_vm0 = vcmp.ge.f32.partialorder %v294_v23, 0.0  ;;  %v443_v27 = vmul.f32 %v1392_v38, %v294_v23  ;;  %v1126_v28 = vpop.f32.mrb[14].mxu0  ;;  %1171 = vmatmul.mubr.msk.f32.gmra.mrb[10].mxu1 %vm504_vm4, %v474_v26 }
  0xf4   :  { %v309_v29 = vadd.f32 %v1126_v28, %v1387_v36  ;;  %v303_v30 = vpop.f32.mrb[15].mxu0  ;;  %v476_v34 = vsel %vm405_vm15, %v299_v21, %v444_v25 }
  0xf5   :  { %v304_v31 = vadd.f32 %v1387_v36, %v303_v30  ;;  %v475_v32 = vsel %vm404_vm0, %v294_v23, %v443_v27 }
  0xf6   :  { %v446_v33 = vmul.f32 %v1392_v38, %v309_v29  ;;  %1173 = vmatprep.mubr.msk.f32.mxu1 %vm504_vm4, %v475_v32  ;;  %vm407_vm1 = vcmp.ge.f32.partialorder %v309_v29, 0.0 }
  0xf7   :  { %vm406_vm2 = vcmp.ge.f32.partialorder %v304_v31, 0.0  ;;  %v445_v35 = vmul.f32 %v1392_v38, %v304_v31  ;;  %v1129_v37 = vpop.f32.mrb[16].mxu0  ;;  %1174 = vmatmul.mubr.msk.f32.gmra.mrb[12].mxu1 %vm504_vm4, %v476_v34 }
  0xf8   :  { %v319_v39 = vadd.f32 %v1129_v37, %v1387_v36  ;;  %v313_v40 = vpop.f32.mrb[17].mxu0  ;;  %v478_v44 = vsel %vm407_vm1, %v309_v29, %v446_v33 }
  0xf9   :  { %v314_v41 = vadd.f32 %v1387_v36, %v313_v40  ;;  %v477_v42 = vsel %vm406_vm2, %v304_v31, %v445_v35 }
  0xfa   :  { %v448_v43 = vmul.f32 %v1392_v38, %v319_v39  ;;  %1176 = vmatprep.mubr.msk.f32.mxu1 %vm504_vm4, %v477_v42  ;;  %vm409_vm3 = vcmp.ge.f32.partialorder %v319_v39, 0.0 }
  0xfb   :  { %vm408_vm5 = vcmp.ge.f32.partialorder %v314_v41, 0.0  ;;  %v447_v45 = vmul.f32 %v1392_v38, %v314_v41  ;;  %v1132_v46 = vpop.f32.mrb[18].mxu0  ;;  %1177 = vmatmul.mubr.msk.f32.gmra.mrb[14].mxu1 %vm504_vm4, %v478_v44 }
  0xfc   :  { %v329_v47 = vadd.f32 %v1132_v46, %v1387_v36  ;;  %v323_v48 = vpop.f32.mrb[19].mxu0  ;;  %v480_v52 = vsel %vm409_vm3, %v319_v39, %v448_v43  ;;  %v1498_v43 = vld [vmem:[%s1698_s6] ss:$0 sm:$0xff] }
  0xfd   :  { %v324_v49 = vadd.f32 %v1387_v36, %v323_v48  ;;  %v479_v50 = vsel %vm408_vm5, %v314_v41, %v447_v45 }
  0xfe   :  { %v450_v51 = vmul.f32 %v1392_v38, %v329_v47  ;;  %1179 = vmatprep.mubr.msk.f32.mxu1 %vm504_vm4, %v479_v50  ;;  %vm411_vm6 = vcmp.ge.f32.partialorder %v329_v47, 0.0 }
  0xff   :  { %vm410_vm7 = vcmp.ge.f32.partialorder %v324_v49, 0.0  ;;  %v449_v53 = vmul.f32 %v1392_v38, %v324_v49  ;;  %v1135_v54 = vpop.f32.mrb[20].mxu0  ;;  %1180 = vmatmul.mubr.msk.f32.gmra.mrb[16].mxu1 %vm504_vm4, %v480_v52 }
 0x100   :  { %v339_v55 = vadd.f32 %v1135_v54, %v1387_v36  ;;  %v333_v56 = vpop.f32.mrb[21].mxu0  ;;  %v482_v60 = vsel %vm411_vm6, %v329_v47, %v450_v51 }
 0x101   :  { %v334_v57 = vadd.f32 %v1387_v36, %v333_v56  ;;  %v481_v58 = vsel %vm410_vm7, %v324_v49, %v449_v53 }
 0x102   :  { %v452_v59 = vmul.f32 %v1392_v38, %v339_v55  ;;  %1182 = vmatprep.mubr.msk.f32.mxu1 %vm504_vm4, %v481_v58  ;;  %vm413_vm8 = vcmp.ge.f32.partialorder %v339_v55, 0.0 }
 0x103   :  { %vm412_vm9 = vcmp.ge.f32.partialorder %v334_v57, 0.0  ;;  %v451_v61 = vmul.f32 %v1392_v38, %v334_v57  ;;  %v1138_v62 = vpop.f32.mrb[22].mxu0  ;;  %1183 = vmatmul.mubr.msk.f32.gmra.mrb[18].mxu1 %vm504_vm4, %v482_v60 }
 0x104   :  { %v349_v63 = vadd.f32 %v1138_v62, %v1387_v36  ;;  %v343_v0 = vpop.f32.mrb[23].mxu0  ;;  %v484_v4 = vsel %vm413_vm8, %v339_v55, %v452_v59 }
 0x105   :  { %v344_v1 = vadd.f32 %v1387_v36, %v343_v0  ;;  %v483_v2 = vsel %vm412_vm9, %v334_v57, %v451_v61 }
 0x106   :  { %v454_v3 = vmul.f32 %v1392_v38, %v349_v63  ;;  %1185 = vmatprep.mubr.msk.f32.mxu1 %vm504_vm4, %v483_v2  ;;  %vm415_vm10 = vcmp.ge.f32.partialorder %v349_v63, 0.0 }
 0x107   :  { %vm414_vm11 = vcmp.ge.f32.partialorder %v344_v1, 0.0  ;;  %v453_v5 = vmul.f32 %v1392_v38, %v344_v1  ;;  %v1141_v6 = vpop.f32.mrb[24].mxu0  ;;  %1186 = vmatmul.mubr.msk.f32.gmra.mrb[20].mxu1 %vm504_vm4, %v484_v4 }
 0x108   :  { %v359_v7 = vadd.f32 %v1141_v6, %v1387_v36  ;;  %v353_v8 = vpop.f32.mrb[25].mxu0  ;;  %v486_v12 = vsel %vm415_vm10, %v349_v63, %v454_v3 }
 0x109   :  { %v354_v9 = vadd.f32 %v1387_v36, %v353_v8  ;;  %v485_v10 = vsel %vm414_vm11, %v344_v1, %v453_v5 }
 0x10a   :  { %v456_v11 = vmul.f32 %v1392_v38, %v359_v7  ;;  %1188 = vmatprep.mubr.msk.f32.mxu1 %vm504_vm4, %v485_v10  ;;  %vm417_vm12 = vcmp.ge.f32.partialorder %v359_v7, 0.0 }
 0x10b   :  { %vm416_vm13 = vcmp.ge.f32.partialorder %v354_v9, 0.0  ;;  %v455_v13 = vmul.f32 %v1392_v38, %v354_v9  ;;  %v1144_v14 = vpop.f32.mrb[26].mxu0  ;;  %1189 = vmatmul.mubr.msk.f32.gmra.mrb[22].mxu1 %vm504_vm4, %v486_v12 }
 0x10c   :  { %v369_v15 = vadd.f32 %v1144_v14, %v1387_v36  ;;  %v363_v16 = vpop.f32.mrb[27].mxu0  ;;  %v488_v20 = vsel %vm417_vm12, %v359_v7, %v456_v11 }
 0x10d   :  { %v364_v17 = vadd.f32 %v1387_v36, %v363_v16  ;;  %v487_v18 = vsel %vm416_vm13, %v354_v9, %v455_v13 }
 0x10e   :  { %v458_v19 = vmul.f32 %v1392_v38, %v369_v15  ;;  %1191 = vmatprep.mubr.msk.f32.mxu1 %vm504_vm4, %v487_v18  ;;  %vm419_vm14 = vcmp.ge.f32.partialorder %v369_v15, 0.0 }
 0x10f   :  { %vm418_vm15 = vcmp.ge.f32.partialorder %v364_v17, 0.0  ;;  %v457_v21 = vmul.f32 %v1392_v38, %v364_v17  ;;  %v1147_v22 = vpop.f32.mrb[28].mxu0  ;;  %1192 = vmatmul.mubr.msk.f32.gmra.mrb[24].mxu1 %vm504_vm4, %v488_v20 }
 0x110   :  { %v379_v23 = vadd.f32 %v1147_v22, %v1387_v36  ;;  %v373_v24 = vpop.f32.mrb[29].mxu0  ;;  %v490_v28 = vsel %vm419_vm14, %v369_v15, %v458_v19 }
 0x111   :  { %v374_v25 = vadd.f32 %v1387_v36, %v373_v24  ;;  %v489_v26 = vsel %vm418_vm15, %v364_v17, %v457_v21 }
 0x112   :  { %v460_v27 = vmul.f32 %v1392_v38, %v379_v23  ;;  %1194 = vmatprep.mubr.msk.f32.mxu1 %vm504_vm4, %v489_v26  ;;  %vm421_vm0 = vcmp.ge.f32.partialorder %v379_v23, 0.0 }
 0x113   :  { %vm420_vm1 = vcmp.ge.f32.partialorder %v374_v25, 0.0  ;;  %v459_v29 = vmul.f32 %v1392_v38, %v374_v25  ;;  %v1150_v30 = vpop.f32.mrb[30].mxu0  ;;  %1195 = vmatmul.mubr.msk.f32.gmra.mrb[26].mxu1 %vm504_vm4, %v490_v28 }
 0x114   :  { %v389_v31 = vadd.f32 %v1150_v30, %v1387_v36  ;;  %v383_v32 = vpop.f32.mrb[31].mxu0  ;;  %v492_v37 = vsel %vm421_vm0, %v379_v23, %v460_v27 }
 0x115   :  { %v384_v33 = vadd.f32 %v1387_v36, %v383_v32  ;;  %v491_v34 = vsel %vm420_vm1, %v374_v25, %v459_v29  ;;  %v1493_v36 = vld [vmem:[%s1697_s5] ss:$0 sm:$0xff] }
 0x116   :  { %v462_v35 = vmul.f32 %v1392_v38, %v389_v31  ;;  %1197 = vmatprep.mubr.msk.f32.mxu1 %vm504_vm4, %v491_v34  ;;  %vm423_vm2 = vcmp.ge.f32.partialorder %v389_v31, 0.0 }
 0x117   :  { %vm422_vm3 = vcmp.ge.f32.partialorder %v384_v33, 0.0  ;;  %v461_v39 = vmul.f32 %v1392_v38, %v384_v33  ;;  %1198 = vmatmul.mubr.msk.f32.gmra.mrb[28].mxu1 %vm504_vm4, %v492_v37 }
 0x118   :  { %v494_v41 = vsel %vm423_vm2, %v389_v31, %v462_v35 }
 0x119   :  { %v493_v40 = vsel %vm422_vm3, %v384_v33, %v461_v39 }
 0x11a   :  { %1200 = vmatprep.mubr.msk.f32.mxu1 %vm504_vm4, %v493_v40 }
 0x11b   :  { %1201 = vmatmul.mubr.msk.f32.gmra.mrb[30].mxu1 %vm504_vm4, %v494_v41 }
 0x1b2   :  { %v1157_v42 = vpop.f32.mrb[0].mxu1 }
 0x1b3   :  { %v673_v38 = vadd.f32 %v1157_v42, %v1493_v36  ;;  %v667_v44 = vpop.f32.mrb[1].mxu1 }
 0x1b4   :  { %v668_v45 = vadd.f32 %v1493_v36, %v667_v44 }
 0x1b5   :  { %vm827_vm5 = vcmp.ge.f32.partialorder %v673_v38, 0.0  ;;  %v866_v46 = vmul.f32 %v1498_v43, %v673_v38 }
 0x1b6   :  { %vm826_vm6 = vcmp.ge.f32.partialorder %v668_v45, 0.0  ;;  %v865_v47 = vmul.f32 %v1498_v43, %v668_v45  ;;  %v1160_v48 = vpop.f32.mrb[2].mxu1 }
 0x1b7   :  { %v898_v49 = vsel %vm827_vm5, %v673_v38, %v866_v46  ;;  %v683_v50 = vadd.f32 %v1160_v48, %v1493_v36  ;;  %v677_v51 = vpop.f32.mrb[3].mxu1 }
 0x1b8   :  { %930 = vst.msk [vmem:[%s1699_s7 + $0x8] sm:$0xff] %vm504_vm4, %v898_v49  ;;  %v897_v52 = vsel %vm826_vm6, %v668_v45, %v865_v47  ;;  %v678_v53 = vadd.f32 %v1493_v36, %v677_v51 }
 0x1b9   :  { %929 = vst.msk [vmem:[%s1699_s7] sm:$0xff] %vm504_vm4, %v897_v52  ;;  %vm829_vm7 = vcmp.ge.f32.partialorder %v683_v50, 0.0  ;;  %v868_v54 = vmul.f32 %v1498_v43, %v683_v50 }
 0x1ba   :  { %vm828_vm8 = vcmp.ge.f32.partialorder %v678_v53, 0.0  ;;  %v867_v55 = vmul.f32 %v1498_v43, %v678_v53  ;;  %v1163_v56 = vpop.f32.mrb[4].mxu1 }
 0x1bb   :  { %v900_v57 = vsel %vm829_vm7, %v683_v50, %v868_v54  ;;  %v693_v58 = vadd.f32 %v1163_v56, %v1493_v36  ;;  %v687_v59 = vpop.f32.mrb[5].mxu1 }
 0x1bc   :  { %932 = vst.msk [vmem:[%s1699_s7 + $0x18] sm:$0xff] %vm504_vm4, %v900_v57  ;;  %v899_v60 = vsel %vm828_vm8, %v678_v53, %v867_v55  ;;  %v688_v61 = vadd.f32 %v1493_v36, %v687_v59 }
 0x1bd   :  { %931 = vst.msk [vmem:[%s1699_s7 + $0x10] sm:$0xff] %vm504_vm4, %v899_v60  ;;  %vm831_vm9 = vcmp.ge.f32.partialorder %v693_v58, 0.0  ;;  %v870_v62 = vmul.f32 %v1498_v43, %v693_v58 }
 0x1be   :  { %vm830_vm10 = vcmp.ge.f32.partialorder %v688_v61, 0.0  ;;  %v869_v63 = vmul.f32 %v1498_v43, %v688_v61  ;;  %v1166_v0 = vpop.f32.mrb[6].mxu1 }
 0x1bf   :  { %v902_v1 = vsel %vm831_vm9, %v693_v58, %v870_v62  ;;  %v703_v2 = vadd.f32 %v1166_v0, %v1493_v36  ;;  %v697_v3 = vpop.f32.mrb[7].mxu1 }
 0x1c0   :  { %934 = vst.msk [vmem:[%s1699_s7 + $0x28] sm:$0xff] %vm504_vm4, %v902_v1  ;;  %v901_v4 = vsel %vm830_vm10, %v688_v61, %v869_v63  ;;  %v698_v5 = vadd.f32 %v1493_v36, %v697_v3 }
 0x1c1   :  { %933 = vst.msk [vmem:[%s1699_s7 + $0x20] sm:$0xff] %vm504_vm4, %v901_v4  ;;  %vm833_vm11 = vcmp.ge.f32.partialorder %v703_v2, 0.0  ;;  %v872_v6 = vmul.f32 %v1498_v43, %v703_v2 }
 0x1c2   :  { %vm832_vm12 = vcmp.ge.f32.partialorder %v698_v5, 0.0  ;;  %v871_v7 = vmul.f32 %v1498_v43, %v698_v5  ;;  %v1169_v8 = vpop.f32.mrb[8].mxu1 }
 0x1c3   :  { %v904_v9 = vsel %vm833_vm11, %v703_v2, %v872_v6  ;;  %v713_v10 = vadd.f32 %v1169_v8, %v1493_v36  ;;  %v707_v11 = vpop.f32.mrb[9].mxu1 }
 0x1c4   :  { %936 = vst.msk [vmem:[%s1699_s7 + $0x38] sm:$0xff] %vm504_vm4, %v904_v9  ;;  %v903_v12 = vsel %vm832_vm12, %v698_v5, %v871_v7  ;;  %v708_v13 = vadd.f32 %v1493_v36, %v707_v11 }
 0x1c5   :  { %935 = vst.msk [vmem:[%s1699_s7 + $0x30] sm:$0xff] %vm504_vm4, %v903_v12  ;;  %vm835_vm13 = vcmp.ge.f32.partialorder %v713_v10, 0.0  ;;  %v874_v14 = vmul.f32 %v1498_v43, %v713_v10 }
 0x1c6   :  { %vm834_vm14 = vcmp.ge.f32.partialorder %v708_v13, 0.0  ;;  %v873_v15 = vmul.f32 %v1498_v43, %v708_v13  ;;  %v1172_v16 = vpop.f32.mrb[10].mxu1 }
 0x1c7   :  { %v906_v17 = vsel %vm835_vm13, %v713_v10, %v874_v14  ;;  %v723_v18 = vadd.f32 %v1172_v16, %v1493_v36  ;;  %v717_v19 = vpop.f32.mrb[11].mxu1 }
 0x1c8   :  { %938 = vst.msk [vmem:[%s1699_s7 + $0x48] sm:$0xff] %vm504_vm4, %v906_v17  ;;  %v905_v20 = vsel %vm834_vm14, %v708_v13, %v873_v15  ;;  %v718_v21 = vadd.f32 %v1493_v36, %v717_v19 }
 0x1c9   :  { %937 = vst.msk [vmem:[%s1699_s7 + $0x40] sm:$0xff] %vm504_vm4, %v905_v20  ;;  %vm837_vm15 = vcmp.ge.f32.partialorder %v723_v18, 0.0  ;;  %v876_v22 = vmul.f32 %v1498_v43, %v723_v18 }
 0x1ca   :  { %vm836_vm0 = vcmp.ge.f32.partialorder %v718_v21, 0.0  ;;  %v875_v23 = vmul.f32 %v1498_v43, %v718_v21  ;;  %v1175_v24 = vpop.f32.mrb[12].mxu1 }
 0x1cb   :  { %v908_v25 = vsel %vm837_vm15, %v723_v18, %v876_v22  ;;  %v733_v26 = vadd.f32 %v1175_v24, %v1493_v36  ;;  %v727_v27 = vpop.f32.mrb[13].mxu1 }
 0x1cc   :  { %940 = vst.msk [vmem:[%s1699_s7 + $0x58] sm:$0xff] %vm504_vm4, %v908_v25  ;;  %v907_v28 = vsel %vm836_vm0, %v718_v21, %v875_v23  ;;  %v728_v29 = vadd.f32 %v1493_v36, %v727_v27 }
 0x1cd   :  { %939 = vst.msk [vmem:[%s1699_s7 + $0x50] sm:$0xff] %vm504_vm4, %v907_v28  ;;  %vm839_vm1 = vcmp.ge.f32.partialorder %v733_v26, 0.0  ;;  %v878_v30 = vmul.f32 %v1498_v43, %v733_v26 }
 0x1ce   :  { %vm838_vm2 = vcmp.ge.f32.partialorder %v728_v29, 0.0  ;;  %v877_v31 = vmul.f32 %v1498_v43, %v728_v29  ;;  %v1178_v32 = vpop.f32.mrb[14].mxu1 }
 0x1cf   :  { %v910_v33 = vsel %vm839_vm1, %v733_v26, %v878_v30  ;;  %v743_v34 = vadd.f32 %v1178_v32, %v1493_v36  ;;  %v737_v35 = vpop.f32.mrb[15].mxu1 }
 0x1d0   :  { %942 = vst.msk [vmem:[%s1699_s7 + $0x68] sm:$0xff] %vm504_vm4, %v910_v33  ;;  %v909_v37 = vsel %vm838_vm2, %v728_v29, %v877_v31  ;;  %v738_v39 = vadd.f32 %v1493_v36, %v737_v35 }
 0x1d1   :  { %941 = vst.msk [vmem:[%s1699_s7 + $0x60] sm:$0xff] %vm504_vm4, %v909_v37  ;;  %vm841_vm3 = vcmp.ge.f32.partialorder %v743_v34, 0.0  ;;  %v880_v40 = vmul.f32 %v1498_v43, %v743_v34 }
 0x1d2   :  { %vm840_vm5 = vcmp.ge.f32.partialorder %v738_v39, 0.0  ;;  %v879_v41 = vmul.f32 %v1498_v43, %v738_v39  ;;  %v1181_v42 = vpop.f32.mrb[16].mxu1 }
 0x1d3   :  { %v912_v38 = vsel %vm841_vm3, %v743_v34, %v880_v40  ;;  %v753_v44 = vadd.f32 %v1181_v42, %v1493_v36  ;;  %v747_v45 = vpop.f32.mrb[17].mxu1 }
 0x1d4   :  { %944 = vst.msk [vmem:[%s1699_s7 + $0x78] sm:$0xff] %vm504_vm4, %v912_v38  ;;  %v911_v46 = vsel %vm840_vm5, %v738_v39, %v879_v41  ;;  %v748_v47 = vadd.f32 %v1493_v36, %v747_v45 }
 0x1d5   :  { %943 = vst.msk [vmem:[%s1699_s7 + $0x70] sm:$0xff] %vm504_vm4, %v911_v46  ;;  %vm843_vm6 = vcmp.ge.f32.partialorder %v753_v44, 0.0  ;;  %v882_v48 = vmul.f32 %v1498_v43, %v753_v44 }
 0x1d6   :  { %vm842_vm7 = vcmp.ge.f32.partialorder %v748_v47, 0.0  ;;  %v881_v49 = vmul.f32 %v1498_v43, %v748_v47  ;;  %v1184_v50 = vpop.f32.mrb[18].mxu1 }
 0x1d7   :  { %v914_v51 = vsel %vm843_vm6, %v753_v44, %v882_v48  ;;  %v763_v52 = vadd.f32 %v1184_v50, %v1493_v36  ;;  %v757_v53 = vpop.f32.mrb[19].mxu1 }
 0x1d8   :  { %946 = vst.msk [vmem:[%s1699_s7 + $0x88] sm:$0xff] %vm504_vm4, %v914_v51  ;;  %v913_v54 = vsel %vm842_vm7, %v748_v47, %v881_v49  ;;  %v758_v55 = vadd.f32 %v1493_v36, %v757_v53 }
 0x1d9   :  { %945 = vst.msk [vmem:[%s1699_s7 + $0x80] sm:$0xff] %vm504_vm4, %v913_v54  ;;  %vm845_vm8 = vcmp.ge.f32.partialorder %v763_v52, 0.0  ;;  %v884_v56 = vmul.f32 %v1498_v43, %v763_v52 }
 0x1da   :  { %vm844_vm9 = vcmp.ge.f32.partialorder %v758_v55, 0.0  ;;  %v883_v57 = vmul.f32 %v1498_v43, %v758_v55  ;;  %v1187_v58 = vpop.f32.mrb[20].mxu1 }
 0x1db   :  { %v916_v59 = vsel %vm845_vm8, %v763_v52, %v884_v56  ;;  %v773_v60 = vadd.f32 %v1187_v58, %v1493_v36  ;;  %v767_v61 = vpop.f32.mrb[21].mxu1 }
 0x1dc   :  { %948 = vst.msk [vmem:[%s1699_s7 + $0x98] sm:$0xff] %vm504_vm4, %v916_v59  ;;  %v915_v62 = vsel %vm844_vm9, %v758_v55, %v883_v57  ;;  %v768_v63 = vadd.f32 %v1493_v36, %v767_v61 }
 0x1dd   :  { %947 = vst.msk [vmem:[%s1699_s7 + $0x90] sm:$0xff] %vm504_vm4, %v915_v62  ;;  %vm847_vm10 = vcmp.ge.f32.partialorder %v773_v60, 0.0  ;;  %v886_v0 = vmul.f32 %v1498_v43, %v773_v60 }
 0x1de   :  { %vm846_vm11 = vcmp.ge.f32.partialorder %v768_v63, 0.0  ;;  %v885_v1 = vmul.f32 %v1498_v43, %v768_v63  ;;  %v1190_v2 = vpop.f32.mrb[22].mxu1 }
 0x1df   :  { %v918_v3 = vsel %vm847_vm10, %v773_v60, %v886_v0  ;;  %v783_v4 = vadd.f32 %v1190_v2, %v1493_v36  ;;  %v777_v5 = vpop.f32.mrb[23].mxu1 }
 0x1e0   :  { %950 = vst.msk [vmem:[%s1699_s7 + $0xa8] sm:$0xff] %vm504_vm4, %v918_v3  ;;  %v917_v6 = vsel %vm846_vm11, %v768_v63, %v885_v1  ;;  %v778_v7 = vadd.f32 %v1493_v36, %v777_v5 }
 0x1e1   :  { %949 = vst.msk [vmem:[%s1699_s7 + $0xa0] sm:$0xff] %vm504_vm4, %v917_v6  ;;  %vm849_vm12 = vcmp.ge.f32.partialorder %v783_v4, 0.0  ;;  %v888_v8 = vmul.f32 %v1498_v43, %v783_v4 }
 0x1e2   :  { %vm848_vm13 = vcmp.ge.f32.partialorder %v778_v7, 0.0  ;;  %v887_v9 = vmul.f32 %v1498_v43, %v778_v7  ;;  %v1193_v10 = vpop.f32.mrb[24].mxu1 }
 0x1e3   :  { %v920_v11 = vsel %vm849_vm12, %v783_v4, %v888_v8  ;;  %v793_v12 = vadd.f32 %v1193_v10, %v1493_v36  ;;  %v787_v13 = vpop.f32.mrb[25].mxu1 }
 0x1e4   :  { %952 = vst.msk [vmem:[%s1699_s7 + $0xb8] sm:$0xff] %vm504_vm4, %v920_v11  ;;  %v919_v14 = vsel %vm848_vm13, %v778_v7, %v887_v9  ;;  %v788_v15 = vadd.f32 %v1493_v36, %v787_v13 }
 0x1e5   :  { %951 = vst.msk [vmem:[%s1699_s7 + $0xb0] sm:$0xff] %vm504_vm4, %v919_v14  ;;  %vm851_vm14 = vcmp.ge.f32.partialorder %v793_v12, 0.0  ;;  %v890_v16 = vmul.f32 %v1498_v43, %v793_v12 }
 0x1e6   :  { %vm850_vm15 = vcmp.ge.f32.partialorder %v788_v15, 0.0  ;;  %v889_v17 = vmul.f32 %v1498_v43, %v788_v15  ;;  %v1196_v18 = vpop.f32.mrb[26].mxu1 }
 0x1e7   :  { %v922_v19 = vsel %vm851_vm14, %v793_v12, %v890_v16  ;;  %v803_v20 = vadd.f32 %v1196_v18, %v1493_v36  ;;  %v797_v21 = vpop.f32.mrb[27].mxu1 }
 0x1e8   :  { %954 = vst.msk [vmem:[%s1699_s7 + $0xc8] sm:$0xff] %vm504_vm4, %v922_v19  ;;  %v921_v22 = vsel %vm850_vm15, %v788_v15, %v889_v17  ;;  %v798_v23 = vadd.f32 %v1493_v36, %v797_v21 }
 0x1e9   :  { %953 = vst.msk [vmem:[%s1699_s7 + $0xc0] sm:$0xff] %vm504_vm4, %v921_v22  ;;  %vm853_vm0 = vcmp.ge.f32.partialorder %v803_v20, 0.0  ;;  %v892_v24 = vmul.f32 %v1498_v43, %v803_v20 }
 0x1ea   :  { %vm852_vm1 = vcmp.ge.f32.partialorder %v798_v23, 0.0  ;;  %v891_v25 = vmul.f32 %v1498_v43, %v798_v23  ;;  %v1199_v26 = vpop.f32.mrb[28].mxu1 }
 0x1eb   :  { %v924_v27 = vsel %vm853_vm0, %v803_v20, %v892_v24  ;;  %v813_v28 = vadd.f32 %v1199_v26, %v1493_v36  ;;  %v807_v29 = vpop.f32.mrb[29].mxu1 }
 0x1ec   :  { %956 = vst.msk [vmem:[%s1699_s7 + $0xd8] sm:$0xff] %vm504_vm4, %v924_v27  ;;  %v923_v30 = vsel %vm852_vm1, %v798_v23, %v891_v25  ;;  %v808_v31 = vadd.f32 %v1493_v36, %v807_v29 }
 0x1ed   :  { %955 = vst.msk [vmem:[%s1699_s7 + $0xd0] sm:$0xff] %vm504_vm4, %v923_v30  ;;  %vm855_vm2 = vcmp.ge.f32.partialorder %v813_v28, 0.0  ;;  %v894_v32 = vmul.f32 %v1498_v43, %v813_v28 }
 0x1ee   :  { %vm854_vm3 = vcmp.ge.f32.partialorder %v808_v31, 0.0  ;;  %v893_v33 = vmul.f32 %v1498_v43, %v808_v31  ;;  %v1202_v34 = vpop.f32.mrb[30].mxu1 }
 0x1ef   :  { %v926_v35 = vsel %vm855_vm2, %v813_v28, %v894_v32  ;;  %v823_v37 = vadd.f32 %v1202_v34, %v1493_v36  ;;  %v817_v39 = vpop.f32.mrb[31].mxu1 }
 0x1f0   :  { %958 = vst.msk [vmem:[%s1699_s7 + $0xe8] sm:$0xff] %vm504_vm4, %v926_v35  ;;  %v925_v40 = vsel %vm854_vm3, %v808_v31, %v893_v33  ;;  %v818_v41 = vadd.f32 %v1493_v36, %v817_v39 }
 0x1f1   :  { %957 = vst.msk [vmem:[%s1699_s7 + $0xe0] sm:$0xff] %vm504_vm4, %v925_v40  ;;  %vm857_vm5 = vcmp.ge.f32.partialorder %v823_v37, 0.0  ;;  %v896_v42 = vmul.f32 %v1498_v43, %v823_v37 }
 0x1f2   :  { %vm856_vm6 = vcmp.ge.f32.partialorder %v818_v41, 0.0  ;;  %v895_v38 = vmul.f32 %v1498_v43, %v818_v41 }
 0x1f3   :  { %v928_v44 = vsel %vm857_vm5, %v823_v37, %v896_v42 }
 0x1f4   :  { %960 = vst.msk [vmem:[%s1699_s7 + $0xf8] sm:$0xff] %vm504_vm4, %v928_v44  ;;  %v927_v45 = vsel %vm856_vm6, %v818_v41, %v895_v38 }
 0x1f5   :  { %959 = vst.msk [vmem:[%s1699_s7 + $0xf0] sm:$0xff] %vm504_vm4, %v927_v45 }

// kernel: hyper_semamba_forward.12
= control target key start
LH: loop header
LB: loop body
LE: loop exit
PB: predicated region body
PF: predicated region fallthrough
CT: control target
= control target key end

     0   :  { %v696_v3 = vmov 0.0   ;;  %v697_v4 = vmov 0   ;;  %vm82_vm0 = vcmask 130048   ;;  %v197_v28 = vlaneseq  ;;  %s938_s0 = inlined_call_operand.vmem [shape: f32[16,256], index: 0, kind: input, shape index: {}]   ;;  %s939_s2 = inlined_call_operand.vmem [shape: f32[16,1], index: 2, kind: input, shape index: {}]   ;;  %s940_s3 = inlined_call_operand.vmem [shape: f32[16,1], index: 3, kind: input, shape index: {}]   ;;  %s941_s5 = inlined_call_operand.<no memory space> [shape: f32[1,1], index: 5, kind: input, shape index: {}]   ;;  %s942_s10 = inlined_call_operand.<no memory space> [shape: f32[1,1], index: 10, kind: input, shape index: {}]   ;;  %s943_s12 = inlined_call_operand.<no memory space> [shape: f32[1,1], index: 12, kind: input, shape index: {}]   ;;  %s944_s14 = inlined_call_operand.<no memory space> [shape: f32[1,1], index: 14, kind: input, shape index: {}]   ;;  %s945_s1 = inlined_call_operand.vmem [shape: f32[16,16], index: 1, kind: input, shape index: {}]   ;;  %s946_s7 = inlined_call_operand.vmem [shape: f32[16,1], index: 7, kind: input, shape index: {}]   ;;  %s947_s8 = inlined_call_operand.vmem [shape: f32[16,1], index: 8, kind: input, shape index: {}]   ;;  %s948_s4 = inlined_call_operand.vmem [shape: f32[1,16], index: 4, kind: input, shape index: {}]   ;;  %s949_s6 = inlined_call_operand.vmem [shape: f32[16,16], index: 6, kind: input, shape index: {}]   ;;  %s950_s13 = inlined_call_operand.vmem [shape: f32[1,256], index: 13, kind: input, shape index: {}]   ;;  %s951_s9 = inlined_call_operand.vmem [shape: f32[1,16], index: 9, kind: input, shape index: {}]   ;;  %s952_s11 = inlined_call_operand.vmem [shape: f32[1,16], index: 11, kind: input, shape index: {}]   ;;  %s953_s15 = inlined_call_operand.vmem [shape: f32[1,256], index: 15, kind: input, shape index: {}]   ;;  %s954_s16 = inlined_call_operand.vmem [shape: f32[1,256], index: 16, kind: output, shape index: {0}]   ;;  %s955_s17 = inlined_call_operand.vmem [shape: f32[1,256], index: 17, kind: output, shape index: {1}]   ;;  %s956_s18 = inlined_call_operand.vmem [shape: f32[1,256], index: 18, kind: output, shape index: {2}]  }
   0x1   :  { %960 = sst [smem:[#allocation6_spill]] %s938_s0  ;;  %153 = vmatprep.mubr.f32.mxu0 %v696_v3  ;;  %690 = vset.pattern.permute.xlu0 %v697_v4  ;;  %v24_v5 = vstv %s941_s5  ;;  %v26_v8 = vstv %s942_s10  ;;  %v28_v12 = vstv %s943_s12  ;;  %v30_v13 = vstv %s944_s14 }
   0x2   :  { %961 = sst [smem:[#allocation7_spill]] %s939_s2  ;;  %s963_s29 = sld [smem:[#allocation6_spill]]  ;;  %691 = vset.pattern.permute.xlu1 %v697_v4  ;;  %25 = vst [vmem:[#allocation2] sm:$0x1] %v24_v5  ;;  %268 = vmatprep.mubr.f32.mxu1 %v696_v3  ;;  %27 = vst [vmem:[#allocation3] sm:$0x1] %v26_v8 }
   0x3   :  { %962 = sst [smem:[#allocation8_spill]] %s940_s3  ;;  %s964_s27 = sld [smem:[#allocation7_spill]]  ;;  %29 = vst [vmem:[#allocation4] sm:$0x1] %v28_v12  ;;  %v68_v14 = vld [vmem:[%s945_s1] sm:$0xff]  ;;  %v69_v17 = vld [vmem:[%s945_s1 + $0x8] sm:$0xff] }
   0x4   :  { %s965_s30 = sld [smem:[#allocation8_spill]]  ;;  %31 = vst [vmem:[#allocation5] sm:$0x1] %v30_v13  ;;  %v277_v18 = vld [vmem:[%s946_s7] sm:$0xff]  ;;  %v278_v19 = vld [vmem:[%s946_s7 + $0x8] sm:$0xff]  ;;  %v198_v30 = vshrl.u32 %v197_v28, 7 }
   0x5   :  { %v376_v20 = vld [vmem:[%s947_s8] sm:$0xff]  ;;  %v377_v21 = vld [vmem:[%s947_s8 + $0x8] sm:$0xff]  ;;  %v698_v60 = vmov 1966171168   ;;  %vm912_vm9 = vcmp.lt.s32.totalorder %v197_v28, 256 }
   0x6   :  { %v865_v32 = vsub.s32 0, %v198_v30  ;;  %v190_v55 = vld [vmem:[%s948_s4] sm:$0x1]  ;;  %v276_v57 = vld [vmem:[%s949_s6 + $0x8] sm:$0xff]  ;;  %v572_v61 = vunpack.c.l.s4 %v698_v60 }
   0x7   :  { %v275_v56 = vld [vmem:[%s949_s6] sm:$0xff] }
   0x8   :  { %v65_v0 = vld [vmem:[%s963_s29 + $0x8] sm:$0xff]  ;;  %v67_v1 = vld [vmem:[%s963_s29 + $0x18] sm:$0xff]  ;;  %v64_v2 = vld [vmem:[%s963_s29] sm:$0xff]  ;;  %v573_v62 = vunpack.c.0.s8 %v572_v61 }
   0x9   :  { %v807_v6 = vpack.c.bf16 %v67_v1, %v65_v0  ;;  %v66_v7 = vld [vmem:[%s963_s29 + $0x10] sm:$0xff]  ;;  %v70_v10 = vld [vmem:[%s964_s27] sm:$0xff]  ;;  %v71_v15 = vld [vmem:[%s964_s27 + $0x8] sm:$0xff] }
   0xa   :  { %v816_v9 = vpack.c.bf16 %v66_v7, %v64_v2  ;;  %v170_v11 = vld [vmem:[%s965_s30] sm:$0xff]  ;;  %74 = vperm.xlu0 %690, %v70_v10   ;;  %v171_v16 = vld [vmem:[%s965_s30 + $0x8] sm:$0xff]  ;;  %v887_v5 = vsub.s32 %v573_v62, %v198_v30 }
   0xb   :  { %668 = vmatprep.subr.bf16.mxu0 %v807_v6  ;;  %174 = vperm.xlu1 %691, %v170_v11   ;;  %v191_v22 = vld [vmem:[#allocation2] sm:$0x1]  ;;  %v397_v23 = vld [vmem:[#allocation3] sm:$0x1]  ;;  %v482_v24 = vld [vmem:[#allocation4] sm:$0x1] }
   0xc   :  { %670 = vmatpush1.bf16.msra.mxu0 %v816_v9  ;;  %v566_v25 = vld [vmem:[#allocation5] sm:$0x1]  ;;  %v567_v13 = vld [vmem:[%s950_s13] sm:$0x3] }
   0xe   :  { %79 = vperm.xlu0 %690, %v71_v15  }
   0xf   :  { %660 = vmatmul.mubr.msk.f32.vlgmr.msra.gmra.mrb[0].mxu0 %vm82_vm0, %v68_v14  ;;  %179 = vperm.xlu1 %691, %v171_v16  }
  0x10   :  { %159 = vmatprep.mubr.f32.mxu0 %v696_v3 }
  0x12   :  { %281 = vperm.xlu0 %690, %v277_v18  }
  0x13   :  { %661 = vmatmul.mubr.msk.f32.gmra.mrb[2].mxu0 %vm82_vm0, %v69_v17  ;;  %286 = vperm.xlu1 %691, %v278_v19  }
  0x14   :  { %474 = vmatprep.mubr.f32.mxu0 %v696_v3 }
  0x16   :  { %380 = vperm.xlu0 %690, %v376_v20  }
  0x17   :  { %385 = vperm.xlu1 %691, %v377_v21  }
  0x1a   :  { %194 = vperm.xlu0 %690, %v191_v22  }
  0x1b   :  { %400 = vperm.xlu1 %691, %v397_v23  }
  0x1e   :  { %485 = vperm.xlu0 %690, %v482_v24  }
  0x1f   :  { %595 = vperm.xlu1 %691, %v566_v25  }
  0x89   :  { %v75_v35 = vpop.permute.xlu0 %74 }
  0x8a   :  { %v175_v26 = vpop.permute.xlu1 %174 }
  0x8d   :  { %v80_v40 = vpop.permute.xlu0 %79 }
  0x8e   :  { %v180_v27 = vpop.permute.xlu1 %179 }
  0x91   :  { %v282_v58 = vpop.permute.xlu0 %281 }
  0x92   :  { %v860_v29 = vpop.permute.xlu1 %286 }
  0x95   :  { %v381_v59 = vpop.permute.xlu0 %380 }
  0x96   :  { %v863_v31 = vpop.permute.xlu1 %385 }
  0x99   :  { %v195_v63 = vpop.permute.xlu0 %194 }
  0x9a   :  { %v401_v33 = vpop.permute.xlu1 %400  ;;  %v200_v0 = vrot.slane %v195_v63, %v865_v32 }
  0x9b   :  { %v868_v34 = vrot.slane %v401_v33, %v865_v32 }
  0xe2   :  { %v155_v36 = vpop.f32.mrb[0].mxu0 }
  0xe3   :  { %v156_v37 = vadd.f32 %v155_v36, %v75_v35  ;;  %v157_v38 = vpop.f32.mrb[1].mxu0 }
  0xe4   :  { %v158_v39 = vadd.f32 %v157_v38, %v75_v35 }
  0xe5   :  { %v182_v42 = vmul.f32 %v175_v26, %v156_v37  ;;  %vm166_vm1 = vcmp.ge.f32.partialorder %v156_v37, 0.0 }
  0xe6   :  { %v161_v41 = vpop.f32.mrb[2].mxu0  ;;  %v183_v45 = vmul.f32 %v175_v26, %v158_v39  ;;  %vm167_vm2 = vcmp.ge.f32.partialorder %v158_v39, 0.0 }
  0xe7   :  { %v162_v43 = vadd.f32 %v161_v41, %v80_v40  ;;  %v163_v44 = vpop.f32.mrb[3].mxu0  ;;  %v186_v49 = vsel %vm166_vm1, %v156_v37, %v182_v42  ;;  %v603_v42 = vld [vmem:[%s953_s15] sm:$0x3] }
  0xe8   :  { %v164_v46 = vadd.f32 %v163_v44, %v80_v40  ;;  %v187_v51 = vsel %vm167_vm2, %v158_v39, %v183_v45  ;;  %v596_v39 = vpop.permute.xlu1 %595  ;;  %v486_v45 = vpop.permute.xlu0 %485 }
  0xe9   :  { %v184_v47 = vmul.f32 %v180_v27, %v162_v43  ;;  %vm168_vm3 = vcmp.ge.f32.partialorder %v162_v43, 0.0  ;;  %v601_v40 = vrot.slane %v596_v39, %v865_v32 }
  0xea   :  { %v185_v48 = vmul.f32 %v180_v27, %v164_v46  ;;  %vm169_vm4 = vcmp.ge.f32.partialorder %v164_v46, 0.0 }
  0xeb   :  { %v188_v50 = vsel %vm168_vm3, %v162_v43, %v184_v47 }
  0xec   :  { %v189_v52 = vsel %vm169_vm4, %v164_v46, %v185_v48  ;;  %v673_v53 = vpack.c.bf16 %v188_v50, %v186_v49  ;;  %v491_v50 = vrot.slane %v486_v45, %v865_v32 }
  0xed   :  { %v671_v54 = vpack.c.bf16 %v189_v52, %v187_v51 }
  0xef   :  { %672 = vmatprep.subr.bf16.mxu1 %v671_v54 }
  0xf0   :  { %674 = vmatpush1.bf16.msra.mxu1 %v673_v53 }
  0xf1   :  { %676 = vmatprep.subr.bf16.mxu1 %v807_v6 }
  0xf3   :  { %662 = vmatmul.mubr.msk.f32.vlgmr.msra.gmra.mrb[0].mxu1 %vm82_vm0, %v190_v55 }
  0xf4   :  { %678 = vmatpush1.bf16.msra.mxu1 %v816_v9  ;;  %359 = vmatprep.mubr.f32.mxu1 %v696_v3 }
  0xf7   :  { %663 = vmatmul.mubr.msk.f32.vlgmr.msra.gmra.mrb[2].mxu1 %vm82_vm0, %v275_v56 }
  0xf8   :  { %365 = vmatprep.mubr.f32.mxu1 %v696_v3 }
  0xfb   :  { %664 = vmatmul.mubr.msk.f32.gmra.mrb[4].mxu1 %vm82_vm0, %v276_v57 }
 0x1c6   :  { %v270_v1 = vpop.f32.mrb[0].mxu1 }
 0x1c7   :  { %v271_v2 = vadd.f32 %v270_v1, %v200_v0  ;;  %v272_v4 = vpop.f32.mrb[1].mxu1 }
 0x1c8   :  { %v273_v6 = vadd.f32 %v272_v4, %v200_v0 }
 0x1ca   :  { %v570_v7 = vcombine.low %v271_v2, %v273_v6  ;;  %v361_v8 = vpop.f32.mrb[2].mxu1 }
 0x1cb   :  { %v362_v9 = vadd.f32 %v361_v8, %v282_v58  ;;  %v363_v10 = vpop.f32.mrb[3].mxu1 }
 0x1cc   :  { %v577_v11 = vrot.slane %v570_v7, %v887_v5  ;;  %v364_v12 = vadd.f32 %v363_v10, %v282_v58 }
 0x1cd   :  { %v388_v16 = vmul.f32 %v381_v59, %v362_v9  ;;  %vm372_vm5 = vcmp.ge.f32.partialorder %v362_v9, 0.0 }
 0x1ce   :  { %v584_v14 = vrot.slane %v577_v11, %v887_v5  ;;  %v367_v15 = vpop.f32.mrb[4].mxu1  ;;  %v389_v20 = vmul.f32 %v381_v59, %v364_v12  ;;  %vm373_vm6 = vcmp.ge.f32.partialorder %v364_v12, 0.0 }
 0x1cf   :  { %v368_v17 = vadd.f32 %v367_v15, %v860_v29  ;;  %v369_v18 = vpop.f32.mrb[5].mxu1  ;;  %v392_v25 = vsel %vm372_vm5, %v362_v9, %v388_v16 }
 0x1d0   :  { %v586_v19 = vmul.f32 %v584_v14, %v567_v13  ;;  %v370_v21 = vadd.f32 %v369_v18, %v860_v29  ;;  %v393_v33 = vsel %vm373_vm6, %v364_v12, %v389_v20  ;;  %v396_v29 = vld [vmem:[%s951_s9] sm:$0x1] }
 0x1d1   :  { %vm374_vm7 = vcmp.ge.f32.partialorder %v368_v17, 0.0  ;;  %v390_v22 = vmul.f32 %v863_v31, %v368_v17 }
 0x1d2   :  { %v587_v23 = vsub.f32 0.0, %v586_v19  ;;  %vm375_vm8 = vcmp.ge.f32.partialorder %v370_v21, 0.0  ;;  %v391_v24 = vmul.f32 %v863_v31, %v370_v21  ;;  %v481_v31 = vld [vmem:[%s952_s11] sm:$0x1] }
 0x1d3   :  { %v394_v26 = vsel %vm374_vm7, %v368_v17, %v390_v22 }
 0x1d4   :  { %v588_v27 = vmul.f32 1.442695, %v587_v23  ;;  %v681_v30 = vpack.c.bf16 %v394_v26, %v392_v25  ;;  %v395_v35 = vsel %vm375_vm8, %v370_v21, %v391_v24 }
 0x1d5   :  { %v679_v36 = vpack.c.bf16 %v395_v35, %v393_v33 }
 0x1d6   :  { %692 = vpow2.f32 %v588_v27 }
 0x1d7   :  { %680 = vmatprep.subr.bf16.mxu0 %v679_v36 }
 0x1d8   :  { %682 = vmatpush1.bf16.msra.mxu0 %v681_v30 }
 0x1d9   :  { %684 = vmatprep.subr.bf16.mxu0 %v679_v36 }
 0x1db   :  { %665 = vmatmul.mubr.msk.f32.vlgmr.msra.gmra.mrb[4].mxu0 %vm82_vm0, %v396_v29 }
 0x1dc   :  { %686 = vmatpush1.bf16.msra.mxu0 %v681_v30  ;;  %559 = vmatprep.mubr.f32.mxu0 %v696_v3 }
 0x1df   :  { %666 = vmatmul.mubr.msk.f32.vlgmr.msra.gmra.mrb[6].mxu0 %vm82_vm0, %v481_v31 }
 0x1e0   :  { %v693_v37 = vpop.eup %692 }
 0x1e1   :  { %v590_v38 = vadd.f32 1.0, %v693_v37 }
 0x1e3   :  { %694 = vrcp.f32 %v590_v38 }
 0x1ed   :  { %v695_v41 = vpop.eup %694 }
 0x1ee   :  { %v602_v43 = vmul.f32 %v695_v41, %v601_v40 }
 0x1f0   :  { %v604_v44 = vmul.f32 %v603_v42, %v602_v43 }
 0x1f2   :  { %609 = vst.msk [vmem:[%s954_s16] sm:$0x3] %vm912_vm9, %v604_v44 }
 0x2ae   :  { %v476_v46 = vpop.f32.mrb[4].mxu0 }
 0x2af   :  { %v477_v47 = vadd.f32 %v476_v46, %v868_v34  ;;  %v478_v48 = vpop.f32.mrb[5].mxu0 }
 0x2b0   :  { %v479_v49 = vadd.f32 %v478_v48, %v868_v34 }
 0x2b2   :  { %v612_v28 = vcombine.low %v477_v47, %v479_v49  ;;  %v561_v51 = vpop.f32.mrb[6].mxu0 }
 0x2b3   :  { %v562_v52 = vadd.f32 %v561_v51, %v491_v50  ;;  %v563_v53 = vpop.f32.mrb[7].mxu0 }
 0x2b4   :  { %v619_v54 = vrot.slane %v612_v28, %v887_v5  ;;  %v564_v55 = vadd.f32 %v563_v53, %v491_v50 }
 0x2b6   :  { %v626_v56 = vrot.slane %v619_v54, %v887_v5  ;;  %v631_v57 = vcombine.low %v562_v52, %v564_v55 }
 0x2b8   :  { %628 = vst.msk [vmem:[%s955_s17] sm:$0x3] %vm912_vm9, %v626_v56  ;;  %v638_v34 = vrot.slane %v631_v57, %v887_v5 }
 0x2ba   :  { %v645_v32 = vrot.slane %v638_v34, %v887_v5 }
 0x2bc   :  { %647 = vst.msk [vmem:[%s956_s18] sm:$0x3] %vm912_vm9, %v645_v32 }

// kernel: hyper_semamba_forward.8
= control target key start
LH: loop header
LB: loop body
LE: loop exit
PB: predicated region body
PF: predicated region fallthrough
CT: control target
= control target key end

     0   :  { %s2610_s24 = smov 0   ;;  %s2902_s0 = inlined_call_operand.vmem [shape: f32[32,8,16], index: 0, kind: input, shape index: {}]   ;;  %s2903_s1 = inlined_call_operand.vmem [shape: f32[16,32], index: 1, kind: input, shape index: {}]   ;;  %s2904_s2 = inlined_call_operand.vmem [shape: f32[16,32], index: 2, kind: input, shape index: {}]   ;;  %s2905_s3 = inlined_call_operand.vmem [shape: f32[1,32], index: 3, kind: input, shape index: {}]   ;;  %s2906_s4 = inlined_call_operand.vmem [shape: f32[1,32], index: 4, kind: input, shape index: {}]   ;;  %s2907_s5 = inlined_call_operand.vmem [shape: f32[4,32], index: 5, kind: input, shape index: {}]   ;;  %s2908_s6 = inlined_call_operand.vmem [shape: f32[1,32], index: 6, kind: input, shape index: {}]   ;;  %s2909_s7 = inlined_call_operand.vmem [shape: f32[32,8], index: 7, kind: input, shape index: {}]   ;;  %s2910_s8 = inlined_call_operand.vmem [shape: f32[1,8], index: 8, kind: input, shape index: {}]   ;;  %s2911_s9 = inlined_call_operand.vmem [shape: f32[32,8], index: 9, kind: input, shape index: {}]   ;;  %s2912_s10 = inlined_call_operand.vmem [shape: f32[1,8], index: 10, kind: input, shape index: {}]   ;;  %s2913_s11 = inlined_call_operand.vmem [shape: f32[32,32], index: 11, kind: input, shape index: {}]   ;;  %s2914_s12 = inlined_call_operand.vmem [shape: f32[1,32], index: 12, kind: input, shape index: {}]   ;;  %s2915_s13 = inlined_call_operand.vmem [shape: f32[8,32], index: 13, kind: input, shape index: {}]   ;;  %s2916_s14 = inlined_call_operand.vmem [shape: f32[1,32], index: 14, kind: input, shape index: {}]   ;;  %s2917_s15 = inlined_call_operand.vmem [shape: f32[32,16], index: 15, kind: input, shape index: {}]   ;;  %s2918_s16 = inlined_call_operand.vmem [shape: f32[1,16], index: 16, kind: input, shape index: {}]   ;;  %s2919_s17 = inlined_call_operand.vmem [shape: f32[32,8,16], index: 17, kind: output, shape index: {}]  }
   0x1   :  { %2921 = sst [smem:[#allocation2_spill]] %s2902_s0 }
   0x2   :  { %2922 = sst [smem:[#allocation3_spill]] %s2903_s1 }
   0x3 LB: > { %s2213_s25 = sadd.s32 4294967295, %s2507_s24   ;;  %p2217_p0 = scmp.ge.s32.totalorder %s2507_s24, 1  ;;  %s2507_s24 = sphi %s2610_s24, %s27_s24  }
   0x4   : > { %p486_p1 = scmp.lt.s32.totalorder %s2507_s24, 33 }
   0x6   : > { %p487_p2 = pnand %p2217_p0, %p486_p1 }
   0x7   : > { %s2923_s28 = sld [smem:[#allocation3_spill]] (!%p487_p2)  ;;  %p536_p3 = scmp.lt.s32.totalorder (!%p487_p2), %s2213_s25, 31  ;;  %v2509_v2 = vmov (!%p487_p2), 0.0|0.0   ;;  %vm2510_vm0 = vmmov (!%p487_p2), 0   ;;  %v2511_v4 = vmov (!%p487_p2), 0.0   ;;  %v628_v5 = vld [vmem:[%s2904_s2] sm:$0xff] (!%p487_p2)  ;;  %v714_v9 = vlaneseq (!%p487_p2) }
   0x8   : > { %490 = sbr.rel (%p487_p2) target bundleno = 1430 (0x596), region = 88  ;;  %2415 = vmatprep.subr.bf16.mxu0 (!%p487_p2), %v2509_v2  ;;  %2306 = vmatprep.mubr.msk.f32.mxu0 (!%p487_p2), %vm2510_vm0, %v2511_v4  ;;  %v629_v6 = vld [vmem:[%s2904_s2 + $0x8] sm:$0xff] (!%p487_p2)  ;;  %vm554_vm1 = vcmask (!%p487_p2), 130048   ;;  %s2924_s23 = sld [smem:[#allocation2_spill]] (!%p487_p2)  ;;  %v2220_v14 = vld [vmem:[%s2905_s3] ss:$0 sm:$0xff] (!%p487_p2) }
   0x9   : > { %2418 = vmatprep.subr.bf16.mxu1 (!%p487_p2), %v2509_v2  ;;  %v2419_v7 = vpack.c.bf16 (!%p487_p2), %v629_v6, %v628_v5  ;;  %2313 = vmatprep.mubr.msk.f32.mxu1 (!%p487_p2), %vm2510_vm0, %v2511_v4  ;;  %v2656_v10 = vshrl.u32 (!%p487_p2), %v714_v9, 7  ;;  %v717_v11 = vand.u32 (!%p487_p2), 127, %v714_v9  ;;  %vm727_vm4 = vcmask (!%p487_p2), 64512   ;;  %v989_v24 = vld [vmem:[%s2909_s7] sm:$0xff] (!%p487_p2)  ;;  %v990_v25 = vld [vmem:[%s2909_s7 + $0x8] sm:$0xff] (!%p487_p2)  ;;  %v991_v30 = vld [vmem:[%s2909_s7 + $0x10] sm:$0xff] (!%p487_p2) }
   0xa   : > { %v2422_v26 = vpack.c.bf16 (!%p487_p2), %v990_v25, %v989_v24  ;;  %v1074_v27 = vld [vmem:[%s2911_s9] sm:$0xff] (!%p487_p2)  ;;  %v1075_v28 = vld [vmem:[%s2911_s9 + $0x8] sm:$0xff] (!%p487_p2)  ;;  %v992_v31 = vld [vmem:[%s2909_s7 + $0x18] sm:$0xff] (!%p487_p2)  ;;  %vm1000_vm6 = vcmask (!%p487_p2), 261120   ;;  %v2512_v5 = vmov (!%p487_p2), 1   ;;  %v2519_v24 = vmov (!%p487_p2), 6  }
   0xb   : > { %2420 = vmatpush3.bf16.msra.mxu1 (!%p487_p2), %v2419_v7  ;;  %v2225_v12 = vadd.s32 (!%p487_p2), 4294967293, %v2656_v10  ;;  %v2228_v13 = vadd.s32 (!%p487_p2), 4294967294, %v2656_v10  ;;  %v2231_v15 = vadd.s32 (!%p487_p2), 4294967295, %v2656_v10  ;;  %v2428_v29 = vpack.c.bf16 (!%p487_p2), %v1075_v28, %v1074_v27  ;;  %v1076_v33 = vld [vmem:[%s2911_s9 + $0x10] sm:$0xff] (!%p487_p2)  ;;  %v1077_v34 = vld [vmem:[%s2911_s9 + $0x18] sm:$0xff] (!%p487_p2)  ;;  %v1155_v59 = vld [vmem:[%s2913_s11] sm:$0xff] (!%p487_p2)  ;;  %2465 = vset.pattern.permute.xlu1 (!%p487_p2), %v2512_v5 }
   0xc   : > { %2321 = vmatprep.subr.mxu1 (!%p487_p2), %v2511_v4  ;;  %v2425_v32 = vpack.c.bf16 (!%p487_p2), %v992_v31, %v991_v30  ;;  %v2431_v35 = vpack.c.bf16 (!%p487_p2), %v1077_v34, %v1076_v33  ;;  %v2224_v36 = vld [vmem:[%s2907_s5 + $0x3] ss:$0 sm:$0xff] (!%p487_p2)  ;;  %v2227_v37 = vld [vmem:[%s2907_s5] ss:$0 sm:$0xff] (!%p487_p2)  ;;  %v2230_v38 = vld [vmem:[%s2907_s5 + $0x1] ss:$0 sm:$0xff] (!%p487_p2) }
   0xd   : > { %v545_v0 = vld [vmem:[%s2923_s28] sm:$0xff] (!%p487_p2)  ;;  %v546_v1 = vld [vmem:[%s2923_s28 + $0x8] sm:$0xff] (!%p487_p2)  ;;  %vm725_vm2 = vcmp.eq.s32.totalorder (!%p487_p2), %v717_v11, %v2225_v12  ;;  %vm809_vm3 = vcmp.eq.s32.totalorder (!%p487_p2), %v717_v11, %v2228_v13  ;;  %vm892_vm5 = vcmp.eq.s32.totalorder (!%p487_p2), %v717_v11, %v2231_v15  ;;  %vm1371_vm7 = vcmp.eq.s32.totalorder (!%p487_p2), %v2656_v10, 0 }
   0xe   : > { %v2416_v3 = vpack.c.bf16 (!%p487_p2), %v546_v1, %v545_v0  ;;  %v726_v20 = vsel (!%p487_p2), %vm725_vm2, 1.0, %v2511_v4  ;;  %v810_v22 = vsel (!%p487_p2), %vm809_vm3, 1.0, %v2511_v4  ;;  %v893_v23 = vsel (!%p487_p2), %vm892_vm5, 1.0, %v2511_v4  ;;  %v2233_v46 = vld [vmem:[%s2907_s5 + $0x2] ss:$0 sm:$0xff] (!%p487_p2)  ;;  %v1156_v60 = vld [vmem:[%s2913_s11 + $0x8] sm:$0xff] (!%p487_p2) }
   0xf   : > { %s2926_s25 = smov (!%p536_p3, %s2213_s25), 31  ;;  %v2234_v52 = vld [vmem:[%s2908_s6] ss:$0 sm:$0xff]  ;;  %v2434_v62 = vpack.c.bf16 %v1156_v60, %v1155_v59  ;;  %v1157_v0 = vld [vmem:[%s2913_s11 + $0x10] sm:$0xff]  ;;  %v1158_v1 = vld [vmem:[%s2913_s11 + $0x18] sm:$0xff]  ;;  %vm1469_vm8 = vcmp.eq.s32.totalorder %v2656_v10, 1 }
  0x10   : > { %2417 = vmatpush3.bf16.msra.mxu0 %v2416_v3  ;;  %s2218_s20 = sshll.u32 %s2926_s25, 3  ;;  %v2437_v3 = vpack.c.bf16 %v1158_v1, %v1157_v0  ;;  %v2235_v6 = vld [vmem:[%s2910_s8] ss:$0 sm:$0xff]  ;;  %vm1567_vm9 = vcmp.eq.s32.totalorder %v2656_v10, 2  ;;  %vm1665_vm10 = vcmp.eq.s32.totalorder %v2656_v10, 3  ;;  %vm1763_vm11 = vcmp.eq.s32.totalorder %v2656_v10, 4 }
  0x11   : > { %2316 = vmatprep.subr.mxu0 %v2511_v4  ;;  %s539_s26 = scalar_lea.vmem %s2924_s23, %s2218_s20  ;;  %v2239_v25 = vld [vmem:[%s2914_s12] ss:$0 sm:$0xff]  ;;  %vm1861_vm12 = vcmp.eq.s32.totalorder %v2656_v10, 5  ;;  %vm1959_vm13 = vcmp.eq.s32.totalorder %v2656_v10, 6  ;;  %vm2057_vm14 = vcmp.eq.s32.totalorder %v2656_v10, 7  ;;  %s543_s19 = scalar_lea.vmem %s2919_s17, %s2218_s20 }
  0x12   : > { %v2646_v8 = vld [vmem:[%s539_s26] sm:$0xff] }
  0x13   : > { %2307 = vmatmul.mubr.msk.f32.vlgmr.msra.gmra.mrb[0].mxu0 %vm554_vm1, %v2646_v8  ;;  %2314 = vmatmul.mubr.msk.f32.vlgmr.msra.gmra.mrb[0].mxu1 %vm554_vm1, %v2646_v8  ;;  %v2237_v1 = vld [vmem:[%s2912_s10] ss:$0 sm:$0xff] }
  0x14   : > { %2318 = vmatprep.mubr.msk.f32.mxu0 %vm2510_vm0, %v2511_v4  ;;  %2323 = vmatprep.mubr.msk.f32.mxu1 %vm2510_vm0, %v2511_v4 }
  0xe6   : > { %v624_v16 = vpop.f32.mrb[0].mxu0  ;;  %v2664_v17 = vpop.f32.mrb[0].mxu1 }
  0xe7   : > { %v625_v18 = vadd.f32 %v2220_v14, %v624_v16  ;;  %v2308_v19 = vpop.f32.mrb[1].mxu0  ;;  %v2315_v21 = vpop.f32.mrb[1].mxu1  ;;  %v2513_v16 = vmov 0  }
  0xe8   : > { %v2514_v19 = vmov 2   ;;  %v2516_v21 = vmov 3  }
  0xe9   : > { %2317 = vmatpush3.msra.mxu0 %v625_v18  ;;  %2322 = vmatpush3.msra.mxu1 %v625_v18  ;;  %v723_v40 = vmul.f32 %v2224_v36, %v625_v18  ;;  %v2761_v36 = vsub.s32 0, %v2656_v10 }
  0xea   : > { %2319 = vmatmul.mubr.msk.f32.vlgmr.msra.gmra.mrb[2].mxu0 %vm727_vm4, %v726_v20  ;;  %2326 = vmatprep.subr.mxu0 %v2511_v4  ;;  %v2515_v20 = vmov 7  }
  0xeb   : > { %2324 = vmatmul.mubr.msk.f32.vlgmr.msra.gmra.mrb[2].mxu1 %vm727_vm4, %v810_v22  ;;  %2327 = vmatpush3.msra.mxu0 %v625_v18  ;;  %v2517_v22 = vmov 4  }
  0xec   : > { %2328 = vmatprep.mubr.msk.f32.mxu0 %vm2510_vm0, %v2511_v4  ;;  %2421 = vmatprep.subr.bf16.mxu1 %v2509_v2 }
  0xed   : > { %2427 = vmatprep.subr.bf16.mxu0 %v2509_v2  ;;  %2339 = vmatprep.mubr.msk.f32.mxu1 %vm2510_vm0, %v2511_v4 }
  0xee   : > { %2329 = vmatmul.mubr.msk.f32.vlgmr.msra.gmra.mrb[4].mxu0 %vm727_vm4, %v893_v23  ;;  %2423 = vmatpush3.bf16.msra.mxu1 %v2422_v26  ;;  %v2518_v23 = vmov 5  }
  0xef   : > { %2350 = vmatprep.mubr.msk.f32.mxu0 %vm2510_vm0, %v2511_v4  ;;  %2429 = vmatpush3.bf16.msra.mxu0 %v2428_v29 }
  0xf0   : > { %2424 = vmatprep.subr.bf16.mxu1 %v2509_v2  ;;  %2430 = vmatprep.subr.bf16.mxu0 %v2509_v2 }
  0xf2   : > { %2426 = vmatpush3.bf16.msra.mxu1 %v2425_v32 }
  0xf3   : > { %2432 = vmatpush3.bf16.msra.mxu0 %v2431_v35  ;;  %2433 = vmatprep.subr.bf16.mxu1 %v2509_v2 }
  0xf4   : > { %2364 = vmatprep.subr.mxu0 %v2511_v4 }
 0x1bd   : > { %v797_v39 = vpop.f32.mrb[2].mxu0 }
 0x1be   : > { %v806_v41 = vmul.f32 %v2227_v37, %v797_v39  ;;  %v2320_v42 = vpop.f32.mrb[3].mxu0  ;;  %v880_v43 = vpop.f32.mrb[2].mxu1  ;;  %v1380_v39 = vsub.s32 1, %v2656_v10 }
 0x1bf   : > { %v889_v44 = vmul.f32 %v2230_v38, %v880_v43  ;;  %v2325_v45 = vpop.f32.mrb[3].mxu1  ;;  %v2767_v38 = vld [vmem:[%s2915_s13] sm:$0xff]  ;;  %v1478_v42 = vsub.s32 2, %v2656_v10 }
 0x1c0   : > { %v807_v47 = vadd.f32 %v806_v41, %v723_v40 }
 0x1c1   : > { %v963_v48 = vpop.f32.mrb[4].mxu0 }
 0x1c2   : > { %v890_v49 = vadd.f32 %v889_v44, %v807_v47  ;;  %v972_v50 = vmul.f32 %v2233_v46, %v963_v48  ;;  %v2330_v51 = vpop.f32.mrb[5].mxu0  ;;  %v1576_v46 = vsub.s32 3, %v2656_v10 }
 0x1c3   : > { %v1772_v51 = vsub.s32 5, %v2656_v10 }
 0x1c4   : > { %v973_v53 = vadd.f32 %v972_v50, %v890_v49  ;;  %v1674_v50 = vsub.s32 4, %v2656_v10 }
 0x1c6   : > { %v981_v54 = vadd.f32 %v2234_v52, %v973_v53 }
 0x1c8   : > { %v982_v55 = vsub.f32 0.0, %v981_v54 }
 0x1ca   : > { %v983_v56 = vmul.f32 1.442695, %v982_v55 }
 0x1cc   : > { %2473 = vpow2.f32 %v983_v56  ;;  %v1870_v56 = vsub.s32 6, %v2656_v10 }
 0x1d6   : > { %v2474_v57 = vpop.eup %2473 }
 0x1d7   : > { %v985_v58 = vadd.f32 1.0, %v2474_v57 }
 0x1d9   : > { %2475 = vrcp.f32 %v985_v58 }
 0x1e3   : > { %v2476_v61 = vpop.eup %2475 }
 0x1e4   : > { %v2730_v63 = vmul.f32 %v2476_v61, %v981_v54 }
 0x1e6   : > { %2340 = vmatmul.mubr.msk.f32.vlgmr.msra.gmra.mrb[4].mxu1 %vm1000_vm6, %v2730_v63  ;;  %2351 = vmatmul.mubr.msk.f32.vlgmr.msra.gmra.mrb[6].mxu0 %vm1000_vm6, %v2730_v63 }
 0x1e7   : > { %2435 = vmatpush3.bf16.msra.mxu1 %v2434_v62  ;;  %2361 = vmatprep.mubr.msk.f32.mxu1 %vm2510_vm0, %v2511_v4 }
 0x1e8   : > { %2436 = vmatprep.subr.bf16.mxu1 %v2509_v2  ;;  %2366 = vmatprep.mubr.msk.f32.mxu0 %vm2510_vm0, %v2511_v4 }
 0x1eb   : > { %2438 = vmatpush3.bf16.msra.mxu1 %v2437_v3 }
 0x1ec   : > { %2374 = vmatprep.subr.mxu1 %v2511_v4 }
 0x1ee   : > { %2362 = vmatmul.mubr.msk.f32.vlgmr.msra.gmra.mrb[6].mxu1 %vm1000_vm6, %v2730_v63 }
 0x1ef   : > { %2376 = vmatprep.mubr.msk.f32.mxu1 %vm2510_vm0, %v2511_v4 }
 0x2b9   : > { %v1070_v7 = vpop.f32.mrb[4].mxu1  ;;  %v2755_v9 = vpop.f32.mrb[6].mxu0 }
 0x2ba   : > { %v2341_v11 = vpop.f32.mrb[5].mxu1  ;;  %v2352_v12 = vpop.f32.mrb[7].mxu0  ;;  %v1071_v13 = vadd.f32 %v2235_v6, %v1070_v7 }
 0x2bc   : > { %1246 = vxpose.xlu0.b32.start.end [1/1] (short) (narrow) %v1071_v13, 8 }
 0x2c1   : > { %v1232_v14 = vpop.f32.mrb[6].mxu1 }
 0x2c2   : > { %v2363_v15 = vpop.f32.mrb[7].mxu1  ;;  %v1233_v26 = vadd.f32 %v2239_v25, %v1232_v14  ;;  %v1968_v14 = vsub.s32 7, %v2656_v10  ;;  %v2250_v10 = vld [vmem:[%s2918_s16] ss:$0 sm:$0xff] }
 0x2c4   : > { %v1237_v27 = vand.u32 2147483647, %v1233_v26  ;;  %v1236_v34 = vmax.f32 %v1233_v26, 0.0 }
 0x2c6   : > { %v1238_v28 = vsub.f32 0.0, %v1237_v27 }
 0x2c8   : > { %v1239_v29 = vmul.f32 1.442695, %v1238_v28 }
 0x2ca   : > { %2477 = vpow2.f32 %v1239_v29 }
 0x2d4   : > { %v2478_v30 = vpop.eup %2477 }
 0x2d5   : > { %v1241_v31 = vadd.f32 1.0, %v2478_v30 }
 0x2d7   : > { %2479 = vlog2.f32 %v1241_v31 }
 0x2e1   : > { %v2480_v32 = vpop.eup %2479 }
 0x2e2   : > { %v1243_v33 = vmul.f32 0.6931472, %v2480_v32 }
 0x2e4   : > { %v1244_v35 = vadd.f32 %v1243_v33, %v1236_v34 }
 0x2e5   : > { %2464 = vset.pattern.permute.xlu0 %v2513_v16  ;;  %v2796_v16 = vadd.f32 %v2237_v1, %v2755_v9 }
 0x2e6   : > { %v1282_v37 = vrot.slane %v1244_v35, %v2761_v36  ;;  %v1381_v41 = vrot.slane %v1244_v35, %v1380_v39  ;;  %v1479_v45 = vrot.slane %v1244_v35, %v1478_v42  ;;  %v1577_v49 = vrot.slane %v1244_v35, %v1576_v46 }
 0x2e7   : > { %v1675_v54 = vrot.slane %v1244_v35, %v1674_v50  ;;  %v2779_v55 = vmul.f32 %v1244_v35, %v2730_v63  ;;  %v1773_v60 = vrot.slane %v1244_v35, %v1772_v51  ;;  %v1871_v11 = vrot.slane %v1244_v35, %v1870_v56 }
 0x2e8   : > { %v1283_v40 = vmul.f32 %v1282_v37, %v2767_v38  ;;  %v1382_v44 = vmul.f32 %v1381_v41, %v2767_v38  ;;  %v1480_v48 = vmul.f32 %v1479_v45, %v2767_v38  ;;  %v1578_v53 = vmul.f32 %v1577_v49, %v2767_v38 }
 0x2e9   : > { %v1676_v59 = vmul.f32 %v1675_v54, %v2767_v38  ;;  %v1290_v61 = vrot.slane %v2779_v55, %v2761_v36  ;;  %v1774_v7 = vmul.f32 %v1773_v60, %v2767_v38  ;;  %v1389_v12 = vrot.slane %v2779_v55, %v1380_v39 }
 0x2ea   : > { %v1284_v43 = vmul.f32 1.442695, %v1283_v40  ;;  %v1383_v47 = vmul.f32 1.442695, %v1382_v44  ;;  %v1481_v52 = vmul.f32 1.442695, %v1480_v48  ;;  %v1969_v9 = vrot.slane %v1244_v35, %v1968_v14 }
 0x2eb   : > { %v1579_v58 = vmul.f32 1.442695, %v1578_v53  ;;  %v1677_v6 = vmul.f32 1.442695, %v1676_v59  ;;  %v1396_v26 = vrot.slane %v2796_v16, 1  ;;  %v1585_v32 = vrot.slane %v2779_v55, %v1576_v46 }
 0x2ec   : > { %2481 = vpow2.f32 %v1284_v43  ;;  %v1970_v33 = vmul.f32 %v1969_v9, %v2767_v38  ;;  %v1494_v35 = vrot.slane %v2796_v16, 2  ;;  %v1683_v40 = vrot.slane %v2779_v55, %v1674_v50 }
 0x2ed   : > { %2483 = vpow2.f32 %v1383_v47  ;;  %v1592_v45 = vrot.slane %v2796_v16, 3  ;;  %v1781_v48 = vrot.slane %v2779_v55, %v1772_v51  ;;  %v1788_v59 = vrot.slane %v2796_v16, 5 }
 0x2ee   : > { %2485 = vpow2.f32 %v1481_v52  ;;  %v1971_v43 = vmul.f32 1.442695, %v1970_v33  ;;  %v1690_v52 = vrot.slane %v2796_v16, 4 }
 0x2ef   : > { %2487 = vpow2.f32 %v1579_v58  ;;  %v1879_v58 = vrot.slane %v2779_v55, %v1870_v56  ;;  %v1886_v56 = vrot.slane %v2796_v16, 6 }
 0x2f0   : > { %2489 = vpow2.f32 %v1677_v6 }
 0x2f6   : > { %v2482_v57 = vpop.eup %2481 }
 0x2f7   : > { %v1286_v3 = vmul.f32 0.0, %v2482_v57  ;;  %v2484_v15 = vpop.eup %2483 }
 0x2f8   : > { %v2486_v25 = vpop.eup %2485 }
 0x2f9   : > { %v2488_v34 = vpop.eup %2487 }
 0x33c   : > { %v1262_v18 = vpop.trf.xlu0 }
 0x33d   : > { %1391 = vperm.xlu1 %2465, %v1262_v18   ;;  %1293 = vperm.xlu0 %2464, %v1262_v18  }
 0x341   : > { %2466 = vset.pattern.permute.xlu1 %v2514_v19  ;;  %2472 = vset.pattern.permute.xlu0 %v2515_v20 }
 0x342   : > { %1489 = vperm.xlu1 %2466, %v1262_v18  }
 0x346   : > { %2467 = vset.pattern.permute.xlu1 %v2516_v21  ;;  %v1775_v21 = vmul.f32 1.442695, %v1774_v7 }
 0x347   : > { %1587 = vperm.xlu1 %2467, %v1262_v18  }
 0x348   : > { %2491 = vpow2.f32 %v1775_v21 }
 0x34b   : > { %2468 = vset.pattern.permute.xlu1 %v2517_v22  ;;  %v1872_v22 = vmul.f32 %v1871_v11, %v2767_v38  ;;  %v2490_v38 = vpop.eup %2489 }
 0x34c   : > { %1685 = vperm.xlu1 %2468, %v1262_v18  }
 0x34d   : > { %v1873_v30 = vmul.f32 1.442695, %v1872_v22 }
 0x34f   : > { %2493 = vpow2.f32 %v1873_v30 }
 0x350   : > { %2469 = vset.pattern.permute.xlu1 %v2518_v23  ;;  %2495 = vpow2.f32 %v1971_v43 }
 0x351   : > { %1783 = vperm.xlu1 %2469, %v1262_v18  }
 0x352   : > { %v2492_v49 = vpop.eup %2491 }
 0x355   : > { %2470 = vset.pattern.permute.xlu1 %v2519_v24  ;;  %v1487_v24 = vrot.slane %v2779_v55, %v1478_v42 }
 0x356   : > { %1881 = vperm.xlu1 %2470, %v1262_v18  }
 0x359   : > { %v2494_v51 = vpop.eup %2493 }
 0x35a   : > { %2471 = vset.pattern.permute.xlu1 %v2515_v20  ;;  %v2496_v1 = vpop.eup %2495 }
 0x35b   : > { %1979 = vperm.xlu1 %2471, %v1262_v18  }
 0x3bc   : > { %v1392_v62 = vpop.permute.xlu1 %1391  ;;  %v1294_v0 = vpop.permute.xlu0 %1293 }
 0x3bd   : > { %v1296_v5 = vmul.f32 %v1294_v0, %v1290_v61  ;;  %v1394_v18 = vmul.f32 %v1392_v62, %v1389_v12  ;;  %v1984_v12 = vrot.slane %v2796_v16, 7 }
 0x3bf   : > { %v1297_v13 = vadd.f32 %v1296_v5, %v1286_v3  ;;  %v1977_v3 = vrot.slane %v2779_v55, %v1968_v14  ;;  %v2074_v55 = vld [vmem:[%s2917_s15] sm:$0xff]  ;;  %v2076_v14 = vld [vmem:[%s2917_s15 + $0x10] sm:$0xff] }
 0x3c1   : > { %v1385_v19 = vmul.f32 %v2484_v15, %v1297_v13  ;;  %v1490_v20 = vpop.permute.xlu1 %1489  ;;  %2365 = vmatpush3.msra.mxu0 %v1297_v13  ;;  %v2075_v13 = vld [vmem:[%s2917_s15 + $0x8] sm:$0xff] }
 0x3c2   : > { %2367 = vmatmul.mubr.msk.f32.vlgmr.msra.gmra.mrb[8].mxu0 %vm727_vm4, %v2796_v16  ;;  %2369 = vmatprep.subr.mxu0 %v2511_v4  ;;  %v1492_v28 = vmul.f32 %v1490_v20, %v1487_v24  ;;  %v2440_v15 = vpack.c.bf16 %v2075_v13, %v2074_v55 }
 0x3c3   : > { %v1395_v23 = vadd.f32 %v1394_v18, %v1385_v19  ;;  %2371 = vmatprep.mubr.msk.f32.mxu0 %vm2510_vm0, %v2511_v4  ;;  %v2222_v18 = vld [vmem:[%s2906_s4] ss:$0 sm:$0xff] }
 0x3c4   : > { %v704_v19 = vadd.f32 %v2222_v18, %v2664_v17 }
 0x3c5   : > { %v1483_v27 = vmul.f32 %v2486_v25, %v1395_v23  ;;  %2370 = vmatpush3.msra.mxu0 %v1395_v23 }
 0x3c6   : > { %v1588_v29 = vpop.permute.xlu1 %1587  ;;  %2372 = vmatmul.mubr.msk.f32.vlgmr.msra.gmra.mrb[10].mxu0 %vm727_vm4, %v1396_v26  ;;  %2379 = vmatprep.subr.mxu0 %v2511_v4  ;;  %v707_v20 = vsub.f32 0.0, %v704_v19 }
 0x3c7   : > { %v1493_v31 = vadd.f32 %v1492_v28, %v1483_v27  ;;  %2381 = vmatprep.mubr.msk.f32.mxu0 %vm2510_vm0, %v2511_v4  ;;  %v1590_v39 = vmul.f32 %v1588_v29, %v1585_v32 }
 0x3c8   : > { %v708_v23 = vmul.f32 1.442695, %v707_v20 }
 0x3c9   : > { %v1581_v37 = vmul.f32 %v2488_v34, %v1493_v31  ;;  %2375 = vmatpush3.msra.mxu1 %v1493_v31 }
 0x3ca   : > { %2377 = vmatmul.mubr.msk.f32.vlgmr.msra.gmra.mrb[8].mxu1 %vm727_vm4, %v1494_v35  ;;  %2384 = vmatprep.subr.mxu1 %v2511_v4  ;;  %2497 = vpow2.f32 %v708_v23 }
 0x3cb   : > { %v1591_v41 = vadd.f32 %v1590_v39, %v1581_v37  ;;  %v1686_v42 = vpop.permute.xlu1 %1685  ;;  %2386 = vmatprep.mubr.msk.f32.mxu1 %vm2510_vm0, %v2511_v4 }
 0x3cc   : > { %v1688_v44 = vmul.f32 %v1686_v42, %v1683_v40 }
 0x3cd   : > { %v1679_v46 = vmul.f32 %v2490_v38, %v1591_v41  ;;  %2380 = vmatpush3.msra.mxu0 %v1591_v41 }
 0x3ce   : > { %2382 = vmatmul.mubr.msk.f32.vlgmr.msra.gmra.mrb[12].mxu0 %vm727_vm4, %v1592_v45  ;;  %2389 = vmatprep.subr.mxu0 %v2511_v4 }
 0x3cf   : > { %v1689_v47 = vadd.f32 %v1688_v44, %v1679_v46  ;;  %2391 = vmatprep.mubr.msk.f32.mxu0 %vm2510_vm0, %v2511_v4 }
 0x3d0   : > { %v1784_v50 = vpop.permute.xlu1 %1783 }
 0x3d1   : > { %v1777_v53 = vmul.f32 %v2492_v49, %v1689_v47  ;;  %v1786_v54 = vmul.f32 %v1784_v50, %v1781_v48  ;;  %2385 = vmatpush3.msra.mxu1 %v1689_v47 }
 0x3d2   : > { %2387 = vmatmul.mubr.msk.f32.vlgmr.msra.gmra.mrb[10].mxu1 %vm727_vm4, %v1690_v52  ;;  %2394 = vmatprep.subr.mxu1 %v2511_v4 }
 0x3d3   : > { %v1787_v57 = vadd.f32 %v1786_v54, %v1777_v53  ;;  %2396 = vmatprep.mubr.msk.f32.mxu1 %vm2510_vm0, %v2511_v4 }
 0x3d4   : > { %v2498_v39 = vpop.eup %2497 }
 0x3d5   : > { %v1882_v60 = vpop.permute.xlu1 %1881  ;;  %v1875_v61 = vmul.f32 %v2494_v51, %v1787_v57  ;;  %2390 = vmatpush3.msra.mxu0 %v1787_v57  ;;  %v710_v38 = vadd.f32 1.0, %v2498_v39 }
 0x3d6   : > { %v1884_v62 = vmul.f32 %v1882_v60, %v1879_v58  ;;  %2392 = vmatmul.mubr.msk.f32.vlgmr.msra.gmra.mrb[14].mxu0 %vm727_vm4, %v1788_v59  ;;  %2399 = vmatprep.subr.mxu0 %v2511_v4  ;;  %v2249_v60 = vld [vmem:[%s2916_s14] ss:$0 sm:$0xff] }
 0x3d7   : > { %2401 = vmatprep.mubr.msk.f32.mxu0 %vm2510_vm0, %v2511_v4  ;;  %2499 = vrcp.f32 %v710_v38 }
 0x3d8   : > { %v1885_v0 = vadd.f32 %v1884_v62, %v1875_v61 }
 0x3da   : > { %v1980_v5 = vpop.permute.xlu1 %1979  ;;  %v1973_v6 = vmul.f32 %v2496_v1, %v1885_v0  ;;  %2395 = vmatpush3.msra.mxu1 %v1885_v0 }
 0x3db   : > { %v1982_v7 = vmul.f32 %v1980_v5, %v1977_v3  ;;  %2397 = vmatmul.mubr.msk.f32.vlgmr.msra.gmra.mrb[12].mxu1 %vm727_vm4, %v1886_v56  ;;  %2439 = vmatprep.subr.bf16.mxu1 %v2509_v2  ;;  %v2071_v3 = vmul.f32 %v2249_v60, %v2730_v63 }
 0x3dc   : > { %2412 = vmatprep.mubr.msk.f32.mxu1 %vm2510_vm0, %v2511_v4  ;;  %v2077_v4 = vld [vmem:[%s2917_s15 + $0x18] sm:$0xff]  ;;  %2441 = vmatpush3.bf16.msra.mxu1 %v2440_v15 }
 0x3dd   : > { %v1983_v11 = vadd.f32 %v1982_v7, %v1973_v6  ;;  %v2443_v16 = vpack.c.bf16 %v2077_v4, %v2076_v14  ;;  %2442 = vmatprep.subr.bf16.mxu1 %v2509_v2 }
 0x3df   : > { %2400 = vmatpush3.msra.mxu0 %v1983_v11 }
 0x3e0   : > { %2402 = vmatmul.mubr.msk.f32.vlgmr.msra.gmra.mrb[16].mxu0 %vm727_vm4, %v1984_v12  ;;  %2444 = vmatpush3.bf16.msra.mxu1 %v2443_v16 }
 0x3e1   : > { %v2500_v62 = vpop.eup %2499 }
 0x3e2   : > { %v713_v56 = vmul.f32 %v2500_v62, %v704_v19 }
 0x495   : > { %v1367_v21 = vpop.f32.mrb[8].mxu0 }
 0x496   : > { %v2368_v22 = vpop.f32.mrb[9].mxu0  ;;  %v1375_v24 = vrot.slane %v1367_v21, %v2761_v36 }
 0x498   : > { %v1376_v26 = vsel %vm1371_vm7, %v1375_v24, 0.0 }
 0x499   : > { %v1465_v9 = vpop.f32.mrb[10].mxu0 }
 0x49a   : > { %v1473_v2 = vrot.slane %v1465_v9, %v2761_v36  ;;  %v2373_v25 = vpop.f32.mrb[11].mxu0 }
 0x49c   : > { %v1474_v27 = vsel %vm1469_vm8, %v1473_v2, 0.0 }
 0x49d   : > { %v1475_v28 = vadd.f32 %v1474_v27, %v1376_v26  ;;  %v1563_v29 = vpop.f32.mrb[8].mxu1 }
 0x49e   : > { %v1571_v17 = vrot.slane %v1563_v29, %v2761_v36  ;;  %v2378_v30 = vpop.f32.mrb[9].mxu1 }
 0x4a0   : > { %v1572_v31 = vsel %vm1567_vm9, %v1571_v17, 0.0 }
 0x4a1   : > { %v1573_v32 = vadd.f32 %v1572_v31, %v1475_v28  ;;  %v1661_v33 = vpop.f32.mrb[12].mxu0 }
 0x4a2   : > { %v1669_v34 = vrot.slane %v1661_v33, %v2761_v36  ;;  %v2383_v35 = vpop.f32.mrb[13].mxu0 }
 0x4a4   : > { %v1670_v37 = vsel %vm1665_vm10, %v1669_v34, 0.0 }
 0x4a5   : > { %v1671_v40 = vadd.f32 %v1670_v37, %v1573_v32  ;;  %v1759_v41 = vpop.f32.mrb[10].mxu1 }
 0x4a6   : > { %v1767_v42 = vrot.slane %v1759_v41, %v2761_v36  ;;  %v2388_v43 = vpop.f32.mrb[11].mxu1 }
 0x4a8   : > { %v1768_v44 = vsel %vm1763_vm11, %v1767_v42, 0.0 }
 0x4a9   : > { %v1769_v45 = vadd.f32 %v1768_v44, %v1671_v40  ;;  %v1857_v46 = vpop.f32.mrb[14].mxu0 }
 0x4aa   : > { %v1865_v47 = vrot.slane %v1857_v46, %v2761_v36  ;;  %v2393_v48 = vpop.f32.mrb[15].mxu0 }
 0x4ac   : > { %v1866_v49 = vsel %vm1861_vm12, %v1865_v47, 0.0 }
 0x4ad   : > { %v1867_v50 = vadd.f32 %v1866_v49, %v1769_v45 }
 0x4ae   : > { %v1955_v52 = vpop.f32.mrb[12].mxu1 }
 0x4af   : > { %v1963_v53 = vrot.slane %v1955_v52, %v2761_v36  ;;  %v2398_v54 = vpop.f32.mrb[13].mxu1 }
 0x4b1   : > { %v1964_v57 = vsel %vm1959_vm13, %v1963_v53, 0.0 }
 0x4b2   : > { %v1965_v51 = vadd.f32 %v1964_v57, %v1867_v50 }
 0x4b3   : > { %v2053_v58 = vpop.f32.mrb[16].mxu0 }
 0x4b4   : > { %v2061_v59 = vrot.slane %v2053_v58, %v2761_v36  ;;  %v2403_v61 = vpop.f32.mrb[17].mxu0 }
 0x4b6   : > { %v2062_v0 = vsel %vm2057_vm14, %v2061_v59, 0.0 }
 0x4b7   : > { %v2063_v1 = vadd.f32 %v2062_v0, %v1965_v51 }
 0x4b9   : > { %v2072_v5 = vadd.f32 %v2071_v3, %v2063_v1 }
 0x4bb   : > { %v2073_v6 = vmul.f32 %v2072_v5, %v713_v56 }
 0x4bd   : > { %2413 = vmatmul.mubr.msk.f32.vlgmr.msra.gmra.mrb[14].mxu1 %vm1000_vm6, %v2073_v6 }
 0x590   : > { %v2154_v36 = vpop.f32.mrb[14].mxu1 }
 0x591   : > { %v2155_v7 = vadd.f32 %v2250_v10, %v2154_v36  ;;  %v2414_v11 = vpop.f32.mrb[15].mxu1 }
 0x593   : > { %v2158_v12 = vadd.f32 %v2155_v7, %v2646_v8 }
 0x595   : > { %2159 = vst.msk [vmem:[%s543_s19] sm:$0xff] %vm554_vm1, %v2158_v12 }
 0x596 PF: > { %s27_s24 = sadd.s32 1, %s2507_s24  }
 0x597   : > { %p24_p4 = scmp.ge.s32.totalorder %s27_s24, 34  }
 0x599   :  { %26 = sbr.rel (!%p24_p4) target bundleno = 3 (0x3), region = 118 }

// kernel: hyper_semamba_forward.13
= control target key start
LH: loop header
LB: loop body
LE: loop exit
PB: predicated region body
PF: predicated region fallthrough
CT: control target
= control target key end

     0   :  { %v260_v12 = vmov 683565275   ;;  %v261_v14 = vmov 2475754826   ;;  %v262_v16 = vmov 2131351028   ;;  %s319_s1 = inlined_call_operand.vmem [shape: f32[1,256], index: 1, kind: input, shape index: {}]   ;;  %s320_s0 = inlined_call_operand.vmem [shape: f32[1,256], index: 0, kind: input, shape index: {}]   ;;  %s321_s2 = inlined_call_operand.vmem [shape: f32[1,256], index: 2, kind: output, shape index: {0}]   ;;  %s322_s3 = inlined_call_operand.vmem [shape: f32[1,256], index: 3, kind: output, shape index: {1}]  }
   0x1   :  { %v289_v0 = vld [vmem:[%s319_s1] sm:$0x3]  ;;  %v263_v18 = vmov 2102212464   ;;  %v264_v20 = vmov 920167782  }
   0x2   :  { %v18_v1 = vand.u32 2139095040, %v289_v0  ;;  %v15_v3 = vand.u32 2147483647, %v289_v0  ;;  %v265_v27 = vmov 1326507024   ;;  %vm17_vm7 = vcmp.lt.s32.totalorder %v289_v0, 0 }
   0x3   :  { %vm107_vm15 = vweird.f32 %v289_v0 }
   0x4   :  { %v19_v2 = vshrl.u32 %v18_v1, 23  ;;  %v22_v6 = vand.u32 8388607, %v15_v3  ;;  %vm16_vm8 = vcmp.le.f32.partialorder %v15_v3, 0.7853982 }
   0x6   :  { %v238_v4 = vadd.s32 4294967169, %v19_v2  ;;  %v23_v9 = vor.u32 8388608, %v22_v6 }
   0x8   :  { %v25_v5 = vadd.s32 1, %v238_v4  ;;  %v63_v29 = vshll.u32 %v23_v9, 8 }
   0xa   :  { %vm26_vm0 = vcmp.gt.s32.totalorder %v25_v5, 0 }
   0xb   :  { %v27_v7 = vsel %vm26_vm0, %v25_v5, 0 }
   0xc   :  { %v29_v8 = vand.u32 31, %v27_v7  ;;  %v28_v10 = vshrl.u32 %v27_v7, 5 }
   0xe   :  { %v30_v11 = vsub.s32 32, %v29_v8  ;;  %v32_v13 = vshll.u32 %v260_v12, %v29_v8  ;;  %v35_v15 = vshll.u32 %v261_v14, %v29_v8  ;;  %v38_v17 = vshll.u32 %v262_v16, %v29_v8 }
   0xf   :  { %v41_v19 = vshll.u32 %v263_v18, %v29_v8  ;;  %v44_v21 = vshll.u32 %v264_v20, %v29_v8  ;;  %vm47_vm1 = vcmp.lt.s32.totalorder %v28_v10, 1  ;;  %vm50_vm2 = vcmp.lt.s32.totalorder %v28_v10, 4 }
  0x10   :  { %v31_v22 = vshrl.u32 %v260_v12, %v30_v11  ;;  %v33_v23 = vshrl.u32 %v261_v14, %v30_v11  ;;  %v36_v24 = vshrl.u32 %v262_v16, %v30_v11  ;;  %v39_v25 = vshrl.u32 %v263_v18, %v30_v11 }
  0x11   :  { %v42_v26 = vshrl.u32 %v264_v20, %v30_v11  ;;  %v45_v28 = vshrl.u32 %v265_v27, %v30_v11  ;;  %vm48_vm3 = vcmp.lt.s32.totalorder %v28_v10, 2  ;;  %vm49_vm4 = vcmp.lt.s32.totalorder %v28_v10, 3 }
  0x12   :  { %v34_v30 = vor.u32 %v33_v23, %v32_v13  ;;  %v37_v31 = vor.u32 %v36_v24, %v35_v15  ;;  %v40_v32 = vor.u32 %v39_v25, %v38_v17 }
  0x13   :  { %v43_v33 = vor.u32 %v42_v26, %v41_v19  ;;  %v46_v34 = vor.u32 %v45_v28, %v44_v21  ;;  %v119_v26 = vlaneseq }
  0x14   :  { %v51_v35 = vsel %vm47_vm1, %v31_v22, %v34_v30  ;;  %v52_v36 = vsel %vm50_vm2, %v40_v32, 2102212464  ;;  %v55_v37 = vsel %vm47_vm1, %v34_v30, %v37_v31  ;;  %v59_v38 = vsel %vm47_vm1, %v37_v31, %v40_v32 }
  0x15   :  { %v53_v39 = vsel %vm49_vm4, %v37_v31, %v52_v36  ;;  %v56_v40 = vsel %vm50_vm2, %v43_v33, 920167782  ;;  %v60_v41 = vsel %vm50_vm2, %v46_v34, 1326507024  ;;  %vm121_vm0 = vcmp.lt.s32.totalorder %v119_v26, 256 }
  0x16   :  { %v57_v42 = vsel %vm49_vm4, %v40_v32, %v56_v40  ;;  %v61_v43 = vsel %vm49_vm4, %v43_v33, %v60_v41  ;;  %v54_v44 = vsel %vm48_vm3, %v51_v35, %v53_v39 }
  0x17   :  { %v58_v45 = vsel %vm48_vm3, %v55_v37, %v57_v42  ;;  %v62_v46 = vsel %vm48_vm3, %v59_v38, %v61_v43  ;;  %v70_v51 = vmul.u32 %v63_v29, %v54_v44 }
  0x18   :  { %v295_v47 = vmul.u32.u64.low %v63_v29, %v62_v46  ;;  %v296_v48 = vmul.u32.u64.high %v63_v29, %v62_v46, %v295_v47  ;;  %v298_v49 = vmul.u32.u64.low %v63_v29, %v58_v45  ;;  %v299_v50 = vmul.u32.u64.high %v63_v29, %v58_v45, %v298_v49  ;;  %v13_v29 = vld [vmem:[%s320_s0] sm:$0x3] }
  0x1a   :  { %vm72_vm5 = vc.u32 %v296_v48, %v298_v49  ;;  %v73_v52 = vadd.s32 1, %v299_v50  ;;  %v71_v63 = vadd.s32 %v298_v49, %v296_v48 }
  0x1c   :  { %v74_v53 = vsel %vm72_vm5, %v73_v52, %v299_v50 }
  0x1d   :  { %v75_v54 = vadd.s32 %v74_v53, %v70_v51 }
  0x1f   :  { %v76_v55 = vadd.s32 536870912, %v75_v54 }
  0x21   :  { %v77_v56 = vshrl.u32 %v76_v55, 30 }
  0x23   :  { %v78_v57 = vshll.u32 %v77_v56, 30  ;;  %v101_v13 = vsub.s32 4, %v77_v56 }
  0x25   :  { %v79_v58 = vsub.s32 %v75_v54, %v78_v57  ;;  %v102_v16 = vsel %vm17_vm7, %v101_v13, %v77_v56 }
  0x26   :  { %v104_v19 = vsel %vm16_vm8, 0, %v102_v16 }
  0x27   :  { %v81_v59 = vsub.s32 0, %v79_v58  ;;  %v217_v20 = vadd.s32 3, %v104_v19  ;;  %v108_v21 = vand.u32 3, %v104_v19 }
  0x29   :  { %v239_v60 = vmin.u32 %v81_v59, %v79_v58  ;;  %v218_v22 = vand.u32 3, %v217_v20  ;;  %vm113_vm9 = vcmp.eq.s32.totalorder %v108_v21, 2  ;;  %vm110_vm11 = vcmp.eq.s32.totalorder %v108_v21, 0 }
  0x2a   :  { %vm109_vm13 = vcmp.lt.s32.totalorder %v108_v21, 2 }
  0x2b   :  { %v83_v61 = vclz %v239_v60  ;;  %vm223_vm10 = vcmp.eq.s32.totalorder %v218_v22, 2  ;;  %vm220_vm12 = vcmp.eq.s32.totalorder %v218_v22, 0  ;;  %vm219_vm14 = vcmp.lt.s32.totalorder %v218_v22, 2 }
  0x2d   :  { %v240_v62 = vadd.s32 4294967294, %v83_v61 }
  0x2f   :  { %vm241_vm6 = vcmp.lt.s32.totalorder %v240_v62, 0 }
  0x30   :  { %v86_v1 = vsel %vm241_vm6, 0, %v240_v62 }
  0x31   :  { %v87_v2 = vsub.s32 32, %v86_v1  ;;  %v88_v4 = vshll.u32 %v79_v58, %v86_v1  ;;  %v91_v5 = vsub.s32 4294967266, %v86_v1 }
  0x33   :  { %v89_v6 = vshrl.u32 %v71_v63, %v87_v2  ;;  %v92_v7 = vadd.s32 127, %v91_v5 }
  0x35   :  { %v90_v8 = vor.u32 %v89_v6, %v88_v4  ;;  %v93_v9 = vshll.u32 %v92_v7, 23 }
  0x37   :  { %v94_v10 = vor.u32 4788187, %v93_v9  ;;  %v97_v11 = vcvt.s32.f32 %v90_v8 }
  0x39   :  { %v95_v12 = vand.u32 2147483647, %v94_v10 }
  0x3b   :  { %v98_v14 = vmul.f32 %v97_v11, %v95_v12 }
  0x3d   :  { %v99_v15 = vxor.u32 2147483648, %v98_v14 }
  0x3f   :  { %v100_v17 = vsel %vm17_vm7, %v99_v15, %v98_v14 }
  0x40   :  { %v103_v18 = vsel %vm16_vm8, %v289_v0, %v100_v17 }
  0x41   :  { %256 = vcosq.f32 %v103_v18 }
  0x42   :  { %258 = vsinq.f32 %v103_v18 }
  0x4b   :  { %v257_v23 = vpop.eup %256 }
  0x4c   :  { %v259_v24 = vpop.eup %258  ;;  %v114_v25 = vxor.u32 2147483648, %v257_v23 }
  0x4d   :  { %v111_v3 = vxor.u32 2147483648, %v259_v24 }
  0x4e   :  { %v115_v27 = vsel %vm113_vm9, %v114_v25, %v259_v24  ;;  %v225_v28 = vsel %vm223_vm10, %v114_v25, %v259_v24 }
  0x4f   :  { %v112_v30 = vsel %vm110_vm11, %v257_v23, %v111_v3  ;;  %v222_v31 = vsel %vm220_vm12, %v257_v23, %v111_v3 }
  0x50   :  { %v116_v32 = vsel %vm109_vm13, %v112_v30, %v115_v27  ;;  %v226_v33 = vsel %vm219_vm14, %v222_v31, %v225_v28 }
  0x51   :  { %v117_v34 = vsel %vm107_vm15, nan, %v116_v32  ;;  %v227_v35 = vsel %vm107_vm15, nan, %v226_v33 }
  0x52   :  { %v118_v36 = vmul.f32 %v117_v34, %v13_v29  ;;  %v228_v37 = vmul.f32 %v227_v35, %v13_v29 }
  0x54   :  { %123 = vst.msk [vmem:[%s321_s2] sm:$0x3] %vm121_vm0, %v118_v36  ;;  %229 = vst.msk [vmem:[%s322_s3] sm:$0x3] %vm121_vm0, %v228_v37 }

// kernel: hyper_semamba_forward.9
= control target key start
LH: loop header
LB: loop body
LE: loop exit
PB: predicated region body
PF: predicated region fallthrough
CT: control target
= control target key end

     0   :  { %s3732_s24 = smov 0   ;;  %s4178_s0 = inlined_call_operand.vmem [shape: f32[16,16,16], index: 0, kind: input, shape index: {}]   ;;  %s4179_s1 = inlined_call_operand.vmem [shape: f32[16,32], index: 1, kind: input, shape index: {}]   ;;  %s4180_s2 = inlined_call_operand.vmem [shape: f32[16,32], index: 2, kind: input, shape index: {}]   ;;  %s4181_s3 = inlined_call_operand.vmem [shape: f32[1,32], index: 3, kind: input, shape index: {}]   ;;  %s4182_s4 = inlined_call_operand.vmem [shape: f32[1,32], index: 4, kind: input, shape index: {}]   ;;  %s4183_s5 = inlined_call_operand.vmem [shape: f32[4,32], index: 5, kind: input, shape index: {}]   ;;  %s4184_s6 = inlined_call_operand.vmem [shape: f32[1,32], index: 6, kind: input, shape index: {}]   ;;  %s4185_s7 = inlined_call_operand.vmem [shape: f32[32,8], index: 7, kind: input, shape index: {}]   ;;  %s4186_s8 = inlined_call_operand.vmem [shape: f32[1,8], index: 8, kind: input, shape index: {}]   ;;  %s4187_s9 = inlined_call_operand.vmem [shape: f32[32,8], index: 9, kind: input, shape index: {}]   ;;  %s4188_s10 = inlined_call_operand.vmem [shape: f32[1,8], index: 10, kind: input, shape index: {}]   ;;  %s4189_s11 = inlined_call_operand.vmem [shape: f32[32,32], index: 11, kind: input, shape index: {}]   ;;  %s4190_s12 = inlined_call_operand.vmem [shape: f32[1,32], index: 12, kind: input, shape index: {}]   ;;  %s4191_s13 = inlined_call_operand.vmem [shape: f32[8,32], index: 13, kind: input, shape index: {}]   ;;  %s4192_s14 = inlined_call_operand.vmem [shape: f32[1,32], index: 14, kind: input, shape index: {}]   ;;  %s4193_s15 = inlined_call_operand.vmem [shape: f32[32,16], index: 15, kind: input, shape index: {}]   ;;  %s4194_s16 = inlined_call_operand.vmem [shape: f32[1,16], index: 16, kind: input, shape index: {}]   ;;  %s4195_s17 = inlined_call_operand.vmem [shape: f32[16,16,16], index: 17, kind: output, shape index: {}]  }
   0x1   :  { %4197 = sst [smem:[#allocation2_spill]] %s4178_s0 }
   0x2   :  { %4198 = sst [smem:[#allocation3_spill]] %s4179_s1 }
   0x3 LB: > { %s3163_s25 = sadd.s32 4294967295, %s3622_s24   ;;  %p3167_p0 = scmp.ge.s32.totalorder %s3622_s24, 1  ;;  %s3622_s24 = sphi %s3732_s24, %s27_s24  }
   0x4   : > { %p487_p1 = scmp.lt.s32.totalorder %s3622_s24, 17 }
   0x6   : > { %p488_p2 = pnand %p3167_p0, %p487_p1 }
   0x7   : > { %s4199_s28 = sld [smem:[#allocation3_spill]] (!%p488_p2)  ;;  %p539_p3 = scmp.lt.s32.totalorder (!%p488_p2), %s3163_s25, 15  ;;  %v642_v2 = vld [vmem:[%s4180_s2] sm:$0xff] (!%p488_p2)  ;;  %v643_v4 = vld [vmem:[%s4180_s2 + $0x8] sm:$0xff] (!%p488_p2)  ;;  %vm560_vm0 = vcmask (!%p488_p2), 130048   ;;  %v740_v8 = vlaneseq (!%p488_p2)  ;;  %v3624_v13 = vmov (!%p488_p2), 0.0  }
   0x8   : > { %491 = sbr.rel (%p488_p2) target bundleno = 1479 (0x5c7), region = 88  ;;  %v3467_v5 = vpack.c.bf16 (!%p488_p2), %v643_v4, %v642_v2  ;;  %s4200_s23 = sld [smem:[#allocation2_spill]] (!%p488_p2)  ;;  %v3172_v17 = vld [vmem:[%s4181_s3] ss:$0 sm:$0xff] (!%p488_p2)  ;;  %v1064_v34 = vld [vmem:[%s4185_s7 + $0x8] sm:$0xff] (!%p488_p2)  ;;  %v1065_v39 = vld [vmem:[%s4185_s7 + $0x10] sm:$0xff] (!%p488_p2) }
   0x9   : > { %v3768_v9 = vshrl.u32 (!%p488_p2), %v740_v8, 7  ;;  %v744_v10 = vand.u32 (!%p488_p2), 127, %v740_v8  ;;  %v1063_v33 = vld [vmem:[%s4185_s7] sm:$0xff] (!%p488_p2)  ;;  %v1157_v37 = vld [vmem:[%s4187_s9 + $0x8] sm:$0xff] (!%p488_p2)  ;;  %v1066_v40 = vld [vmem:[%s4185_s7 + $0x18] sm:$0xff] (!%p488_p2)  ;;  %vm1074_vm7 = vcmask (!%p488_p2), 261120  }
   0xa   : > { %3468 = vmatprep.subr.bf16.mxu1 (!%p488_p2), %v3467_v5  ;;  %v3483_v35 = vpack.c.bf16 (!%p488_p2), %v1064_v34, %v1063_v33  ;;  %v1156_v36 = vld [vmem:[%s4187_s9] sm:$0xff] (!%p488_p2)  ;;  %v3487_v41 = vpack.c.bf16 (!%p488_p2), %v1066_v40, %v1065_v39  ;;  %v1158_v42 = vld [vmem:[%s4187_s9 + $0x10] sm:$0xff] (!%p488_p2)  ;;  %v1159_v43 = vld [vmem:[%s4187_s9 + $0x18] sm:$0xff] (!%p488_p2)  ;;  %vm3627_vm8 = vmmov (!%p488_p2), 0   ;;  %vm1400_vm9 = vcmask (!%p488_p2), 64512  }
   0xb   : > { %3470 = vmatpush3.bf16.msra.mxu1 (!%p488_p2), %v3467_v5  ;;  %v3179_v11 = vadd.s32 (!%p488_p2), 4294967293, %v3768_v9  ;;  %v3184_v12 = vadd.s32 (!%p488_p2), 4294967294, %v3768_v9  ;;  %v3777_v16 = vadd.s32 (!%p488_p2), 8, %v3768_v9  ;;  %v3189_v24 = vadd.s32 (!%p488_p2), 4294967295, %v3768_v9  ;;  %v1242_v45 = vld [vmem:[%s4189_s11] sm:$0xff] (!%p488_p2)  ;;  %v1243_v46 = vld [vmem:[%s4189_s11 + $0x8] sm:$0xff] (!%p488_p2) }
   0xc   : > { %v3491_v38 = vpack.c.bf16 (!%p488_p2), %v1157_v37, %v1156_v36  ;;  %v3495_v44 = vpack.c.bf16 (!%p488_p2), %v1159_v43, %v1158_v42  ;;  %v3499_v47 = vpack.c.bf16 (!%p488_p2), %v1243_v46, %v1242_v45  ;;  %v3178_v48 = vld [vmem:[%s4183_s5 + $0x3] ss:$0 sm:$0xff] (!%p488_p2)  ;;  %v3183_v49 = vld [vmem:[%s4183_s5] ss:$0 sm:$0xff] (!%p488_p2)  ;;  %v3188_v50 = vld [vmem:[%s4183_s5 + $0x1] ss:$0 sm:$0xff] (!%p488_p2) }
   0xd   : > { %v551_v0 = vld [vmem:[%s4199_s28] sm:$0xff] (!%p488_p2)  ;;  %v552_v1 = vld [vmem:[%s4199_s28 + $0x8] sm:$0xff] (!%p488_p2)  ;;  %vm754_vm1 = vcmp.eq.s32.totalorder (!%p488_p2), %v744_v10, %v3179_v11  ;;  %vm850_vm2 = vcmp.eq.s32.totalorder (!%p488_p2), %v744_v10, %v3184_v12  ;;  %v3180_v19 = vadd.s32 (!%p488_p2), 4294967293, %v3777_v16  ;;  %v3185_v20 = vadd.s32 (!%p488_p2), 4294967294, %v3777_v16 }
   0xe   : > { %v3463_v3 = vpack.c.bf16 (!%p488_p2), %v552_v1, %v551_v0  ;;  %v756_v14 = vsel (!%p488_p2), %vm754_vm1, 1.0, %v3624_v13  ;;  %v852_v15 = vsel (!%p488_p2), %vm850_vm2, 1.0, %v3624_v13  ;;  %v3190_v28 = vadd.s32 (!%p488_p2), 4294967295, %v3777_v16  ;;  %v3193_v61 = vld [vmem:[%s4183_s5 + $0x2] ss:$0 sm:$0xff] (!%p488_p2) }
   0xf   : > { %s4202_s25 = smov (!%p539_p3, %s3163_s25), 15  ;;  %vm755_vm3 = vcmp.eq.s32.totalorder %v744_v10, %v3180_v19  ;;  %vm851_vm4 = vcmp.eq.s32.totalorder %v744_v10, %v3185_v20  ;;  %vm946_vm5 = vcmp.eq.s32.totalorder %v744_v10, %v3189_v24  ;;  %v3194_v5 = vld [vmem:[%s4184_s6] ss:$0 sm:$0xff]  ;;  %v1244_v24 = vld [vmem:[%s4189_s11 + $0x10] sm:$0xff]  ;;  %vm1474_vm10 = vcmp.eq.s32.totalorder %v3768_v9, 0 }
  0x10   : > { %3464 = vmatprep.subr.bf16.mxu0 %v3463_v3  ;;  %s3226_s20 = sshll.u32 %s4202_s25, 4  ;;  %v757_v29 = vsel %vm755_vm3, 1.0, %v3624_v13  ;;  %v853_v30 = vsel %vm851_vm4, 1.0, %v3624_v13  ;;  %v948_v31 = vsel %vm946_vm5, 1.0, %v3624_v13  ;;  %vm947_vm6 = vcmp.eq.s32.totalorder %v744_v10, %v3190_v28  ;;  %v3877_v39 = vld [vmem:[%s4190_s12] ss:$0 sm:$0xff] }
  0x11   : > { %3466 = vmatpush3.bf16.msra.mxu0 %v3463_v3  ;;  %s3760_s26 = scalar_lea.vmem %s4200_s23, %s3226_s20  ;;  %v949_v32 = vsel %vm947_vm6, 1.0, %v3624_v13  ;;  %vm1575_vm11 = vcmp.eq.s32.totalorder %v3768_v9, 1  ;;  %vm1676_vm12 = vcmp.eq.s32.totalorder %v3768_v9, 2  ;;  %vm1777_vm13 = vcmp.eq.s32.totalorder %v3768_v9, 3  ;;  %s548_s27 = scalar_lea.vmem %s4195_s17, %s3226_s20 }
  0x12   : > { %v549_v6 = vld [vmem:[%s3760_s26] sm:$0xff]  ;;  %v550_v7 = vld [vmem:[%s3760_s26 + $0x8] sm:$0xff]  ;;  %vm1878_vm14 = vcmp.eq.s32.totalorder %v3768_v9, 4  ;;  %vm1979_vm15 = vcmp.eq.s32.totalorder %v3768_v9, 5  ;;  %vm2080_vm1 = vcmp.eq.s32.totalorder %v3768_v9, 6  ;;  %vm2181_vm2 = vcmp.eq.s32.totalorder %v3768_v9, 7 }
  0x13   : > { %3308 = vmatprep.mubr.msk.f32.mxu0 %vm560_vm0, %v549_v6  ;;  %3315 = vmatprep.mubr.msk.f32.mxu1 %vm560_vm0, %v549_v6  ;;  %vm2283_vm3 = vcmp.eq.s32.totalorder %v3777_v16, 8  ;;  %vm2384_vm4 = vcmp.eq.s32.totalorder %v3777_v16, 9  ;;  %vm2485_vm5 = vcmp.eq.s32.totalorder %v3777_v16, 10  ;;  %vm2586_vm6 = vcmp.eq.s32.totalorder %v3777_v16, 11 }
  0x14   : > { %3309 = vmatmul.mubr.msk.f32.vlgmr.msra.gmra.mrb[0].mxu0 %vm560_vm0, %v550_v7  ;;  %3316 = vmatmul.mubr.msk.f32.vlgmr.msra.gmra.mrb[0].mxu1 %vm560_vm0, %v550_v7 }
  0x15   : > { %3322 = vmatprep.mubr.msk.f32.mxu0 %vm560_vm0, %v756_v14  ;;  %3329 = vmatprep.mubr.msk.f32.mxu1 %vm560_vm0, %v852_v15 }
  0xe7   : > { %v3310_v18 = vpop.f32.mrb[0].mxu0  ;;  %v3784_v21 = vpop.f32.mrb[0].mxu1 }
  0xe8   : > { %v639_v22 = vadd.f32 %v3310_v18, %v3172_v17  ;;  %v633_v23 = vpop.f32.mrb[1].mxu0  ;;  %v3787_v25 = vpop.f32.mrb[1].mxu1 }
  0xe9   : > { %v634_v26 = vadd.f32 %v3172_v17, %v633_v23 }
  0xea   : > { %v751_v53 = vmul.f32 %v3178_v48, %v639_v22 }
  0xeb   : > { %v3471_v27 = vpack.c.bf16 %v639_v22, %v634_v26  ;;  %v750_v58 = vmul.f32 %v3178_v48, %v634_v26  ;;  %v1245_v26 = vld [vmem:[%s4189_s11 + $0x18] sm:$0xff]  ;;  %v3626_v48 = vmov 2  }
  0xed   : > { %3472 = vmatprep.subr.bf16.mxu0 %v3471_v27  ;;  %3476 = vmatprep.subr.bf16.mxu1 %v3471_v27 }
  0xee   : > { %3474 = vmatpush3.bf16.msra.mxu0 %v3471_v27  ;;  %3478 = vmatpush3.bf16.msra.mxu1 %v3471_v27 }
  0xef   : > { %3480 = vmatprep.subr.bf16.mxu0 %v3471_v27  ;;  %3484 = vmatprep.subr.bf16.mxu1 %v3483_v35 }
  0xf1   : > { %3323 = vmatmul.mubr.msk.f32.vlgmr.msra.gmra.mrb[2].mxu0 %vm560_vm0, %v757_v29  ;;  %3330 = vmatmul.mubr.msk.f32.vlgmr.msra.gmra.mrb[2].mxu1 %vm560_vm0, %v853_v30  ;;  %v3503_v30 = vpack.c.bf16 %v1245_v26, %v1244_v24  ;;  %v3911_v26 = vsub.s32 0, %v3768_v9 }
  0xf2   : > { %3482 = vmatpush3.bf16.msra.mxu0 %v3471_v27  ;;  %3336 = vmatprep.mubr.msk.f32.mxu0 %vm560_vm0, %v948_v31  ;;  %v3625_v31 = vmov 0  }
  0xf3   : > { %3486 = vmatpush3.bf16.msra.mxu1 %v3483_v35  ;;  %3492 = vmatprep.subr.bf16.mxu0 %v3491_v38 }
  0xf4   : > { %3488 = vmatprep.subr.bf16.mxu1 %v3487_v41  ;;  %3541 = vset.pattern.permute.xlu1 %v3625_v31 }
  0xf5   : > { %3337 = vmatmul.mubr.msk.f32.vlgmr.msra.gmra.mrb[4].mxu0 %vm560_vm0, %v949_v32  ;;  %v3195_v32 = vld [vmem:[%s4186_s8] ss:$0 sm:$0xff] }
  0xf6   : > { %3494 = vmatpush3.bf16.msra.mxu0 %v3491_v38 }
  0xf7   : > { %3490 = vmatpush3.bf16.msra.mxu1 %v3487_v41  ;;  %3496 = vmatprep.subr.bf16.mxu0 %v3495_v44 }
  0xf8   : > { %3500 = vmatprep.subr.bf16.mxu1 %v3499_v47 }
  0xfa   : > { %3498 = vmatpush3.bf16.msra.mxu0 %v3495_v44 }
  0xfb   : > { %3372 = vmatprep.subr.mxu0 %v3624_v13 }
 0x1c4   : > { %v3324_v51 = vpop.f32.mrb[2].mxu0  ;;  %v3331_v52 = vpop.f32.mrb[2].mxu1 }
 0x1c5   : > { %v845_v54 = vmul.f32 %v3324_v51, %v3183_v49  ;;  %v830_v55 = vpop.f32.mrb[3].mxu0  ;;  %v941_v56 = vmul.f32 %v3331_v52, %v3188_v50  ;;  %v926_v57 = vpop.f32.mrb[3].mxu1 }
 0x1c6   : > { %v844_v59 = vmul.f32 %v3183_v49, %v830_v55  ;;  %v940_v60 = vmul.f32 %v3188_v50, %v926_v57  ;;  %v3891_v55 = vld [vmem:[%s4191_s13] sm:$0xff] }
 0x1c7   : > { %v847_v62 = vadd.f32 %v845_v54, %v751_v53  ;;  %v3883_v53 = vsub.s32 6, %v3768_v9  ;;  %v3886_v54 = vsub.s32 7, %v3768_v9 }
 0x1c8   : > { %v846_v63 = vadd.f32 %v844_v59, %v750_v58  ;;  %v3338_v0 = vpop.f32.mrb[4].mxu0 }
 0x1c9   : > { %v943_v1 = vadd.f32 %v941_v56, %v847_v62  ;;  %v1037_v2 = vmul.f32 %v3338_v0, %v3193_v61  ;;  %v1022_v3 = vpop.f32.mrb[5].mxu0  ;;  %v3629_v62 = vmov 1   ;;  %v3631_v0 = vmov 15  }
 0x1ca   : > { %v942_v4 = vadd.f32 %v940_v60, %v846_v63  ;;  %v1036_v6 = vmul.f32 %v3193_v61, %v1022_v3  ;;  %v3628_v61 = vmov 14   ;;  %v3630_v63 = vmov 3  }
 0x1cb   : > { %v1039_v7 = vadd.f32 %v1037_v2, %v943_v1  ;;  %v3632_v1 = vmov 4   ;;  %v3633_v2 = vmov 5   ;;  %v3634_v3 = vmov 6  }
 0x1cc   : > { %v1038_v8 = vadd.f32 %v1036_v6, %v942_v4  ;;  %v3635_v4 = vmov 7   ;;  %v3637_v6 = vmov 9  }
 0x1cd   : > { %v1048_v10 = vadd.f32 %v3194_v5, %v1039_v7  ;;  %v3638_v7 = vmov 10  }
 0x1ce   : > { %v1047_v11 = vadd.f32 %v3194_v5, %v1038_v8  ;;  %v3636_v5 = vmov 8  }
 0x1cf   : > { %v1050_v12 = vsub.f32 0.0, %v1048_v10 }
 0x1d0   : > { %v1049_v14 = vsub.f32 0.0, %v1047_v11 }
 0x1d1   : > { %v1053_v15 = vmul.f32 1.442695, %v1050_v12  ;;  %v3640_v12 = vmov 12  }
 0x1d2   : > { %v1051_v17 = vmul.f32 1.442695, %v1049_v14 }
 0x1d3   : > { %3558 = vpow2.f32 %v1053_v15  ;;  %v3641_v15 = vmov 13  }
 0x1d4   : > { %3560 = vpow2.f32 %v1051_v17 }
 0x1dd   : > { %v3559_v18 = vpop.eup %3558 }
 0x1de   : > { %v3561_v19 = vpop.eup %3560  ;;  %v1056_v20 = vadd.f32 1.0, %v3559_v18 }
 0x1df   : > { %v1055_v22 = vadd.f32 1.0, %v3561_v19 }
 0x1e0   : > { %3562 = vrcp.f32 %v1056_v20 }
 0x1e1   : > { %3564 = vrcp.f32 %v1055_v22 }
 0x1ea   : > { %v3563_v23 = vpop.eup %3562 }
 0x1eb   : > { %v3565_v27 = vpop.eup %3564  ;;  %v3852_v29 = vmul.f32 %v3563_v23, %v1048_v10  ;;  %v3639_v10 = vmov 11  }
 0x1ec   : > { %v3850_v28 = vmul.f32 %v3565_v27, %v1047_v11 }
 0x1ee   : > { %3347 = vmatprep.mubr.msk.f32.mxu1 %vm1074_vm7, %v3850_v28  ;;  %3358 = vmatprep.mubr.msk.f32.mxu0 %vm1074_vm7, %v3850_v28 }
 0x1ef   : > { %3348 = vmatmul.mubr.msk.f32.vlgmr.msra.gmra.mrb[4].mxu1 %vm1074_vm7, %v3852_v29  ;;  %3359 = vmatmul.mubr.msk.f32.vlgmr.msra.gmra.mrb[6].mxu0 %vm1074_vm7, %v3852_v29 }
 0x1f0   : > { %3502 = vmatpush3.bf16.msra.mxu1 %v3499_v47  ;;  %3369 = vmatprep.mubr.msk.f32.mxu1 %vm1074_vm7, %v3850_v28 }
 0x1f1   : > { %3504 = vmatprep.subr.bf16.mxu1 %v3503_v30  ;;  %3374 = vmatprep.mubr.msk.f32.mxu0 %vm3627_vm8, %v3624_v13 }
 0x1f4   : > { %3506 = vmatpush3.bf16.msra.mxu1 %v3503_v30  ;;  %v3916_v30 = vsub.s32 1, %v3768_v9 }
 0x1f5   : > { %3382 = vmatprep.subr.mxu1 %v3624_v13 }
 0x1f7   : > { %3370 = vmatmul.mubr.msk.f32.vlgmr.msra.gmra.mrb[6].mxu1 %vm1074_vm7, %v3852_v29 }
 0x1f8   : > { %3384 = vmatprep.mubr.msk.f32.mxu1 %vm3627_vm8, %v3624_v13 }
 0x2c2   : > { %v3349_v33 = vpop.f32.mrb[4].mxu1  ;;  %v3870_v34 = vpop.f32.mrb[6].mxu0 }
 0x2c3   : > { %v1147_v35 = vpop.f32.mrb[5].mxu1  ;;  %v3872_v36 = vpop.f32.mrb[7].mxu0  ;;  %v1153_v38 = vadd.f32 %v3349_v33, %v3195_v32  ;;  %v3922_v33 = vsub.s32 2, %v3768_v9 }
 0x2c4   : > { %v1148_v37 = vadd.f32 %v3195_v32, %v1147_v35 }
 0x2c6   : > { %1347 = vxpose.xlu0.b32.start [1/2] (short) (narrow) %v1148_v37, 8 }
 0x2ca   : > { %v3371_v40 = vpop.f32.mrb[6].mxu1  ;;  %1348 = vxpose.xlu0.b32.end [2/2] (short) (narrow) %v1153_v38, 8 }
 0x2cb   : > { %v1325_v41 = vadd.f32 %v3371_v40, %v3877_v39  ;;  %v1319_v42 = vpop.f32.mrb[7].mxu1 }
 0x2cc   : > { %v1320_v8 = vadd.f32 %v3877_v39, %v1319_v42  ;;  %v3928_v39 = vsub.s32 3, %v3768_v9 }
 0x2cd   : > { %v1331_v43 = vand.u32 2147483647, %v1325_v41  ;;  %v1329_v51 = vmax.f32 %v1325_v41, 0.0  ;;  %v3931_v41 = vsub.s32 4, %v3768_v9 }
 0x2ce   : > { %v1330_v11 = vand.u32 2147483647, %v1320_v8  ;;  %v1328_v23 = vmax.f32 %v1320_v8, 0.0 }
 0x2cf   : > { %v1333_v44 = vsub.f32 0.0, %v1331_v43 }
 0x2d0   : > { %v1332_v14 = vsub.f32 0.0, %v1330_v11 }
 0x2d1   : > { %v1336_v45 = vmul.f32 1.442695, %v1333_v44 }
 0x2d2   : > { %v1334_v17 = vmul.f32 1.442695, %v1332_v14 }
 0x2d3   : > { %3566 = vpow2.f32 %v1336_v45  ;;  %v3939_v45 = vsub.s32 5, %v3768_v9 }
 0x2dd   : > { %v3567_v46 = vpop.eup %3566 }
 0x2de   : > { %v1339_v47 = vadd.f32 1.0, %v3567_v46 }
 0x2e0   : > { %3568 = vlog2.f32 %v1339_v47 }
 0x2e1   : > { %3570 = vpow2.f32 %v1334_v17 }
 0x2ea   : > { %v3569_v49 = vpop.eup %3568 }
 0x2eb   : > { %v1343_v50 = vmul.f32 0.6931472, %v3569_v49  ;;  %v3571_v18 = vpop.eup %3570 }
 0x2ec   : > { %v1338_v19 = vadd.f32 1.0, %v3571_v18 }
 0x2ed   : > { %v3880_v52 = vadd.f32 %v1343_v50, %v1329_v51 }
 0x2ee   : > { %3572 = vlog2.f32 %v1338_v19 }
 0x2ef   : > { %v2800_v56 = vrot.slane %v3880_v52, %v3883_v53  ;;  %v2901_v57 = vrot.slane %v3880_v52, %v3886_v54 }
 0x2f1   : > { %v3898_v58 = vmul.f32 %v2800_v56, %v3891_v55  ;;  %v3901_v59 = vmul.f32 %v2901_v57, %v3891_v55 }
 0x2f3   : > { %3543 = vset.pattern.permute.xlu0 %v3626_v48 }
 0x2f8   : > { %v3573_v20 = vpop.eup %3572 }
 0x2f9   : > { %v1341_v22 = vmul.f32 0.6931472, %v3573_v20 }
 0x2fb   : > { %v3908_v24 = vadd.f32 %v1341_v22, %v1328_v23 }
 0x2fd   : > { %v1384_v27 = vrot.slane %v3908_v24, %v3911_v26  ;;  %v1487_v32 = vrot.slane %v3908_v24, %v3916_v30  ;;  %v1588_v38 = vrot.slane %v3908_v24, %v3922_v33  ;;  %v1689_v43 = vrot.slane %v3908_v24, %v3928_v39 }
 0x2fe   : > { %v1790_v44 = vrot.slane %v3908_v24, %v3931_v41  ;;  %v3943_v46 = vmul.f32 %v3908_v24, %v3850_v28  ;;  %v1891_v51 = vrot.slane %v3908_v24, %v3939_v45  ;;  %v2093_v14 = vrot.slane %v3908_v24, %v3886_v54 }
 0x2ff   : > { %v1385_v31 = vmul.f32 %v1384_v27, %v3891_v55  ;;  %v1488_v37 = vmul.f32 %v1487_v32, %v3891_v55  ;;  %v1589_v42 = vmul.f32 %v1588_v38, %v3891_v55  ;;  %v1690_v48 = vmul.f32 %v1689_v43, %v3891_v55 }
 0x300   : > { %v1791_v50 = vmul.f32 %v1790_v44, %v3891_v55  ;;  %v1392_v56 = vrot.slane %v3943_v46, %v3911_v26  ;;  %v1697_v32 = vrot.slane %v3943_v46, %v3928_v39 }
 0x301   : > { %v1386_v35 = vmul.f32 1.442695, %v1385_v31  ;;  %v1489_v40 = vmul.f32 1.442695, %v1488_v37  ;;  %v1590_v47 = vmul.f32 1.442695, %v1589_v42  ;;  %v2094_v31 = vmul.f32 %v2093_v14, %v3891_v55 }
 0x302   : > { %v1691_v57 = vmul.f32 1.442695, %v1690_v48  ;;  %v1798_v48 = vrot.slane %v3943_v46, %v3931_v41 }
 0x303   : > { %3574 = vpow2.f32 %v1386_v35  ;;  %v2194_v35 = vrot.slane %v3880_v52, %v3911_v26  ;;  %v2095_v44 = vmul.f32 1.442695, %v2094_v31 }
 0x304   : > { %3576 = vpow2.f32 %v1489_v40 }
 0x305   : > { %3578 = vpow2.f32 %v1590_v47 }
 0x306   : > { %3580 = vpow2.f32 %v1691_v57 }
 0x30d   : > { %v3575_v49 = vpop.eup %3574 }
 0x346   : > { %v1363_v60 = vpop.trf.xlu0 }
 0x347   : > { %1598 = vperm.xlu0 %3543, %v1363_v60   ;;  %1395 = vperm.xlu1 %3541, %v1363_v60  }
 0x34b   : > { %3555 = vset.pattern.permute.xlu0 %v3628_v61  ;;  %3542 = vset.pattern.permute.xlu1 %v3629_v62  ;;  %v3954_v61 = vld [vmem:[%s4188_s10] ss:$0 sm:$0xff]  ;;  %v1388_v62 = vmul.f32 0.0, %v3575_v49  ;;  %v2195_v49 = vmul.f32 %v2194_v35, %v3891_v55 }
 0x34c   : > { %2810 = vperm.xlu0 %3555, %v1363_v60   ;;  %1497 = vperm.xlu1 %3542, %v1363_v60  }
 0x350   : > { %3544 = vset.pattern.permute.xlu1 %v3630_v63  ;;  %3557 = vset.pattern.permute.xlu0 %v3631_v0 }
 0x351   : > { %1699 = vperm.xlu1 %3544, %v1363_v60  }
 0x355   : > { %3545 = vset.pattern.permute.xlu1 %v3632_v1  ;;  %v1892_v1 = vmul.f32 %v1891_v51, %v3891_v55 }
 0x356   : > { %1800 = vperm.xlu1 %3545, %v1363_v60  }
 0x35a   : > { %3546 = vset.pattern.permute.xlu1 %v3633_v2 }
 0x35b   : > { %1901 = vperm.xlu1 %3546, %v1363_v60  }
 0x35f   : > { %3547 = vset.pattern.permute.xlu1 %v3634_v3  ;;  %v1992_v3 = vrot.slane %v3908_v24, %v3883_v53 }
 0x360   : > { %2002 = vperm.xlu1 %3547, %v1363_v60  }
 0x364   : > { %3548 = vset.pattern.permute.xlu1 %v3635_v4  ;;  %v3577_v4 = vpop.eup %3576 }
 0x365   : > { %2103 = vperm.xlu1 %3548, %v1363_v60   ;;  %v3579_v18 = vpop.eup %3578 }
 0x366   : > { %v3581_v37 = vpop.eup %3580 }
 0x369   : > { %3549 = vset.pattern.permute.xlu1 %v3636_v5  ;;  %v3961_v5 = vadd.f32 %v3954_v61, %v3872_v36  ;;  %v1993_v36 = vmul.f32 %v1992_v3, %v3891_v55 }
 0x36a   : > { %2204 = vperm.xlu1 %3549, %v1363_v60  }
 0x36b   : > { %v1502_v19 = vrot.slane %v3961_v5, 1  ;;  %v1994_v27 = vmul.f32 1.442695, %v1993_v36  ;;  %v1603_v38 = vrot.slane %v3961_v5, 2  ;;  %v1704_v51 = vrot.slane %v3961_v5, 3 }
 0x36c   : > { %v1906_v14 = vrot.slane %v3961_v5, 5  ;;  %v2007_v31 = vrot.slane %v3961_v5, 6 }
 0x36e   : > { %3550 = vset.pattern.permute.xlu1 %v3637_v6  ;;  %v1495_v6 = vrot.slane %v3943_v46, %v3916_v30 }
 0x36f   : > { %2305 = vperm.xlu1 %3550, %v1363_v60  }
 0x373   : > { %3551 = vset.pattern.permute.xlu1 %v3638_v7 }
 0x374   : > { %2406 = vperm.xlu1 %3551, %v1363_v60  }
 0x378   : > { %3552 = vset.pattern.permute.xlu1 %v3639_v10 }
 0x379   : > { %2507 = vperm.xlu1 %3552, %v1363_v60  }
 0x37d   : > { %3553 = vset.pattern.permute.xlu1 %v3640_v12  ;;  %v1893_v12 = vmul.f32 1.442695, %v1892_v1  ;;  %v2196_v1 = vmul.f32 1.442695, %v2195_v49 }
 0x37e   : > { %2608 = vperm.xlu1 %3553, %v1363_v60  }
 0x382   : > { %3554 = vset.pattern.permute.xlu1 %v3641_v15  ;;  %v1596_v15 = vrot.slane %v3943_v46, %v3922_v33 }
 0x383   : > { %2709 = vperm.xlu1 %3554, %v1363_v60  }
 0x387   : > { %3556 = vset.pattern.permute.xlu1 %v3631_v0  ;;  %v1792_v0 = vmul.f32 1.442695, %v1791_v50 }
 0x388   : > { %2911 = vperm.xlu1 %3556, %v1363_v60  }
 0x389   : > { %3582 = vpow2.f32 %v1792_v0 }
 0x38a   : > { %3584 = vpow2.f32 %v1893_v12 }
 0x38b   : > { %3586 = vpow2.f32 %v1994_v27  ;;  %v2101_v27 = vrot.slane %v3943_v46, %v3886_v54 }
 0x38c   : > { %3588 = vpow2.f32 %v2095_v44 }
 0x38d   : > { %3590 = vpow2.f32 %v2196_v1 }
 0x393   : > { %v3583_v50 = vpop.eup %3582 }
 0x3c6   : > { %v1396_v60 = vpop.permute.xlu1 %1395  ;;  %v1599_v11 = vpop.permute.xlu0 %1598 }
 0x3c7   : > { %v1398_v63 = vmul.f32 %v1396_v60, %v1392_v56  ;;  %v1601_v20 = vmul.f32 %v1599_v11, %v1596_v15  ;;  %v2295_v56 = vrot.slane %v3880_v52, %v3916_v30  ;;  %v2000_v11 = vrot.slane %v3943_v46, %v3883_v53 }
 0x3c9   : > { %v1399_v2 = vadd.f32 %v1398_v63, %v1388_v62  ;;  %v1899_v62 = vrot.slane %v3943_v46, %v3939_v45  ;;  %v2598_v46 = vrot.slane %v3880_v52, %v3931_v41 }
 0x3cb   : > { %3373 = vmatpush3.msra.mxu0 %v1399_v2  ;;  %v1491_v7 = vmul.f32 %v3577_v4, %v1399_v2  ;;  %v1498_v8 = vpop.permute.xlu1 %1497  ;;  %v3585_v2 = vpop.eup %3584  ;;  %v1805_v4 = vrot.slane %v3961_v5, 4 }
 0x3cc   : > { %v1500_v10 = vmul.f32 %v1498_v8, %v1495_v6  ;;  %3375 = vmatmul.mubr.msk.f32.vlgmr.msra.gmra.mrb[8].mxu0 %vm1400_vm9, %v3961_v5  ;;  %3377 = vmatprep.subr.mxu0 %v3624_v13  ;;  %v2296_v6 = vmul.f32 %v2295_v56, %v3891_v55  ;;  %v2396_v8 = vrot.slane %v3880_v52, %v3922_v33  ;;  %v3587_v12 = vpop.eup %3586 }
 0x3cd   : > { %3379 = vmatprep.mubr.msk.f32.mxu0 %vm3627_vm8, %v3624_v13  ;;  %v2599_v56 = vmul.f32 %v2598_v46, %v3891_v55 }
 0x3ce   : > { %v1501_v17 = vadd.f32 %v1500_v10, %v1491_v7  ;;  %v2297_v15 = vmul.f32 1.442695, %v2296_v6 }
 0x3d0   : > { %v1592_v22 = vmul.f32 %v3579_v18, %v1501_v17  ;;  %3378 = vmatpush3.msra.mxu0 %v1501_v17  ;;  %v1700_v23 = vpop.permute.xlu1 %1699  ;;  %3592 = vpow2.f32 %v2297_v15  ;;  %v2802_v15 = vmul.f32 1.442695, %v3898_v58 }
 0x3d1   : > { %3380 = vmatmul.mubr.msk.f32.vlgmr.msra.gmra.mrb[10].mxu0 %vm1400_vm9, %v1502_v19  ;;  %3387 = vmatprep.subr.mxu0 %v3624_v13  ;;  %v1702_v42 = vmul.f32 %v1700_v23, %v1697_v32  ;;  %v2397_v19 = vmul.f32 %v2396_v8, %v3891_v55  ;;  %v3589_v23 = vpop.eup %3588 }
 0x3d2   : > { %v1602_v24 = vadd.f32 %v1601_v20, %v1592_v22  ;;  %3389 = vmatprep.mubr.msk.f32.mxu0 %vm3627_vm8, %v3624_v13  ;;  %v2497_v20 = vrot.slane %v3880_v52, %v3928_v39 }
 0x3d4   : > { %v1693_v40 = vmul.f32 %v3581_v37, %v1602_v24  ;;  %3383 = vmatpush3.msra.mxu1 %v1602_v24  ;;  %v4025_v24 = vmul.f32 %v3880_v52, %v3852_v29  ;;  %v2398_v37 = vmul.f32 1.442695, %v2397_v19 }
 0x3d5   : > { %3385 = vmatmul.mubr.msk.f32.vlgmr.msra.gmra.mrb[8].mxu1 %vm1400_vm9, %v1603_v38  ;;  %v1801_v43 = vpop.permute.xlu1 %1800  ;;  %3392 = vmatprep.subr.mxu1 %v3624_v13 }
 0x3d6   : > { %v1703_v47 = vadd.f32 %v1702_v42, %v1693_v40  ;;  %3394 = vmatprep.mubr.msk.f32.mxu1 %vm3627_vm8, %v3624_v13  ;;  %v1803_v60 = vmul.f32 %v1801_v43, %v1798_v48  ;;  %v2498_v40 = vmul.f32 %v2497_v20, %v3891_v55  ;;  %v3591_v43 = vpop.eup %3590  ;;  %v2202_v44 = vrot.slane %v4025_v24, %v3911_v26 }
 0x3d7   : > { %3594 = vpow2.f32 %v2398_v37  ;;  %v2808_v46 = vrot.slane %v4025_v24, %v3883_v53 }
 0x3d8   : > { %v1794_v57 = vmul.f32 %v3583_v50, %v1703_v47  ;;  %3388 = vmatpush3.msra.mxu0 %v1703_v47  ;;  %v2108_v47 = vrot.slane %v3961_v5, 7  ;;  %v2499_v50 = vmul.f32 1.442695, %v2498_v40  ;;  %v2811_v40 = vpop.permute.xlu0 %2810 }
 0x3d9   : > { %3390 = vmatmul.mubr.msk.f32.vlgmr.msra.gmra.mrb[12].mxu0 %vm1400_vm9, %v1704_v51  ;;  %3397 = vmatprep.subr.mxu0 %v3624_v13 }
 0x3da   : > { %v1804_v63 = vadd.f32 %v1803_v60, %v1794_v57  ;;  %v1902_v0 = vpop.permute.xlu1 %1901  ;;  %3399 = vmatprep.mubr.msk.f32.mxu0 %vm3627_vm8, %v3624_v13  ;;  %v2699_v57 = vrot.slane %v3880_v52, %v3939_v45  ;;  %v3593_v5 = vpop.eup %3592  ;;  %3596 = vpow2.f32 %v2499_v50  ;;  %v2909_v50 = vrot.slane %v4025_v24, %v3886_v54  ;;  %v3012_v54 = vld [vmem:[%s4193_s15] sm:$0xff] }
 0x3db   : > { %v1904_v3 = vmul.f32 %v1902_v0, %v1899_v62  ;;  %v4046_v62 = vadd.f32 %v3870_v34, %v3954_v61 }
 0x3dc   : > { %v1895_v7 = vmul.f32 %v3585_v2, %v1804_v63  ;;  %3393 = vmatpush3.msra.mxu1 %v1804_v63  ;;  %v2303_v63 = vrot.slane %v4025_v24, %v3916_v30  ;;  %v2600_v2 = vmul.f32 1.442695, %v2599_v56  ;;  %v2700_v52 = vmul.f32 %v2699_v57, %v3891_v55 }
 0x3dd   : > { %3395 = vmatmul.mubr.msk.f32.vlgmr.msra.gmra.mrb[10].mxu1 %vm1400_vm9, %v1805_v4  ;;  %3402 = vmatprep.subr.mxu1 %v3624_v13  ;;  %v2404_v30 = vrot.slane %v4025_v24, %v3922_v33  ;;  %v2310_v4 = vrot.slane %v4046_v62, 1  ;;  %v2505_v33 = vrot.slane %v4025_v24, %v3928_v39  ;;  %v2606_v39 = vrot.slane %v4025_v24, %v3931_v41 }
 0x3de   : > { %v1905_v10 = vadd.f32 %v1904_v3, %v1895_v7  ;;  %3404 = vmatprep.mubr.msk.f32.mxu1 %vm3627_vm8, %v3624_v13  ;;  %3598 = vpow2.f32 %v2600_v2  ;;  %v2701_v8 = vmul.f32 1.442695, %v2700_v52  ;;  %v2512_v20 = vrot.slane %v4046_v62, 3 }
 0x3df   : > { %v2003_v36 = vpop.permute.xlu1 %2002  ;;  %v2707_v41 = vrot.slane %v4025_v24, %v3939_v45  ;;  %v2714_v45 = vrot.slane %v4046_v62, 5  ;;  %v3014_v24 = vld [vmem:[%s4193_s15 + $0x10] sm:$0xff] }
 0x3e0   : > { %v1996_v17 = vmul.f32 %v3587_v12, %v1905_v10  ;;  %v2005_v18 = vmul.f32 %v2003_v36, %v2000_v11  ;;  %3398 = vmatpush3.msra.mxu0 %v1905_v10  ;;  %v2411_v12 = vrot.slane %v4046_v62, 2  ;;  %3600 = vpow2.f32 %v2701_v8 }
 0x3e1   : > { %3400 = vmatmul.mubr.msk.f32.vlgmr.msra.gmra.mrb[14].mxu0 %vm1400_vm9, %v1906_v14  ;;  %3407 = vmatprep.subr.mxu0 %v3624_v13  ;;  %v3595_v61 = vpop.eup %3594  ;;  %3602 = vpow2.f32 %v2802_v15 }
 0x3e2   : > { %v2006_v22 = vadd.f32 %v2005_v18, %v1996_v17  ;;  %3409 = vmatprep.mubr.msk.f32.mxu0 %vm3627_vm8, %v3624_v13 }
 0x3e4   : > { %3403 = vmatpush3.msra.mxu1 %v2006_v22  ;;  %v2097_v32 = vmul.f32 %v3589_v23, %v2006_v22  ;;  %v2104_v35 = vpop.permute.xlu1 %2103  ;;  %v3597_v11 = vpop.eup %3596  ;;  %v2903_v22 = vmul.f32 1.442695, %v3901_v59 }
 0x3e5   : > { %v2106_v38 = vmul.f32 %v2104_v35, %v2101_v27  ;;  %3405 = vmatmul.mubr.msk.f32.vlgmr.msra.gmra.mrb[12].mxu1 %vm1400_vm9, %v2007_v31  ;;  %3412 = vmatprep.subr.mxu1 %v3624_v13  ;;  %v2613_v35 = vrot.slane %v4046_v62, 4 }
 0x3e6   : > { %3414 = vmatprep.mubr.msk.f32.mxu1 %vm3627_vm8, %v3624_v13  ;;  %3604 = vpow2.f32 %v2903_v22 }
 0x3e7   : > { %v2107_v42 = vadd.f32 %v2106_v38, %v2097_v32 }
 0x3e8   : > { %v3599_v19 = vpop.eup %3598 }
 0x3e9   : > { %3408 = vmatpush3.msra.mxu0 %v2107_v42  ;;  %v2198_v48 = vmul.f32 %v3591_v43, %v2107_v42  ;;  %v2205_v49 = vpop.permute.xlu1 %2204 }
 0x3ea   : > { %v2207_v51 = vmul.f32 %v2205_v49, %v2202_v44  ;;  %3410 = vmatmul.mubr.msk.f32.vlgmr.msra.gmra.mrb[16].mxu0 %vm1400_vm9, %v2108_v47  ;;  %3417 = vmatprep.subr.mxu0 %v3624_v13  ;;  %v3601_v32 = vpop.eup %3600  ;;  %v2813_v44 = vmul.f32 %v2811_v40, %v2808_v46 }
 0x3eb   : > { %3419 = vmatprep.mubr.msk.f32.mxu0 %vm3627_vm8, %v3624_v13  ;;  %v3603_v43 = vpop.eup %3602 }
 0x3ec   : > { %v2208_v60 = vadd.f32 %v2207_v51, %v2198_v48  ;;  %v2815_v51 = vrot.slane %v4046_v62, 6 }
 0x3ee   : > { %3413 = vmatpush3.msra.mxu1 %v2208_v60  ;;  %v2299_v0 = vmul.f32 %v3593_v5, %v2208_v60  ;;  %v2306_v1 = vpop.permute.xlu1 %2305  ;;  %v2916_v5 = vrot.slane %v4046_v62, 7 }
 0x3ef   : > { %v2308_v3 = vmul.f32 %v2306_v1, %v2303_v63  ;;  %3415 = vmatmul.mubr.msk.f32.vlgmr.msra.gmra.mrb[14].mxu1 %vm1400_vm9, %v4046_v62  ;;  %3422 = vmatprep.subr.mxu1 %v3624_v13  ;;  %v3015_v62 = vld [vmem:[%s4193_s15 + $0x18] sm:$0xff]  ;;  %v3175_v1 = vld [vmem:[%s4182_s4] ss:$0 sm:$0xff] }
 0x3f0   : > { %3424 = vmatprep.mubr.msk.f32.mxu1 %vm3627_vm8, %v3624_v13  ;;  %v3605_v53 = vpop.eup %3604  ;;  %v718_v2 = vadd.f32 %v3175_v1, %v3787_v25 }
 0x3f1   : > { %v2309_v34 = vadd.f32 %v2308_v3, %v2299_v0  ;;  %v3511_v0 = vpack.c.bf16 %v3015_v62, %v3014_v24 }
 0x3f2   : > { %v726_v3 = vsub.f32 0.0, %v718_v2 }
 0x3f3   : > { %3418 = vmatpush3.msra.mxu0 %v2309_v34  ;;  %v2400_v6 = vmul.f32 %v3595_v61, %v2309_v34  ;;  %v2407_v7 = vpop.permute.xlu1 %2406 }
 0x3f4   : > { %v2409_v10 = vmul.f32 %v2407_v7, %v2404_v30  ;;  %3420 = vmatmul.mubr.msk.f32.vlgmr.msra.gmra.mrb[18].mxu0 %vm1400_vm9, %v2310_v4  ;;  %3427 = vmatprep.subr.mxu0 %v3624_v13  ;;  %v728_v61 = vmul.f32 1.442695, %v726_v3 }
 0x3f5   : > { %3429 = vmatprep.mubr.msk.f32.mxu0 %vm3627_vm8, %v3624_v13 }
 0x3f6   : > { %v2410_v55 = vadd.f32 %v2409_v10, %v2400_v6  ;;  %3606 = vpow2.f32 %v728_v61 }
 0x3f8   : > { %3423 = vmatpush3.msra.mxu1 %v2410_v55  ;;  %v2501_v36 = vmul.f32 %v3597_v11, %v2410_v55  ;;  %v2508_v14 = vpop.permute.xlu1 %2507 }
 0x3f9   : > { %v2510_v17 = vmul.f32 %v2508_v14, %v2505_v33  ;;  %3425 = vmatmul.mubr.msk.f32.vlgmr.msra.gmra.mrb[16].mxu1 %vm1400_vm9, %v2411_v12  ;;  %3432 = vmatprep.subr.mxu1 %v3624_v13 }
 0x3fa   : > { %3434 = vmatprep.mubr.msk.f32.mxu1 %vm3627_vm8, %v3624_v13 }
 0x3fb   : > { %v2511_v18 = vadd.f32 %v2510_v17, %v2501_v36 }
 0x3fd   : > { %3428 = vmatpush3.msra.mxu0 %v2511_v18  ;;  %v2602_v58 = vmul.f32 %v3599_v19, %v2511_v18  ;;  %v2609_v23 = vpop.permute.xlu1 %2608 }
 0x3fe   : > { %v2611_v27 = vmul.f32 %v2609_v23, %v2606_v39  ;;  %3430 = vmatmul.mubr.msk.f32.vlgmr.msra.gmra.mrb[20].mxu0 %vm1400_vm9, %v2512_v20  ;;  %3437 = vmatprep.subr.mxu0 %v3624_v13 }
 0x3ff   : > { %3439 = vmatprep.mubr.msk.f32.mxu0 %vm3627_vm8, %v3624_v13 }
 0x400   : > { %v2612_v31 = vadd.f32 %v2611_v27, %v2602_v58  ;;  %v3607_v18 = vpop.eup %3606 }
 0x401   : > { %v732_v23 = vadd.f32 1.0, %v3607_v18 }
 0x402   : > { %3433 = vmatpush3.msra.mxu1 %v2612_v31  ;;  %v2703_v59 = vmul.f32 %v3601_v32, %v2612_v31  ;;  %v2710_v37 = vpop.permute.xlu1 %2709 }
 0x403   : > { %v2712_v38 = vmul.f32 %v2710_v37, %v2707_v41  ;;  %3435 = vmatmul.mubr.msk.f32.vlgmr.msra.gmra.mrb[18].mxu1 %vm1400_vm9, %v2613_v35  ;;  %3442 = vmatprep.subr.mxu1 %v3624_v13  ;;  %3608 = vrcp.f32 %v732_v23 }
 0x404   : > { %3444 = vmatprep.mubr.msk.f32.mxu1 %vm3627_vm8, %v3624_v13 }
 0x405   : > { %v2713_v42 = vadd.f32 %v2712_v38, %v2703_v59 }
 0x407   : > { %v2804_v47 = vmul.f32 %v3603_v43, %v2713_v42  ;;  %3438 = vmatpush3.msra.mxu0 %v2713_v42  ;;  %v2912_v48 = vpop.permute.xlu1 %2911 }
 0x408   : > { %3440 = vmatmul.mubr.msk.f32.vlgmr.msra.gmra.mrb[22].mxu0 %vm1400_vm9, %v2714_v45  ;;  %3447 = vmatprep.subr.mxu0 %v3624_v13  ;;  %v2914_v57 = vmul.f32 %v2912_v48, %v2909_v50 }
 0x409   : > { %v2814_v49 = vadd.f32 %v2813_v44, %v2804_v47  ;;  %3449 = vmatprep.mubr.msk.f32.mxu0 %vm3627_vm8, %v3624_v13  ;;  %v3013_v13 = vld [vmem:[%s4193_s15 + $0x8] sm:$0xff]  ;;  %v4134_v47 = vld [vmem:[%s4192_s14] ss:$0 sm:$0xff]  ;;  %vm2687_vm8 = vcmp.eq.s32.totalorder %v3777_v16, 12 }
 0x40a   : > { %v3507_v63 = vpack.c.bf16 %v3013_v13, %v3012_v54 }
 0x40b   : > { %v2905_v56 = vmul.f32 %v3605_v53, %v2814_v49  ;;  %3443 = vmatpush3.msra.mxu1 %v2814_v49  ;;  %v4137_v49 = vadd.f32 %v3784_v21, %v3175_v1 }
 0x40c   : > { %3445 = vmatmul.mubr.msk.f32.vlgmr.msra.gmra.mrb[20].mxu1 %vm1400_vm9, %v2815_v51  ;;  %3508 = vmatprep.subr.bf16.mxu1 %v3507_v63 }
 0x40d   : > { %v2915_v60 = vadd.f32 %v2914_v57, %v2905_v56  ;;  %3510 = vmatpush3.bf16.msra.mxu1 %v3507_v63  ;;  %v3609_v50 = vpop.eup %3608  ;;  %v3006_v56 = vmul.f32 %v4134_v47, %v3850_v28  ;;  %v727_v9 = vsub.f32 0.0, %v4137_v49 }
 0x40e   : > { %3512 = vmatprep.subr.bf16.mxu1 %v3511_v0 }
 0x40f   : > { %3448 = vmatpush3.msra.mxu0 %v2915_v60  ;;  %v738_v60 = vmul.f32 %v3609_v50, %v718_v2  ;;  %v730_v63 = vmul.f32 1.442695, %v727_v9 }
 0x410   : > { %3450 = vmatmul.mubr.msk.f32.vlgmr.msra.gmra.mrb[24].mxu0 %vm1400_vm9, %v2916_v5  ;;  %vm2788_vm9 = vcmp.eq.s32.totalorder %v3777_v16, 13 }
 0x411   : > { %3514 = vmatpush3.bf16.msra.mxu1 %v3511_v0  ;;  %3610 = vpow2.f32 %v730_v63 }
 0x49f   : > { %v1470_v52 = vpop.f32.mrb[8].mxu0 }
 0x4a0   : > { %v3376_v34 = vpop.f32.mrb[9].mxu0  ;;  %v1479_v30 = vrot.slane %v1470_v52, %v3911_v26 }
 0x4a2   : > { %v1480_v8 = vsel %vm1474_vm10, %v1479_v30, 0.0  ;;  %vm2889_vm10 = vcmp.eq.s32.totalorder %v3777_v16, 14 }
 0x4a4   : > { %v1571_v4 = vpop.f32.mrb[10].mxu0 }
 0x4a5   : > { %v1580_v6 = vrot.slane %v1571_v4, %v3911_v26  ;;  %v3381_v7 = vpop.f32.mrb[11].mxu0 }
 0x4a7   : > { %v1581_v10 = vsel %vm1575_vm11, %v1580_v6, 0.0  ;;  %vm2990_vm11 = vcmp.eq.s32.totalorder %v3777_v16, 15  ;;  %v3221_v16 = vld [vmem:[%s4194_s16] ss:$0 sm:$0xff] }
 0x4a8   : > { %v1583_v55 = vadd.f32 %v1581_v10, %v1480_v8  ;;  %v1672_v11 = vpop.f32.mrb[8].mxu1  ;;  %v3611_v10 = vpop.eup %3610 }
 0x4a9   : > { %v1681_v25 = vrot.slane %v1672_v11, %v3911_v26  ;;  %v3386_v33 = vpop.f32.mrb[9].mxu1 }
 0x4ab   : > { %v1682_v12 = vsel %vm1676_vm12, %v1681_v25, 0.0 }
 0x4ac   : > { %v1684_v36 = vadd.f32 %v1682_v12, %v1583_v55  ;;  %v1773_v14 = vpop.f32.mrb[12].mxu0  ;;  %v733_v12 = vadd.f32 1.0, %v3611_v10 }
 0x4ad   : > { %v1782_v15 = vrot.slane %v1773_v14, %v3911_v26  ;;  %v3391_v17 = vpop.f32.mrb[13].mxu0 }
 0x4ae   : > { %3612 = vrcp.f32 %v733_v12 }
 0x4af   : > { %v1783_v19 = vsel %vm1777_vm13, %v1782_v15, 0.0 }
 0x4b0   : > { %v1785_v39 = vadd.f32 %v1783_v19, %v1684_v36  ;;  %v1874_v20 = vpop.f32.mrb[10].mxu1 }
 0x4b1   : > { %v1883_v22 = vrot.slane %v1874_v20, %v3911_v26  ;;  %v3396_v58 = vpop.f32.mrb[11].mxu1 }
 0x4b3   : > { %v1884_v27 = vsel %vm1878_vm14, %v1883_v22, 0.0 }
 0x4b4   : > { %v1886_v31 = vadd.f32 %v1884_v27, %v1785_v39  ;;  %v1975_v32 = vpop.f32.mrb[14].mxu0 }
 0x4b5   : > { %v1984_v41 = vrot.slane %v1975_v32, %v3911_v26  ;;  %v3401_v35 = vpop.f32.mrb[15].mxu0 }
 0x4b7   : > { %v1985_v59 = vsel %vm1979_vm15, %v1984_v41, 0.0 }
 0x4b8   : > { %v1987_v37 = vadd.f32 %v1985_v59, %v1886_v31  ;;  %v2076_v38 = vpop.f32.mrb[12].mxu1  ;;  %v3613_v35 = vpop.eup %3612 }
 0x4b9   : > { %v2085_v40 = vrot.slane %v2076_v38, %v3911_v26  ;;  %v3406_v46 = vpop.f32.mrb[13].mxu1  ;;  %v3007_v38 = vmul.f32 %v4134_v47, %v3852_v29  ;;  %v3614_v29 = vld [vmem:[%s3760_s26 + $0x8] sm:$0xff] }
 0x4bb   : > { %v2086_v42 = vsel %vm2080_vm1, %v2085_v40, 0.0  ;;  %v739_v40 = vmul.f32 %v3613_v35, %v4137_v49 }
 0x4bc   : > { %v2088_v43 = vadd.f32 %v2086_v42, %v1987_v37 }
 0x4bd   : > { %v2177_v45 = vpop.f32.mrb[16].mxu0 }
 0x4be   : > { %v2186_v44 = vrot.slane %v2177_v45, %v3911_v26  ;;  %v3411_v48 = vpop.f32.mrb[17].mxu0 }
 0x4bf   : > { %v3615_v48 = vld [vmem:[%s3760_s26] sm:$0xff] }
 0x4c0   : > { %v2187_v53 = vsel %vm2181_vm2, %v2186_v44, 0.0 }
 0x4c1   : > { %v2189_v51 = vadd.f32 %v2187_v53, %v2088_v43 }
 0x4c2   : > { %v2278_v57 = vpop.f32.mrb[14].mxu1 }
 0x4c3   : > { %v3008_v5 = vadd.f32 %v3006_v56, %v2189_v51  ;;  %v3416_v54 = vpop.f32.mrb[15].mxu1  ;;  %v2287_v24 = vrot.slane %v2278_v57, %v3911_v26 }
 0x4c5   : > { %v3010_v13 = vmul.f32 %v3008_v5, %v738_v60  ;;  %v2289_v0 = vsel %vm2283_vm3, %v2287_v24, 0.0 }
 0x4c7   : > { %v2379_v21 = vpop.f32.mrb[18].mxu0  ;;  %3460 = vmatprep.mubr.msk.f32.mxu1 %vm1074_vm7, %v3010_v13 }
 0x4c8   : > { %v2388_v62 = vrot.slane %v2379_v21, %v3911_v26  ;;  %v3421_v28 = vpop.f32.mrb[19].mxu0 }
 0x4ca   : > { %v2390_v1 = vsel %vm2384_vm4, %v2388_v62, 0.0 }
 0x4cb   : > { %v2392_v2 = vadd.f32 %v2390_v1, %v2289_v0 }
 0x4cc   : > { %v2480_v3 = vpop.f32.mrb[16].mxu1 }
 0x4cd   : > { %v2489_v52 = vrot.slane %v2480_v3, %v3911_v26  ;;  %v3426_v34 = vpop.f32.mrb[17].mxu1 }
 0x4cf   : > { %v2491_v61 = vsel %vm2485_vm5, %v2489_v52, 0.0 }
 0x4d0   : > { %v2493_v30 = vadd.f32 %v2491_v61, %v2392_v2 }
 0x4d1   : > { %v2581_v4 = vpop.f32.mrb[20].mxu0 }
 0x4d2   : > { %v2590_v6 = vrot.slane %v2581_v4, %v3911_v26  ;;  %v3431_v7 = vpop.f32.mrb[21].mxu0 }
 0x4d4   : > { %v2592_v8 = vsel %vm2586_vm6, %v2590_v6, 0.0 }
 0x4d5   : > { %v2594_v55 = vadd.f32 %v2592_v8, %v2493_v30 }
 0x4d6   : > { %v2682_v11 = vpop.f32.mrb[18].mxu1 }
 0x4d7   : > { %v2691_v25 = vrot.slane %v2682_v11, %v3911_v26  ;;  %v3436_v33 = vpop.f32.mrb[19].mxu1 }
 0x4d9   : > { %v2693_v36 = vsel %vm2687_vm8, %v2691_v25, 0.0 }
 0x4da   : > { %v2695_v14 = vadd.f32 %v2693_v36, %v2594_v55 }
 0x4db   : > { %v2783_v15 = vpop.f32.mrb[22].mxu0 }
 0x4dc   : > { %v2792_v17 = vrot.slane %v2783_v15, %v3911_v26  ;;  %v3441_v18 = vpop.f32.mrb[23].mxu0 }
 0x4de   : > { %v2794_v19 = vsel %vm2788_vm9, %v2792_v17, 0.0 }
 0x4df   : > { %v2796_v39 = vadd.f32 %v2794_v19, %v2695_v14  ;;  %v2884_v20 = vpop.f32.mrb[20].mxu1 }
 0x4e0   : > { %v2893_v22 = vrot.slane %v2884_v20, %v3911_v26  ;;  %v3446_v58 = vpop.f32.mrb[21].mxu1 }
 0x4e2   : > { %v2895_v23 = vsel %vm2889_vm10, %v2893_v22, 0.0 }
 0x4e3   : > { %v2897_v27 = vadd.f32 %v2895_v23, %v2796_v39  ;;  %v2985_v31 = vpop.f32.mrb[24].mxu0 }
 0x4e4   : > { %v2994_v32 = vrot.slane %v2985_v31, %v3911_v26  ;;  %v3451_v41 = vpop.f32.mrb[25].mxu0 }
 0x4e6   : > { %v2996_v59 = vsel %vm2990_vm11, %v2994_v32, 0.0 }
 0x4e7   : > { %v2998_v37 = vadd.f32 %v2996_v59, %v2897_v27 }
 0x4e9   : > { %v3009_v46 = vadd.f32 %v3007_v38, %v2998_v37 }
 0x4eb   : > { %v3011_v42 = vmul.f32 %v3009_v46, %v739_v40 }
 0x4ed   : > { %3461 = vmatmul.mubr.msk.f32.vlgmr.msra.gmra.mrb[22].mxu1 %vm1074_vm7, %v3011_v42 }
 0x5c0   : > { %v3462_v26 = vpop.f32.mrb[22].mxu1 }
 0x5c1   : > { %v3101_v43 = vadd.f32 %v3462_v26, %v3221_v16  ;;  %v3095_v45 = vpop.f32.mrb[23].mxu1 }
 0x5c2   : > { %v3096_v44 = vadd.f32 %v3221_v16, %v3095_v45 }
 0x5c3   : > { %v3105_v47 = vadd.f32 %v3614_v29, %v3101_v43 }
 0x5c4   : > { %v3104_v49 = vadd.f32 %v3615_v48, %v3096_v44 }
 0x5c5   : > { %3107 = vst.msk [vmem:[%s548_s27 + $0x8] sm:$0xff] %vm560_vm0, %v3105_v47 }
 0x5c6   : > { %3106 = vst.msk [vmem:[%s548_s27] sm:$0xff] %vm560_vm0, %v3104_v49 }
 0x5c7 PF: > { %s27_s24 = sadd.s32 1, %s3622_s24  }
 0x5c8   : > { %p24_p4 = scmp.ge.s32.totalorder %s27_s24, 18  }
 0x5ca   :  { %26 = sbr.rel (!%p24_p4) target bundleno = 3 (0x3), region = 118 }

</bundles_post_ra>
